<compile_context>
chip_gen: v6e
topology: v6e:2x2x1
jax: 0.10.0
libtpu: 0.0.40
codegen_flags: <defaults>
</compile_context>

<pallas_src>
import functools

import numpy as np

import jax
import jax.numpy as jnp
from jax.experimental import pallas as pl
from jax.experimental.pallas import tpu as pltpu


# ----------------------------------------------------------------------------
# Helpers
# ----------------------------------------------------------------------------
def _out_sz(n, k, s, p):
    return (n + 2 * p - k) // s + 1


def _make_sel(hi, wi, ho, wo, kh, kw, stride, pad, dtype):
    """sel[t] @ x_flat == tap-t rows of the im2col patch matrix (zero padding baked in)."""
    sel = np.zeros((kh * kw, ho * wo, hi * wi), dtype=np.float32)
    for dy in range(kh):
        for dx in range(kw):
            t = dy * kw + dx
            for oy in range(ho):
                iy = stride * oy - pad + dy
                if not 0 <= iy < hi:
                    continue
                for ox in range(wo):
                    ix = stride * ox - pad + dx
                    if 0 <= ix < wi:
                        sel[t, oy * wo + ox, iy * wi + ix] = 1.0
    return jnp.asarray(sel, dtype)


def _const_spec(arr):
    nd = arr.ndim
    return pl.BlockSpec(arr.shape, lambda g, _nd=nd: (0,) * _nd)


_SINGLE_TC_KINDS = ("v5 lite", "v5litepod", "v5e", "v6 lite", "v6e", "trillium")


def _auto_samples_per_step(bs):
    """Fold the whole batch into one grid step on single-TC chips (v5e/v6e)."""
    try:
        kind = jax.devices()[0].device_kind.lower()
    except Exception:
        return 1
    if any(t in kind for t in _SINGLE_TC_KINDS):
        return bs
    return 1                       # multi-TC (v4/v5p/v7x): keep parallel per-sample grid


# ----------------------------------------------------------------------------
# The fused Pallas kernel (one grid step == `sb` whole forward passes)
# ----------------------------------------------------------------------------
def _fused_forward_kernel(
    x_ref,                        # (sb, H*W, 2*input_dim)
    wf_ref,                       # fusion 1x1 conv weight (2*input_dim, input_dim)
    m1_ref, wc1_ref, bc1_ref,     # fe1: masks (9,HW,Cin), K-stacked W (9*Cin,64), bias
    s2_ref, wc2_ref, bc2_ref,     # fe2: sel (16,HW/4,HW),   W (16*64,64), bias
    s3_ref, wc3_ref, bc3_ref,     # fe3: sel (16,HW/16,HW/4),W (16*64,64), bias
    s4_ref, wc4_ref, bc4_ref,     # fe4: sel (16,1,HW/16),   W (16*64,hd), bias
    wh_ref, bh_ref,               # fused hypernetwork head (hd, n_flat), (1, n_flat)
    out_ref,                      # (sb, 1, n_flat) f32
    *, eps, shifts,
):
    f32 = jnp.float32
    cdt = wf_ref.dtype
    sb = x_ref.shape[0]

    def row_roll(x, d):
        # out[i, :] = x[(i + d) % n, :]; static sublane slices + concat (XLU/copy,
        # guaranteed lowering; keeps the spatial shift entirely off the MXU).
        n = x.shape[0]
        d = d % n
        if d == 0:
            return x
        return jnp.concatenate([x[d:, :], x[:d, :]], axis=0)

    def conv_stacked(g_blocks, w_ref, b_ref):
        # K-stacked im2col: one MXU matmul does the tap-sum in its K-reduction.
        im2col = jnp.concatenate(g_blocks, axis=1)            # (rows, taps*Cin)
        y = jnp.dot(im2col, w_ref[...], preferred_element_type=f32) + b_ref[...]
        return jnp.maximum(y, 0.0)

    def conv_sel(xin, sel_ref, w_ref, b_ref):
        # one-hot gathers (exact even in bf16) then single stacked conv matmul
        taps = sel_ref.shape[0]
        xin = xin.astype(cdt)
        g = [jnp.dot(sel_ref[t], xin) for t in range(taps)]
        return conv_stacked(g, w_ref, b_ref)

    for s in range(sb):                                        # unrolled; samples interleave
        # --- fusion: 1x1 conv (bias dropped: cancelled by InstanceNorm mean
        #     subtraction) -> InstanceNorm2d (biased var, eps, no affine) -> ReLU
        xs = x_ref[s].astype(cdt)                              # (HW, 2*input_dim)
        y = jnp.dot(xs, wf_ref[...], preferred_element_type=f32)
        mu = jnp.mean(y, axis=0, keepdims=True)
        d = y - mu
        var = jnp.mean(d * d, axis=0, keepdims=True)
        y = jnp.maximum(d * jax.lax.rsqrt(var + eps), 0.0)     # (HW, input_dim) f32

        # --- fe1: 3x3 s1 p1 via row-rotations * boundary masks, one stacked matmul
        y = y.astype(cdt)
        g1 = [row_roll(y, shifts[t]) * m1_ref[t] for t in range(len(shifts))]
        y = conv_stacked(g1, wc1_ref, bc1_ref)                 # (HW,    64)

        # --- fe2..fe4: 4x4 s2 p1 convs, gather-by-matmul + stacked matmul
        y = conv_sel(y, s2_ref, wc2_ref, bc2_ref)              # (HW/4,  64)
        y = conv_sel(y, s3_ref, wc3_ref, bc3_ref)              # (HW/16, 64)
        feat = conv_sel(y, s4_ref, wc4_ref, bc4_ref)           # (1, hidden_dim)

        # --- fused hypernetwork head: (1, hd) @ (hd, n_flat) lane-dense row
        row = jnp.dot(feat.astype(cdt), wh_ref[...],
                      preferred_element_type=f32) + bh_ref[...]
        out_ref[s] = row.astype(out_ref.dtype)


# ----------------------------------------------------------------------------
# Parameters (deterministic synthetic init; conv weights stored as (kh*kw, Cin, Cout))
# ----------------------------------------------------------------------------
def init_params(key, input_dim, hidden_dim, kernel_size, out_channels, in_channels):
    def kaiming(k, shape, fan_in):
        return jax.random.normal(k, shape, jnp.float32) * jnp.sqrt(2.0 / fan_in)

    ks = jax.random.split(key, 7)
    p = {}
    p["fusion_w"] = kaiming(ks[0], (2 * input_dim, input_dim), 2 * input_dim)  # 1x1 conv
    p["fusion_b"] = jnp.zeros((input_dim,), jnp.float32)
    p["fe1_w"] = kaiming(ks[1], (9, input_dim, 64), 9 * input_dim)
    p["fe1_b"] = jnp.zeros((64,), jnp.float32)
    p["fe2_w"] = kaiming(ks[2], (16, 64, 64), 16 * 64)
    p["fe2_b"] = jnp.zeros((64,), jnp.float32)
    p["fe3_w"] = kaiming(ks[3], (16, 64, 64), 16 * 64)
    p["fe3_b"] = jnp.zeros((64,), jnp.float32)
    p["fe4_w"] = kaiming(ks[4], (16, 64, hidden_dim), 16 * 64)
    p["fe4_b"] = jnp.zeros((hidden_dim,), jnp.float32)
    p["w1"] = kaiming(ks[5], (hidden_dim, in_channels * hidden_dim), hidden_dim)
    p["b1"] = jnp.zeros((in_channels * hidden_dim,), jnp.float32)
    p["w2"] = kaiming(ks[6], (hidden_dim, out_channels * kernel_size * kernel_size),
                      hidden_dim)
    p["b2"] = jnp.zeros((out_channels * kernel_size * kernel_size,), jnp.float32)
    return p


# ----------------------------------------------------------------------------
# Forward pass (mirrors WeightRegressor.forward) -- single fused pallas_call
# ----------------------------------------------------------------------------
def weight_regressor_forward(params, w_image_codes, w_bar_codes, *,
                             hidden_dim, kernel_size, out_channels, in_channels,
                             compute_dtype=jnp.float32, eps=1e-5,
                             samples_per_step=None):
    bs, input_dim, H, W = w_image_codes.shape
    c0 = 2 * input_dim
    hw = H * W
    cdt = compute_dtype
    f32 = jnp.float32
    hp = jax.lax.Precision.HIGHEST

    # NCHW -> per-sample (HW, 2*input_dim) rows.  This is one tiny fused XLA
    # producer (concat+transpose+reshape on ~4 KB).
    # TODO(synk): fold into the kernel (split fusion weight + trans_a dot, or
    # CompilerParams(allow_input_fusion)) to remove the last pre-kernel HBM hop.
    x = jnp.concatenate([w_image_codes, w_bar_codes], axis=1)         # (bs, 2D, H, W)
    x = jnp.transpose(x, (0, 2, 3, 1)).reshape(bs, hw, c0).astype(cdt)

    # feature-extractor spatial geometry
    h2s, w2s = _out_sz(H, 4, 2, 1), _out_sz(W, 4, 2, 1)
    h3s, w3s = _out_sz(h2s, 4, 2, 1), _out_sz(w2s, 4, 2, 1)
    h4s, w4s = _out_sz(h3s, 4, 2, 1), _out_sz(w3s, 4, 2, 1)
    assert h4s == 1 and w4s == 1, "spatial must reduce to 1x1 (reference .view requires it)"

    # fe1 (3x3 s1 p1): row-roll shifts + 0/1 boundary masks (exact in bf16)
    shifts = []
    m1 = np.zeros((9, hw, input_dim), np.float32)
    for dy in range(3):
        for dx in range(3):
            t = dy * 3 + dx
            shifts.append((dy - 1) * W + (dx - 1))
            for oy in range(H):
                for ox in range(W):
                    if 0 <= oy + dy - 1 < H and 0 <= ox + dx - 1 < W:
                        m1[t, oy * W + ox, :] = 1.0
    m1 = jnp.asarray(m1, cdt)
    shifts = tuple(shifts)

    # strided convs keep small one-hot gather matrices (exact 0/1 entries)
    sel2 = _make_sel(H, W, h2s, w2s, 4, 4, 2, 1, cdt)
    sel3 = _make_sel(h2s, w2s, h3s, w3s, 4, 4, 2, 1, cdt)
    sel4 = _make_sel(h3s, w3s, h4s, w4s, 4, 4, 2, 1, cdt)

    # K-stacked conv weights: (taps, Cin, Cout) -> (taps*Cin, Cout)
    wf = params["fusion_w"].astype(cdt)
    wc1 = params["fe1_w"].reshape(-1, 64).astype(cdt)
    wc2 = params["fe2_w"].reshape(-1, 64).astype(cdt)
    wc3 = params["fe3_w"].reshape(-1, 64).astype(cdt)
    wc4 = params["fe4_w"].reshape(-1, hidden_dim).astype(cdt)
    bc1 = params["fe1_b"].reshape(1, -1).astype(f32)
    bc2 = params["fe2_b"].reshape(1, -1).astype(f32)
    bc3 = params["fe3_b"].reshape(1, -1).astype(f32)
    bc4 = params["fe4_b"].reshape(1, -1).astype(f32)

    # hypernetwork head fusion at trace time (no nonlinearity between heads)
    n_out = out_channels * kernel_size * kernel_size
    n_in = in_channels
    n_flat = n_in * n_out
    w1r = params["w1"].reshape(hidden_dim, n_in, hidden_dim)
    wh = jnp.einsum("cih,ho->cio", w1r, params["w2"], precision=hp)
    wh = wh.reshape(hidden_dim, n_flat).astype(cdt)
    bh = (jnp.matmul(params["b1"].reshape(n_in, hidden_dim), params["w2"], precision=hp)
          + params["b2"][None, :]).reshape(1, n_flat).astype(f32)

    if samples_per_step is None:
        samples_per_step = _auto_samples_per_step(bs)
    sb = samples_per_step if (samples_per_step and bs % samples_per_step == 0) else 1
    grid = (bs // sb,)

    consts = (wf,
              m1, wc1, bc1,
              sel2, wc2, bc2,
              sel3, wc3, bc3,
              sel4, wc4, bc4,
              wh, bh)

    out = pl.pallas_call(
        functools.partial(_fused_forward_kernel, eps=eps, shifts=shifts),
        out_shape=jax.ShapeDtypeStruct((bs, 1, n_flat), f32),
        grid=grid,
        in_specs=[pl.BlockSpec((sb, hw, c0), lambda g: (g, 0, 0))]
                 + [_const_spec(a) for a in consts],
        out_specs=pl.BlockSpec((sb, 1, n_flat), lambda g: (g, 0, 0)),
        compiler_params=pltpu.CompilerParams(dimension_semantics=("parallel",)),
    )(x, *consts)

    # flat row is in-channel-major (bs, in, out*k*k); the PyTorch double .view
    # reinterprets that memory layout as (bs, out, in, k, k).
    return out.reshape(bs, out_channels, in_channels, kernel_size, kernel_size)


# ----------------------------------------------------------------------------
# Pure-JAX (non-Pallas) reference for validation
# ----------------------------------------------------------------------------
def _reference_forward(params, w_image_codes, w_bar_codes, *,
                       hidden_dim, kernel_size, out_channels, in_channels, eps=1e-5):
    hp = jax.lax.Precision.HIGHEST

    def conv(x, w_taps, b, kh, kw, stride, pad):
        cin, cout = w_taps.shape[1], w_taps.shape[2]
        w = w_taps.reshape(kh, kw, cin, cout).transpose(3, 2, 0, 1)   # OIHW
        y = jax.lax.conv_general_dilated(
            x, w, window_strides=(stride, stride),
            padding=[(pad, pad), (pad, pad)],
            dimension_numbers=("NCHW", "OIHW", "NCHW"), precision=hp)
        return y + b.reshape(1, -1, 1, 1)

    def inorm(x):
        mu = jnp.mean(x, axis=(2, 3), keepdims=True)
        var = jnp.mean((x - mu) ** 2, axis=(2, 3), keepdims=True)
        return (x - mu) * jax.lax.rsqrt(var + eps)

    bs = w_image_codes.shape[0]
    x = jnp.concatenate([w_image_codes, w_bar_codes], axis=1)
    x = conv(x, params["fusion_w"][None], params["fusion_b"], 1, 1, 1, 0)
    x = jnp.maximum(inorm(x), 0.0)
    x = jnp.maximum(conv(x, params["fe1_w"], params["fe1_b"], 3, 3, 1, 1), 0.0)
    x = jnp.maximum(conv(x, params["fe2_w"], params["fe2_b"], 4, 4, 2, 1), 0.0)
    x = jnp.maximum(conv(x, params["fe3_w"], params["fe3_b"], 4, 4, 2, 1), 0.0)
    x = jnp.maximum(conv(x, params["fe4_w"], params["fe4_b"], 4, 4, 2, 1), 0.0)
    out = x.reshape(bs, -1)
    out = jnp.matmul(out, params["w1"], precision=hp) + params["b1"]
    out = out.reshape(bs, in_channels, hidden_dim)
    out = jnp.matmul(out, params["w2"], precision=hp) + params["b2"]
    return out.reshape(bs, out_channels, in_channels, kernel_size, kernel_size)


if __name__ == "__main__":
    # Module hyperparameters (spatial 8x8 so the three stride-2 convs reduce it to 1x1).
    INPUT_DIM = 4
    HIDDEN_DIM = 32
    KERNEL_SIZE = 3
    OUT_CHANNELS = 16
    IN_CHANNELS = 16
    BS, H, W = 2, 8, 8

    key = jax.random.PRNGKey(0)
    k_params, k_img, k_bar = jax.random.split(key, 3)

    params = init_params(k_params, INPUT_DIM, HIDDEN_DIM, KERNEL_SIZE,
                         OUT_CHANNELS, IN_CHANNELS)

    # Inputs in PyTorch NCHW convention.
    w_image_codes = jax.random.normal(k_img, (BS, INPUT_DIM, H, W), jnp.float32)
    w_bar_codes = jax.random.normal(k_bar, (BS, INPUT_DIM, H, W), jnp.float32)

    fwd = jax.jit(functools.partial(
        weight_regressor_forward,
        hidden_dim=HIDDEN_DIM, kernel_size=KERNEL_SIZE,
        out_channels=OUT_CHANNELS, in_channels=IN_CHANNELS))
    # On v6e/v7x, compute_dtype=jnp.bfloat16 can be passed for bf16 MXU feeds
    # (f32 accumulation / bias / norm math are kept inside the kernel).

    kernel = fwd(params, w_image_codes, w_bar_codes)
    jax.block_until_ready(kernel)

    assert kernel.shape == (BS, OUT_CHANNELS, IN_CHANNELS, KERNEL_SIZE, KERNEL_SIZE)
    assert kernel.dtype == jnp.float32
    assert bool(jnp.all(jnp.isfinite(kernel)))

    # Validate against the pure-JAX reference.
    ref = _reference_forward(params, w_image_codes, w_bar_codes,
                             hidden_dim=HIDDEN_DIM, kernel_size=KERNEL_SIZE,
                             out_channels=OUT_CHANNELS, in_channels=IN_CHANNELS)
    jax.block_until_ready(ref)
    max_diff = float(jnp.max(jnp.abs(kernel - ref)))
    assert bool(jnp.allclose(kernel, ref, rtol=1e-2, atol=1e-2)), f"max diff {max_diff}"

    print("KERNEL_OK")
</pallas_src>

<mosaic_0001>
module attributes {stable_mosaic.version = 11 : i64} {
  func.func @_fused_forward_kernel(%arg0: i32, %arg1: memref<1x64x8xf32, #tpu.memory_space<vmem>>, %arg2: memref<8x4xf32, #tpu.memory_space<vmem>>, %arg3: memref<9x64x4xf32, #tpu.memory_space<vmem>>, %arg4: memref<36x64xf32, #tpu.memory_space<vmem>>, %arg5: memref<1x64xf32, #tpu.memory_space<vmem>>, %arg6: memref<16x16x64xf32, #tpu.memory_space<vmem>>, %arg7: memref<1024x64xf32, #tpu.memory_space<vmem>>, %arg8: memref<1x64xf32, #tpu.memory_space<vmem>>, %arg9: memref<16x4x16xf32, #tpu.memory_space<vmem>>, %arg10: memref<1024x64xf32, #tpu.memory_space<vmem>>, %arg11: memref<1x64xf32, #tpu.memory_space<vmem>>, %arg12: memref<16x1x4xf32, #tpu.memory_space<vmem>>, %arg13: memref<1024x32xf32, #tpu.memory_space<vmem>>, %arg14: memref<1x32xf32, #tpu.memory_space<vmem>>, %arg15: memref<32x2304xf32, #tpu.memory_space<vmem>>, %arg16: memref<1x2304xf32, #tpu.memory_space<vmem>>, %arg17: memref<1x1x2304xf32, #tpu.memory_space<vmem>>) attributes {dimension_semantics = [#tpu.dimension_semantics<parallel>], iteration_bounds = array<i64: 2>, scalar_prefetch = 0 : i64, scratch_operands = 0 : i64, tpu.core_type = #tpu.core_type<tc>, window_params = [{transform_indices = @transform_0, window_bounds = array<i64: 1, 64, 8>}, {pipeline_mode = #tpu.pipeline_mode<synchronous>, transform_indices = @transform_1, window_bounds = array<i64: 8, 4>}, {pipeline_mode = #tpu.pipeline_mode<synchronous>, transform_indices = @transform_2, window_bounds = array<i64: 9, 64, 4>}, {pipeline_mode = #tpu.pipeline_mode<synchronous>, transform_indices = @transform_3, window_bounds = array<i64: 36, 64>}, {pipeline_mode = #tpu.pipeline_mode<synchronous>, transform_indices = @transform_4, window_bounds = array<i64: 1, 64>}, {pipeline_mode = #tpu.pipeline_mode<synchronous>, transform_indices = @transform_5, window_bounds = array<i64: 16, 16, 64>}, {pipeline_mode = #tpu.pipeline_mode<synchronous>, transform_indices = @transform_6, window_bounds = array<i64: 1024, 64>}, {pipeline_mode = #tpu.pipeline_mode<synchronous>, transform_indices = @transform_7, window_bounds = array<i64: 1, 64>}, {pipeline_mode = #tpu.pipeline_mode<synchronous>, transform_indices = @transform_8, window_bounds = array<i64: 16, 4, 16>}, {pipeline_mode = #tpu.pipeline_mode<synchronous>, transform_indices = @transform_9, window_bounds = array<i64: 1024, 64>}, {pipeline_mode = #tpu.pipeline_mode<synchronous>, transform_indices = @transform_10, window_bounds = array<i64: 1, 64>}, {pipeline_mode = #tpu.pipeline_mode<synchronous>, transform_indices = @transform_11, window_bounds = array<i64: 16, 1, 4>}, {pipeline_mode = #tpu.pipeline_mode<synchronous>, transform_indices = @transform_12, window_bounds = array<i64: 1024, 32>}, {pipeline_mode = #tpu.pipeline_mode<synchronous>, transform_indices = @transform_13, window_bounds = array<i64: 1, 32>}, {pipeline_mode = #tpu.pipeline_mode<synchronous>, transform_indices = @transform_14, window_bounds = array<i64: 32, 2304>}, {pipeline_mode = #tpu.pipeline_mode<synchronous>, transform_indices = @transform_15, window_bounds = array<i64: 1, 2304>}, {transform_indices = @transform_16, window_bounds = array<i64: 1, 1, 2304>}]} {
    %c0 = arith.constant 0 : index
    %c0_0 = arith.constant 0 : index
    %c0_1 = arith.constant 0 : index
    %0 = vector.load %arg1[%c0, %c0_0, %c0_1] : memref<1x64x8xf32, #tpu.memory_space<vmem>>, vector<1x64x8xf32>
    %1 = vector.shape_cast %0 : vector<1x64x8xf32> to vector<64x8xf32>
    %c0_2 = arith.constant 0 : index
    %c0_3 = arith.constant 0 : index
    %2 = vector.load %arg2[%c0_2, %c0_3] : memref<8x4xf32, #tpu.memory_space<vmem>>, vector<8x4xf32>
    %cst = arith.constant dense<0.000000e+00> : vector<64x4xf32>
    %3 = tpu.matmul %1, %2, %cst {dimension_numbers = #tpu.dot_dimension_numbers<[1], [0], [0], [1], [0, 0, 1, 1], [], []>} : vector<64x8xf32>, vector<8x4xf32>, vector<64x4xf32> -> vector<64x4xf32>
    %cst_4 = arith.constant dense<0.000000e+00> : vector<4xf32>
    %4 = vector.multi_reduction <add>, %3, %cst_4 [0] : vector<64x4xf32> to vector<4xf32>
    %5 = vector.shape_cast %4 : vector<4xf32> to vector<1x4xf32>
    %cst_5 = arith.constant 6.400000e+01 : f32
    %6 = vector.broadcast %cst_5 : f32 to vector<1x4xf32>
    %7 = arith.divf %5, %6 : vector<1x4xf32>
    %8 = vector.broadcast %7 : vector<1x4xf32> to vector<64x4xf32>
    %9 = arith.subf %3, %8 : vector<64x4xf32>
    %10 = arith.mulf %9, %9 : vector<64x4xf32>
    %cst_6 = arith.constant dense<0.000000e+00> : vector<4xf32>
    %11 = vector.multi_reduction <add>, %10, %cst_6 [0] : vector<64x4xf32> to vector<4xf32>
    %12 = vector.shape_cast %11 : vector<4xf32> to vector<1x4xf32>
    %cst_7 = arith.constant 6.400000e+01 : f32
    %13 = vector.broadcast %cst_7 : f32 to vector<1x4xf32>
    %14 = arith.divf %12, %13 : vector<1x4xf32>
    %cst_8 = arith.constant 9.99999974E-6 : f32
    %15 = vector.broadcast %cst_8 : f32 to vector<1x4xf32>
    %16 = arith.addf %14, %15 : vector<1x4xf32>
    %17 = math.rsqrt %16 : vector<1x4xf32>
    %18 = vector.broadcast %17 : vector<1x4xf32> to vector<64x4xf32>
    %19 = arith.mulf %9, %18 : vector<64x4xf32>
    %cst_9 = arith.constant 0.000000e+00 : f32
    %20 = vector.broadcast %cst_9 : f32 to vector<64x4xf32>
    %21 = arith.maximumf %19, %20 : vector<64x4xf32>
    %22 = vector.extract_strided_slice %21 {offsets = [55, 0], sizes = [9, 4], strides = [1, 1]} : vector<64x4xf32> to vector<9x4xf32>
    %23 = vector.extract_strided_slice %21 {offsets = [0, 0], sizes = [55, 4], strides = [1, 1]} : vector<64x4xf32> to vector<55x4xf32>
    %24 = tpu.concatenate %22, %23 in 0 : vector<9x4xf32>, vector<55x4xf32> -> vector<64x4xf32>
    %c0_10 = arith.constant 0 : index
    %c0_11 = arith.constant 0 : index
    %c0_12 = arith.constant 0 : index
    %25 = vector.load %arg3[%c0_10, %c0_11, %c0_12] : memref<9x64x4xf32, #tpu.memory_space<vmem>>, vector<1x64x4xf32>
    %26 = vector.shape_cast %25 : vector<1x64x4xf32> to vector<64x4xf32>
    %27 = arith.mulf %24, %26 : vector<64x4xf32>
    %28 = vector.extract_strided_slice %21 {offsets = [56, 0], sizes = [8, 4], strides = [1, 1]} : vector<64x4xf32> to vector<8x4xf32>
    %29 = vector.extract_strided_slice %21 {offsets = [0, 0], sizes = [56, 4], strides = [1, 1]} : vector<64x4xf32> to vector<56x4xf32>
    %30 = tpu.concatenate %28, %29 in 0 : vector<8x4xf32>, vector<56x4xf32> -> vector<64x4xf32>
    %c1 = arith.constant 1 : index
    %c0_13 = arith.constant 0 : index
    %c0_14 = arith.constant 0 : index
    %31 = vector.load %arg3[%c1, %c0_13, %c0_14] : memref<9x64x4xf32, #tpu.memory_space<vmem>>, vector<1x64x4xf32>
    %32 = vector.shape_cast %31 : vector<1x64x4xf32> to vector<64x4xf32>
    %33 = arith.mulf %30, %32 : vector<64x4xf32>
    %34 = vector.extract_strided_slice %21 {offsets = [57, 0], sizes = [7, 4], strides = [1, 1]} : vector<64x4xf32> to vector<7x4xf32>
    %35 = vector.extract_strided_slice %21 {offsets = [0, 0], sizes = [57, 4], strides = [1, 1]} : vector<64x4xf32> to vector<57x4xf32>
    %36 = tpu.concatenate %34, %35 in 0 : vector<7x4xf32>, vector<57x4xf32> -> vector<64x4xf32>
    %c2 = arith.constant 2 : index
    %c0_15 = arith.constant 0 : index
    %c0_16 = arith.constant 0 : index
    %37 = vector.load %arg3[%c2, %c0_15, %c0_16] : memref<9x64x4xf32, #tpu.memory_space<vmem>>, vector<1x64x4xf32>
    %38 = vector.shape_cast %37 : vector<1x64x4xf32> to vector<64x4xf32>
    %39 = arith.mulf %36, %38 : vector<64x4xf32>
    %40 = vector.extract_strided_slice %21 {offsets = [63, 0], sizes = [1, 4], strides = [1, 1]} : vector<64x4xf32> to vector<1x4xf32>
    %41 = vector.extract_strided_slice %21 {offsets = [0, 0], sizes = [63, 4], strides = [1, 1]} : vector<64x4xf32> to vector<63x4xf32>
    %42 = tpu.concatenate %40, %41 in 0 : vector<1x4xf32>, vector<63x4xf32> -> vector<64x4xf32>
    %c3 = arith.constant 3 : index
    %c0_17 = arith.constant 0 : index
    %c0_18 = arith.constant 0 : index
    %43 = vector.load %arg3[%c3, %c0_17, %c0_18] : memref<9x64x4xf32, #tpu.memory_space<vmem>>, vector<1x64x4xf32>
    %44 = vector.shape_cast %43 : vector<1x64x4xf32> to vector<64x4xf32>
    %45 = arith.mulf %42, %44 : vector<64x4xf32>
    %c4 = arith.constant 4 : index
    %c0_19 = arith.constant 0 : index
    %c0_20 = arith.constant 0 : index
    %46 = vector.load %arg3[%c4, %c0_19, %c0_20] : memref<9x64x4xf32, #tpu.memory_space<vmem>>, vector<1x64x4xf32>
    %47 = vector.shape_cast %46 : vector<1x64x4xf32> to vector<64x4xf32>
    %48 = arith.mulf %21, %47 : vector<64x4xf32>
    %49 = vector.extract_strided_slice %21 {offsets = [1, 0], sizes = [63, 4], strides = [1, 1]} : vector<64x4xf32> to vector<63x4xf32>
    %50 = vector.extract_strided_slice %21 {offsets = [0, 0], sizes = [1, 4], strides = [1, 1]} : vector<64x4xf32> to vector<1x4xf32>
    %51 = tpu.concatenate %49, %50 in 0 : vector<63x4xf32>, vector<1x4xf32> -> vector<64x4xf32>
    %c5 = arith.constant 5 : index
    %c0_21 = arith.constant 0 : index
    %c0_22 = arith.constant 0 : index
    %52 = vector.load %arg3[%c5, %c0_21, %c0_22] : memref<9x64x4xf32, #tpu.memory_space<vmem>>, vector<1x64x4xf32>
    %53 = vector.shape_cast %52 : vector<1x64x4xf32> to vector<64x4xf32>
    %54 = arith.mulf %51, %53 : vector<64x4xf32>
    %55 = vector.extract_strided_slice %21 {offsets = [7, 0], sizes = [57, 4], strides = [1, 1]} : vector<64x4xf32> to vector<57x4xf32>
    %56 = vector.extract_strided_slice %21 {offsets = [0, 0], sizes = [7, 4], strides = [1, 1]} : vector<64x4xf32> to vector<7x4xf32>
    %57 = tpu.concatenate %55, %56 in 0 : vector<57x4xf32>, vector<7x4xf32> -> vector<64x4xf32>
    %c6 = arith.constant 6 : index
    %c0_23 = arith.constant 0 : index
    %c0_24 = arith.constant 0 : index
    %58 = vector.load %arg3[%c6, %c0_23, %c0_24] : memref<9x64x4xf32, #tpu.memory_space<vmem>>, vector<1x64x4xf32>
    %59 = vector.shape_cast %58 : vector<1x64x4xf32> to vector<64x4xf32>
    %60 = arith.mulf %57, %59 : vector<64x4xf32>
    %61 = vector.extract_strided_slice %21 {offsets = [8, 0], sizes = [56, 4], strides = [1, 1]} : vector<64x4xf32> to vector<56x4xf32>
    %62 = vector.extract_strided_slice %21 {offsets = [0, 0], sizes = [8, 4], strides = [1, 1]} : vector<64x4xf32> to vector<8x4xf32>
    %63 = tpu.concatenate %61, %62 in 0 : vector<56x4xf32>, vector<8x4xf32> -> vector<64x4xf32>
    %c7 = arith.constant 7 : index
    %c0_25 = arith.constant 0 : index
    %c0_26 = arith.constant 0 : index
    %64 = vector.load %arg3[%c7, %c0_25, %c0_26] : memref<9x64x4xf32, #tpu.memory_space<vmem>>, vector<1x64x4xf32>
    %65 = vector.shape_cast %64 : vector<1x64x4xf32> to vector<64x4xf32>
    %66 = arith.mulf %63, %65 : vector<64x4xf32>
    %67 = vector.extract_strided_slice %21 {offsets = [9, 0], sizes = [55, 4], strides = [1, 1]} : vector<64x4xf32> to vector<55x4xf32>
    %68 = vector.extract_strided_slice %21 {offsets = [0, 0], sizes = [9, 4], strides = [1, 1]} : vector<64x4xf32> to vector<9x4xf32>
    %69 = tpu.concatenate %67, %68 in 0 : vector<55x4xf32>, vector<9x4xf32> -> vector<64x4xf32>
    %c8 = arith.constant 8 : index
    %c0_27 = arith.constant 0 : index
    %c0_28 = arith.constant 0 : index
    %70 = vector.load %arg3[%c8, %c0_27, %c0_28] : memref<9x64x4xf32, #tpu.memory_space<vmem>>, vector<1x64x4xf32>
    %71 = vector.shape_cast %70 : vector<1x64x4xf32> to vector<64x4xf32>
    %72 = arith.mulf %69, %71 : vector<64x4xf32>
    %73 = tpu.concatenate %27, %33, %39, %45, %48, %54, %60, %66, %72 in 1 : vector<64x4xf32>, vector<64x4xf32>, vector<64x4xf32>, vector<64x4xf32>, vector<64x4xf32>, vector<64x4xf32>, vector<64x4xf32>, vector<64x4xf32>, vector<64x4xf32> -> vector<64x36xf32>
    %c0_29 = arith.constant 0 : index
    %c0_30 = arith.constant 0 : index
    %74 = vector.load %arg4[%c0_29, %c0_30] : memref<36x64xf32, #tpu.memory_space<vmem>>, vector<36x64xf32>
    %cst_31 = arith.constant dense<0.000000e+00> : vector<64x64xf32>
    %75 = tpu.matmul %73, %74, %cst_31 {dimension_numbers = #tpu.dot_dimension_numbers<[1], [0], [0], [1], [0, 0, 1, 1], [], []>} : vector<64x36xf32>, vector<36x64xf32>, vector<64x64xf32> -> vector<64x64xf32>
    %c0_32 = arith.constant 0 : index
    %c0_33 = arith.constant 0 : index
    %76 = vector.load %arg5[%c0_32, %c0_33] : memref<1x64xf32, #tpu.memory_space<vmem>>, vector<1x64xf32>
    %77 = vector.broadcast %76 : vector<1x64xf32> to vector<64x64xf32>
    %78 = arith.addf %75, %77 : vector<64x64xf32>
    %cst_34 = arith.constant 0.000000e+00 : f32
    %79 = vector.broadcast %cst_34 : f32 to vector<64x64xf32>
    %80 = arith.maximumf %78, %79 : vector<64x64xf32>
    %c0_35 = arith.constant 0 : index
    %c0_36 = arith.constant 0 : index
    %c0_37 = arith.constant 0 : index
    %81 = vector.load %arg6[%c0_35, %c0_36, %c0_37] : memref<16x16x64xf32, #tpu.memory_space<vmem>>, vector<1x16x64xf32>
    %82 = vector.shape_cast %81 : vector<1x16x64xf32> to vector<16x64xf32>
    %cst_38 = arith.constant dense<0.000000e+00> : vector<16x64xf32>
    %83 = tpu.matmul %82, %80, %cst_38 {dimension_numbers = #tpu.dot_dimension_numbers<[1], [0], [0], [1], [0, 0, 1, 1], [], []>} : vector<16x64xf32>, vector<64x64xf32>, vector<16x64xf32> -> vector<16x64xf32>
    %c1_39 = arith.constant 1 : index
    %c0_40 = arith.constant 0 : index
    %c0_41 = arith.constant 0 : index
    %84 = vector.load %arg6[%c1_39, %c0_40, %c0_41] : memref<16x16x64xf32, #tpu.memory_space<vmem>>, vector<1x16x64xf32>
    %85 = vector.shape_cast %84 : vector<1x16x64xf32> to vector<16x64xf32>
    %cst_42 = arith.constant dense<0.000000e+00> : vector<16x64xf32>
    %86 = tpu.matmul %85, %80, %cst_42 {dimension_numbers = #tpu.dot_dimension_numbers<[1], [0], [0], [1], [0, 0, 1, 1], [], []>} : vector<16x64xf32>, vector<64x64xf32>, vector<16x64xf32> -> vector<16x64xf32>
    %c2_43 = arith.constant 2 : index
    %c0_44 = arith.constant 0 : index
    %c0_45 = arith.constant 0 : index
    %87 = vector.load %arg6[%c2_43, %c0_44, %c0_45] : memref<16x16x64xf32, #tpu.memory_space<vmem>>, vector<1x16x64xf32>
    %88 = vector.shape_cast %87 : vector<1x16x64xf32> to vector<16x64xf32>
    %cst_46 = arith.constant dense<0.000000e+00> : vector<16x64xf32>
    %89 = tpu.matmul %88, %80, %cst_46 {dimension_numbers = #tpu.dot_dimension_numbers<[1], [0], [0], [1], [0, 0, 1, 1], [], []>} : vector<16x64xf32>, vector<64x64xf32>, vector<16x64xf32> -> vector<16x64xf32>
    %c3_47 = arith.constant 3 : index
    %c0_48 = arith.constant 0 : index
    %c0_49 = arith.constant 0 : index
    %90 = vector.load %arg6[%c3_47, %c0_48, %c0_49] : memref<16x16x64xf32, #tpu.memory_space<vmem>>, vector<1x16x64xf32>
    %91 = vector.shape_cast %90 : vector<1x16x64xf32> to vector<16x64xf32>
    %cst_50 = arith.constant dense<0.000000e+00> : vector<16x64xf32>
    %92 = tpu.matmul %91, %80, %cst_50 {dimension_numbers = #tpu.dot_dimension_numbers<[1], [0], [0], [1], [0, 0, 1, 1], [], []>} : vector<16x64xf32>, vector<64x64xf32>, vector<16x64xf32> -> vector<16x64xf32>
    %c4_51 = arith.constant 4 : index
    %c0_52 = arith.constant 0 : index
    %c0_53 = arith.constant 0 : index
    %93 = vector.load %arg6[%c4_51, %c0_52, %c0_53] : memref<16x16x64xf32, #tpu.memory_space<vmem>>, vector<1x16x64xf32>
    %94 = vector.shape_cast %93 : vector<1x16x64xf32> to vector<16x64xf32>
    %cst_54 = arith.constant dense<0.000000e+00> : vector<16x64xf32>
    %95 = tpu.matmul %94, %80, %cst_54 {dimension_numbers = #tpu.dot_dimension_numbers<[1], [0], [0], [1], [0, 0, 1, 1], [], []>} : vector<16x64xf32>, vector<64x64xf32>, vector<16x64xf32> -> vector<16x64xf32>
    %c5_55 = arith.constant 5 : index
    %c0_56 = arith.constant 0 : index
    %c0_57 = arith.constant 0 : index
    %96 = vector.load %arg6[%c5_55, %c0_56, %c0_57] : memref<16x16x64xf32, #tpu.memory_space<vmem>>, vector<1x16x64xf32>
    %97 = vector.shape_cast %96 : vector<1x16x64xf32> to vector<16x64xf32>
    %cst_58 = arith.constant dense<0.000000e+00> : vector<16x64xf32>
    %98 = tpu.matmul %97, %80, %cst_58 {dimension_numbers = #tpu.dot_dimension_numbers<[1], [0], [0], [1], [0, 0, 1, 1], [], []>} : vector<16x64xf32>, vector<64x64xf32>, vector<16x64xf32> -> vector<16x64xf32>
    %c6_59 = arith.constant 6 : index
    %c0_60 = arith.constant 0 : index
    %c0_61 = arith.constant 0 : index
    %99 = vector.load %arg6[%c6_59, %c0_60, %c0_61] : memref<16x16x64xf32, #tpu.memory_space<vmem>>, vector<1x16x64xf32>
    %100 = vector.shape_cast %99 : vector<1x16x64xf32> to vector<16x64xf32>
    %cst_62 = arith.constant dense<0.000000e+00> : vector<16x64xf32>
    %101 = tpu.matmul %100, %80, %cst_62 {dimension_numbers = #tpu.dot_dimension_numbers<[1], [0], [0], [1], [0, 0, 1, 1], [], []>} : vector<16x64xf32>, vector<64x64xf32>, vector<16x64xf32> -> vector<16x64xf32>
    %c7_63 = arith.constant 7 : index
    %c0_64 = arith.constant 0 : index
    %c0_65 = arith.constant 0 : index
    %102 = vector.load %arg6[%c7_63, %c0_64, %c0_65] : memref<16x16x64xf32, #tpu.memory_space<vmem>>, vector<1x16x64xf32>
    %103 = vector.shape_cast %102 : vector<1x16x64xf32> to vector<16x64xf32>
    %cst_66 = arith.constant dense<0.000000e+00> : vector<16x64xf32>
    %104 = tpu.matmul %103, %80, %cst_66 {dimension_numbers = #tpu.dot_dimension_numbers<[1], [0], [0], [1], [0, 0, 1, 1], [], []>} : vector<16x64xf32>, vector<64x64xf32>, vector<16x64xf32> -> vector<16x64xf32>
    %c8_67 = arith.constant 8 : index
    %c0_68 = arith.constant 0 : index
    %c0_69 = arith.constant 0 : index
    %105 = vector.load %arg6[%c8_67, %c0_68, %c0_69] : memref<16x16x64xf32, #tpu.memory_space<vmem>>, vector<1x16x64xf32>
    %106 = vector.shape_cast %105 : vector<1x16x64xf32> to vector<16x64xf32>
    %cst_70 = arith.constant dense<0.000000e+00> : vector<16x64xf32>
    %107 = tpu.matmul %106, %80, %cst_70 {dimension_numbers = #tpu.dot_dimension_numbers<[1], [0], [0], [1], [0, 0, 1, 1], [], []>} : vector<16x64xf32>, vector<64x64xf32>, vector<16x64xf32> -> vector<16x64xf32>
    %c9 = arith.constant 9 : index
    %c0_71 = arith.constant 0 : index
    %c0_72 = arith.constant 0 : index
    %108 = vector.load %arg6[%c9, %c0_71, %c0_72] : memref<16x16x64xf32, #tpu.memory_space<vmem>>, vector<1x16x64xf32>
    %109 = vector.shape_cast %108 : vector<1x16x64xf32> to vector<16x64xf32>
    %cst_73 = arith.constant dense<0.000000e+00> : vector<16x64xf32>
    %110 = tpu.matmul %109, %80, %cst_73 {dimension_numbers = #tpu.dot_dimension_numbers<[1], [0], [0], [1], [0, 0, 1, 1], [], []>} : vector<16x64xf32>, vector<64x64xf32>, vector<16x64xf32> -> vector<16x64xf32>
    %c10 = arith.constant 10 : index
    %c0_74 = arith.constant 0 : index
    %c0_75 = arith.constant 0 : index
    %111 = vector.load %arg6[%c10, %c0_74, %c0_75] : memref<16x16x64xf32, #tpu.memory_space<vmem>>, vector<1x16x64xf32>
    %112 = vector.shape_cast %111 : vector<1x16x64xf32> to vector<16x64xf32>
    %cst_76 = arith.constant dense<0.000000e+00> : vector<16x64xf32>
    %113 = tpu.matmul %112, %80, %cst_76 {dimension_numbers = #tpu.dot_dimension_numbers<[1], [0], [0], [1], [0, 0, 1, 1], [], []>} : vector<16x64xf32>, vector<64x64xf32>, vector<16x64xf32> -> vector<16x64xf32>
    %c11 = arith.constant 11 : index
    %c0_77 = arith.constant 0 : index
    %c0_78 = arith.constant 0 : index
    %114 = vector.load %arg6[%c11, %c0_77, %c0_78] : memref<16x16x64xf32, #tpu.memory_space<vmem>>, vector<1x16x64xf32>
    %115 = vector.shape_cast %114 : vector<1x16x64xf32> to vector<16x64xf32>
    %cst_79 = arith.constant dense<0.000000e+00> : vector<16x64xf32>
    %116 = tpu.matmul %115, %80, %cst_79 {dimension_numbers = #tpu.dot_dimension_numbers<[1], [0], [0], [1], [0, 0, 1, 1], [], []>} : vector<16x64xf32>, vector<64x64xf32>, vector<16x64xf32> -> vector<16x64xf32>
    %c12 = arith.constant 12 : index
    %c0_80 = arith.constant 0 : index
    %c0_81 = arith.constant 0 : index
    %117 = vector.load %arg6[%c12, %c0_80, %c0_81] : memref<16x16x64xf32, #tpu.memory_space<vmem>>, vector<1x16x64xf32>
    %118 = vector.shape_cast %117 : vector<1x16x64xf32> to vector<16x64xf32>
    %cst_82 = arith.constant dense<0.000000e+00> : vector<16x64xf32>
    %119 = tpu.matmul %118, %80, %cst_82 {dimension_numbers = #tpu.dot_dimension_numbers<[1], [0], [0], [1], [0, 0, 1, 1], [], []>} : vector<16x64xf32>, vector<64x64xf32>, vector<16x64xf32> -> vector<16x64xf32>
    %c13 = arith.constant 13 : index
    %c0_83 = arith.constant 0 : index
    %c0_84 = arith.constant 0 : index
    %120 = vector.load %arg6[%c13, %c0_83, %c0_84] : memref<16x16x64xf32, #tpu.memory_space<vmem>>, vector<1x16x64xf32>
    %121 = vector.shape_cast %120 : vector<1x16x64xf32> to vector<16x64xf32>
    %cst_85 = arith.constant dense<0.000000e+00> : vector<16x64xf32>
    %122 = tpu.matmul %121, %80, %cst_85 {dimension_numbers = #tpu.dot_dimension_numbers<[1], [0], [0], [1], [0, 0, 1, 1], [], []>} : vector<16x64xf32>, vector<64x64xf32>, vector<16x64xf32> -> vector<16x64xf32>
    %c14 = arith.constant 14 : index
    %c0_86 = arith.constant 0 : index
    %c0_87 = arith.constant 0 : index
    %123 = vector.load %arg6[%c14, %c0_86, %c0_87] : memref<16x16x64xf32, #tpu.memory_space<vmem>>, vector<1x16x64xf32>
    %124 = vector.shape_cast %123 : vector<1x16x64xf32> to vector<16x64xf32>
    %cst_88 = arith.constant dense<0.000000e+00> : vector<16x64xf32>
    %125 = tpu.matmul %124, %80, %cst_88 {dimension_numbers = #tpu.dot_dimension_numbers<[1], [0], [0], [1], [0, 0, 1, 1], [], []>} : vector<16x64xf32>, vector<64x64xf32>, vector<16x64xf32> -> vector<16x64xf32>
    %c15 = arith.constant 15 : index
    %c0_89 = arith.constant 0 : index
    %c0_90 = arith.constant 0 : index
    %126 = vector.load %arg6[%c15, %c0_89, %c0_90] : memref<16x16x64xf32, #tpu.memory_space<vmem>>, vector<1x16x64xf32>
    %127 = vector.shape_cast %126 : vector<1x16x64xf32> to vector<16x64xf32>
    %cst_91 = arith.constant dense<0.000000e+00> : vector<16x64xf32>
    %128 = tpu.matmul %127, %80, %cst_91 {dimension_numbers = #tpu.dot_dimension_numbers<[1], [0], [0], [1], [0, 0, 1, 1], [], []>} : vector<16x64xf32>, vector<64x64xf32>, vector<16x64xf32> -> vector<16x64xf32>
    %129 = tpu.concatenate %83, %86, %89, %92, %95, %98, %101, %104, %107, %110, %113, %116, %119, %122, %125, %128 in 1 : vector<16x64xf32>, vector<16x64xf32>, vector<16x64xf32>, vector<16x64xf32>, vector<16x64xf32>, vector<16x64xf32>, vector<16x64xf32>, vector<16x64xf32>, vector<16x64xf32>, vector<16x64xf32>, vector<16x64xf32>, vector<16x64xf32>, vector<16x64xf32>, vector<16x64xf32>, vector<16x64xf32>, vector<16x64xf32> -> vector<16x1024xf32>
    %c0_92 = arith.constant 0 : index
    %c0_93 = arith.constant 0 : index
    %130 = vector.load %arg7[%c0_92, %c0_93] : memref<1024x64xf32, #tpu.memory_space<vmem>>, vector<1024x64xf32>
    %cst_94 = arith.constant dense<0.000000e+00> : vector<16x64xf32>
    %131 = tpu.matmul %129, %130, %cst_94 {dimension_numbers = #tpu.dot_dimension_numbers<[1], [0], [0], [1], [0, 0, 1, 1], [], []>} : vector<16x1024xf32>, vector<1024x64xf32>, vector<16x64xf32> -> vector<16x64xf32>
    %c0_95 = arith.constant 0 : index
    %c0_96 = arith.constant 0 : index
    %132 = vector.load %arg8[%c0_95, %c0_96] : memref<1x64xf32, #tpu.memory_space<vmem>>, vector<1x64xf32>
    %133 = vector.broadcast %132 : vector<1x64xf32> to vector<16x64xf32>
    %134 = arith.addf %131, %133 : vector<16x64xf32>
    %cst_97 = arith.constant 0.000000e+00 : f32
    %135 = vector.broadcast %cst_97 : f32 to vector<16x64xf32>
    %136 = arith.maximumf %134, %135 : vector<16x64xf32>
    %c0_98 = arith.constant 0 : index
    %c0_99 = arith.constant 0 : index
    %c0_100 = arith.constant 0 : index
    %137 = vector.load %arg9[%c0_98, %c0_99, %c0_100] : memref<16x4x16xf32, #tpu.memory_space<vmem>>, vector<1x4x16xf32>
    %138 = vector.shape_cast %137 : vector<1x4x16xf32> to vector<4x16xf32>
    %cst_101 = arith.constant dense<0.000000e+00> : vector<4x64xf32>
    %139 = tpu.matmul %138, %136, %cst_101 {dimension_numbers = #tpu.dot_dimension_numbers<[1], [0], [0], [1], [0, 0, 1, 1], [], []>} : vector<4x16xf32>, vector<16x64xf32>, vector<4x64xf32> -> vector<4x64xf32>
    %c1_102 = arith.constant 1 : index
    %c0_103 = arith.constant 0 : index
    %c0_104 = arith.constant 0 : index
    %140 = vector.load %arg9[%c1_102, %c0_103, %c0_104] : memref<16x4x16xf32, #tpu.memory_space<vmem>>, vector<1x4x16xf32>
    %141 = vector.shape_cast %140 : vector<1x4x16xf32> to vector<4x16xf32>
    %cst_105 = arith.constant dense<0.000000e+00> : vector<4x64xf32>
    %142 = tpu.matmul %141, %136, %cst_105 {dimension_numbers = #tpu.dot_dimension_numbers<[1], [0], [0], [1], [0, 0, 1, 1], [], []>} : vector<4x16xf32>, vector<16x64xf32>, vector<4x64xf32> -> vector<4x64xf32>
    %c2_106 = arith.constant 2 : index
    %c0_107 = arith.constant 0 : index
    %c0_108 = arith.constant 0 : index
    %143 = vector.load %arg9[%c2_106, %c0_107, %c0_108] : memref<16x4x16xf32, #tpu.memory_space<vmem>>, vector<1x4x16xf32>
    %144 = vector.shape_cast %143 : vector<1x4x16xf32> to vector<4x16xf32>
    %cst_109 = arith.constant dense<0.000000e+00> : vector<4x64xf32>
    %145 = tpu.matmul %144, %136, %cst_109 {dimension_numbers = #tpu.dot_dimension_numbers<[1], [0], [0], [1], [0, 0, 1, 1], [], []>} : vector<4x16xf32>, vector<16x64xf32>, vector<4x64xf32> -> vector<4x64xf32>
    %c3_110 = arith.constant 3 : index
    %c0_111 = arith.constant 0 : index
    %c0_112 = arith.constant 0 : index
    %146 = vector.load %arg9[%c3_110, %c0_111, %c0_112] : memref<16x4x16xf32, #tpu.memory_space<vmem>>, vector<1x4x16xf32>
    %147 = vector.shape_cast %146 : vector<1x4x16xf32> to vector<4x16xf32>
    %cst_113 = arith.constant dense<0.000000e+00> : vector<4x64xf32>
    %148 = tpu.matmul %147, %136, %cst_113 {dimension_numbers = #tpu.dot_dimension_numbers<[1], [0], [0], [1], [0, 0, 1, 1], [], []>} : vector<4x16xf32>, vector<16x64xf32>, vector<4x64xf32> -> vector<4x64xf32>
    %c4_114 = arith.constant 4 : index
    %c0_115 = arith.constant 0 : index
    %c0_116 = arith.constant 0 : index
    %149 = vector.load %arg9[%c4_114, %c0_115, %c0_116] : memref<16x4x16xf32, #tpu.memory_space<vmem>>, vector<1x4x16xf32>
    %150 = vector.shape_cast %149 : vector<1x4x16xf32> to vector<4x16xf32>
    %cst_117 = arith.constant dense<0.000000e+00> : vector<4x64xf32>
    %151 = tpu.matmul %150, %136, %cst_117 {dimension_numbers = #tpu.dot_dimension_numbers<[1], [0], [0], [1], [0, 0, 1, 1], [], []>} : vector<4x16xf32>, vector<16x64xf32>, vector<4x64xf32> -> vector<4x64xf32>
    %c5_118 = arith.constant 5 : index
    %c0_119 = arith.constant 0 : index
    %c0_120 = arith.constant 0 : index
    %152 = vector.load %arg9[%c5_118, %c0_119, %c0_120] : memref<16x4x16xf32, #tpu.memory_space<vmem>>, vector<1x4x16xf32>
    %153 = vector.shape_cast %152 : vector<1x4x16xf32> to vector<4x16xf32>
    %cst_121 = arith.constant dense<0.000000e+00> : vector<4x64xf32>
    %154 = tpu.matmul %153, %136, %cst_121 {dimension_numbers = #tpu.dot_dimension_numbers<[1], [0], [0], [1], [0, 0, 1, 1], [], []>} : vector<4x16xf32>, vector<16x64xf32>, vector<4x64xf32> -> vector<4x64xf32>
    %c6_122 = arith.constant 6 : index
    %c0_123 = arith.constant 0 : index
    %c0_124 = arith.constant 0 : index
    %155 = vector.load %arg9[%c6_122, %c0_123, %c0_124] : memref<16x4x16xf32, #tpu.memory_space<vmem>>, vector<1x4x16xf32>
    %156 = vector.shape_cast %155 : vector<1x4x16xf32> to vector<4x16xf32>
    %cst_125 = arith.constant dense<0.000000e+00> : vector<4x64xf32>
    %157 = tpu.matmul %156, %136, %cst_125 {dimension_numbers = #tpu.dot_dimension_numbers<[1], [0], [0], [1], [0, 0, 1, 1], [], []>} : vector<4x16xf32>, vector<16x64xf32>, vector<4x64xf32> -> vector<4x64xf32>
    %c7_126 = arith.constant 7 : index
    %c0_127 = arith.constant 0 : index
    %c0_128 = arith.constant 0 : index
    %158 = vector.load %arg9[%c7_126, %c0_127, %c0_128] : memref<16x4x16xf32, #tpu.memory_space<vmem>>, vector<1x4x16xf32>
    %159 = vector.shape_cast %158 : vector<1x4x16xf32> to vector<4x16xf32>
    %cst_129 = arith.constant dense<0.000000e+00> : vector<4x64xf32>
    %160 = tpu.matmul %159, %136, %cst_129 {dimension_numbers = #tpu.dot_dimension_numbers<[1], [0], [0], [1], [0, 0, 1, 1], [], []>} : vector<4x16xf32>, vector<16x64xf32>, vector<4x64xf32> -> vector<4x64xf32>
    %c8_130 = arith.constant 8 : index
    %c0_131 = arith.constant 0 : index
    %c0_132 = arith.constant 0 : index
    %161 = vector.load %arg9[%c8_130, %c0_131, %c0_132] : memref<16x4x16xf32, #tpu.memory_space<vmem>>, vector<1x4x16xf32>
    %162 = vector.shape_cast %161 : vector<1x4x16xf32> to vector<4x16xf32>
    %cst_133 = arith.constant dense<0.000000e+00> : vector<4x64xf32>
    %163 = tpu.matmul %162, %136, %cst_133 {dimension_numbers = #tpu.dot_dimension_numbers<[1], [0], [0], [1], [0, 0, 1, 1], [], []>} : vector<4x16xf32>, vector<16x64xf32>, vector<4x64xf32> -> vector<4x64xf32>
    %c9_134 = arith.constant 9 : index
    %c0_135 = arith.constant 0 : index
    %c0_136 = arith.constant 0 : index
    %164 = vector.load %arg9[%c9_134, %c0_135, %c0_136] : memref<16x4x16xf32, #tpu.memory_space<vmem>>, vector<1x4x16xf32>
    %165 = vector.shape_cast %164 : vector<1x4x16xf32> to vector<4x16xf32>
    %cst_137 = arith.constant dense<0.000000e+00> : vector<4x64xf32>
    %166 = tpu.matmul %165, %136, %cst_137 {dimension_numbers = #tpu.dot_dimension_numbers<[1], [0], [0], [1], [0, 0, 1, 1], [], []>} : vector<4x16xf32>, vector<16x64xf32>, vector<4x64xf32> -> vector<4x64xf32>
    %c10_138 = arith.constant 10 : index
    %c0_139 = arith.constant 0 : index
    %c0_140 = arith.constant 0 : index
    %167 = vector.load %arg9[%c10_138, %c0_139, %c0_140] : memref<16x4x16xf32, #tpu.memory_space<vmem>>, vector<1x4x16xf32>
    %168 = vector.shape_cast %167 : vector<1x4x16xf32> to vector<4x16xf32>
    %cst_141 = arith.constant dense<0.000000e+00> : vector<4x64xf32>
    %169 = tpu.matmul %168, %136, %cst_141 {dimension_numbers = #tpu.dot_dimension_numbers<[1], [0], [0], [1], [0, 0, 1, 1], [], []>} : vector<4x16xf32>, vector<16x64xf32>, vector<4x64xf32> -> vector<4x64xf32>
    %c11_142 = arith.constant 11 : index
    %c0_143 = arith.constant 0 : index
    %c0_144 = arith.constant 0 : index
    %170 = vector.load %arg9[%c11_142, %c0_143, %c0_144] : memref<16x4x16xf32, #tpu.memory_space<vmem>>, vector<1x4x16xf32>
    %171 = vector.shape_cast %170 : vector<1x4x16xf32> to vector<4x16xf32>
    %cst_145 = arith.constant dense<0.000000e+00> : vector<4x64xf32>
    %172 = tpu.matmul %171, %136, %cst_145 {dimension_numbers = #tpu.dot_dimension_numbers<[1], [0], [0], [1], [0, 0, 1, 1], [], []>} : vector<4x16xf32>, vector<16x64xf32>, vector<4x64xf32> -> vector<4x64xf32>
    %c12_146 = arith.constant 12 : index
    %c0_147 = arith.constant 0 : index
    %c0_148 = arith.constant 0 : index
    %173 = vector.load %arg9[%c12_146, %c0_147, %c0_148] : memref<16x4x16xf32, #tpu.memory_space<vmem>>, vector<1x4x16xf32>
    %174 = vector.shape_cast %173 : vector<1x4x16xf32> to vector<4x16xf32>
    %cst_149 = arith.constant dense<0.000000e+00> : vector<4x64xf32>
    %175 = tpu.matmul %174, %136, %cst_149 {dimension_numbers = #tpu.dot_dimension_numbers<[1], [0], [0], [1], [0, 0, 1, 1], [], []>} : vector<4x16xf32>, vector<16x64xf32>, vector<4x64xf32> -> vector<4x64xf32>
    %c13_150 = arith.constant 13 : index
    %c0_151 = arith.constant 0 : index
    %c0_152 = arith.constant 0 : index
    %176 = vector.load %arg9[%c13_150, %c0_151, %c0_152] : memref<16x4x16xf32, #tpu.memory_space<vmem>>, vector<1x4x16xf32>
    %177 = vector.shape_cast %176 : vector<1x4x16xf32> to vector<4x16xf32>
    %cst_153 = arith.constant dense<0.000000e+00> : vector<4x64xf32>
    %178 = tpu.matmul %177, %136, %cst_153 {dimension_numbers = #tpu.dot_dimension_numbers<[1], [0], [0], [1], [0, 0, 1, 1], [], []>} : vector<4x16xf32>, vector<16x64xf32>, vector<4x64xf32> -> vector<4x64xf32>
    %c14_154 = arith.constant 14 : index
    %c0_155 = arith.constant 0 : index
    %c0_156 = arith.constant 0 : index
    %179 = vector.load %arg9[%c14_154, %c0_155, %c0_156] : memref<16x4x16xf32, #tpu.memory_space<vmem>>, vector<1x4x16xf32>
    %180 = vector.shape_cast %179 : vector<1x4x16xf32> to vector<4x16xf32>
    %cst_157 = arith.constant dense<0.000000e+00> : vector<4x64xf32>
    %181 = tpu.matmul %180, %136, %cst_157 {dimension_numbers = #tpu.dot_dimension_numbers<[1], [0], [0], [1], [0, 0, 1, 1], [], []>} : vector<4x16xf32>, vector<16x64xf32>, vector<4x64xf32> -> vector<4x64xf32>
    %c15_158 = arith.constant 15 : index
    %c0_159 = arith.constant 0 : index
    %c0_160 = arith.constant 0 : index
    %182 = vector.load %arg9[%c15_158, %c0_159, %c0_160] : memref<16x4x16xf32, #tpu.memory_space<vmem>>, vector<1x4x16xf32>
    %183 = vector.shape_cast %182 : vector<1x4x16xf32> to vector<4x16xf32>
    %cst_161 = arith.constant dense<0.000000e+00> : vector<4x64xf32>
    %184 = tpu.matmul %183, %136, %cst_161 {dimension_numbers = #tpu.dot_dimension_numbers<[1], [0], [0], [1], [0, 0, 1, 1], [], []>} : vector<4x16xf32>, vector<16x64xf32>, vector<4x64xf32> -> vector<4x64xf32>
    %185 = tpu.concatenate %139, %142, %145, %148, %151, %154, %157, %160, %163, %166, %169, %172, %175, %178, %181, %184 in 1 : vector<4x64xf32>, vector<4x64xf32>, vector<4x64xf32>, vector<4x64xf32>, vector<4x64xf32>, vector<4x64xf32>, vector<4x64xf32>, vector<4x64xf32>, vector<4x64xf32>, vector<4x64xf32>, vector<4x64xf32>, vector<4x64xf32>, vector<4x64xf32>, vector<4x64xf32>, vector<4x64xf32>, vector<4x64xf32> -> vector<4x1024xf32>
    %c0_162 = arith.constant 0 : index
    %c0_163 = arith.constant 0 : index
    %186 = vector.load %arg10[%c0_162, %c0_163] : memref<1024x64xf32, #tpu.memory_space<vmem>>, vector<1024x64xf32>
    %cst_164 = arith.constant dense<0.000000e+00> : vector<4x64xf32>
    %187 = tpu.matmul %185, %186, %cst_164 {dimension_numbers = #tpu.dot_dimension_numbers<[1], [0], [0], [1], [0, 0, 1, 1], [], []>} : vector<4x1024xf32>, vector<1024x64xf32>, vector<4x64xf32> -> vector<4x64xf32>
    %c0_165 = arith.constant 0 : index
    %c0_166 = arith.constant 0 : index
    %188 = vector.load %arg11[%c0_165, %c0_166] : memref<1x64xf32, #tpu.memory_space<vmem>>, vector<1x64xf32>
    %189 = vector.broadcast %188 : vector<1x64xf32> to vector<4x64xf32>
    %190 = arith.addf %187, %189 : vector<4x64xf32>
    %cst_167 = arith.constant 0.000000e+00 : f32
    %191 = vector.broadcast %cst_167 : f32 to vector<4x64xf32>
    %192 = arith.maximumf %190, %191 : vector<4x64xf32>
    %c0_168 = arith.constant 0 : index
    %c0_169 = arith.constant 0 : index
    %c0_170 = arith.constant 0 : index
    %193 = vector.load %arg12[%c0_168, %c0_169, %c0_170] : memref<16x1x4xf32, #tpu.memory_space<vmem>>, vector<1x1x4xf32>
    %194 = vector.shape_cast %193 : vector<1x1x4xf32> to vector<1x4xf32>
    %cst_171 = arith.constant dense<0.000000e+00> : vector<1x64xf32>
    %195 = tpu.matmul %194, %192, %cst_171 {dimension_numbers = #tpu.dot_dimension_numbers<[1], [0], [0], [1], [0, 0, 1, 1], [], []>} : vector<1x4xf32>, vector<4x64xf32>, vector<1x64xf32> -> vector<1x64xf32>
    %c1_172 = arith.constant 1 : index
    %c0_173 = arith.constant 0 : index
    %c0_174 = arith.constant 0 : index
    %196 = vector.load %arg12[%c1_172, %c0_173, %c0_174] : memref<16x1x4xf32, #tpu.memory_space<vmem>>, vector<1x1x4xf32>
    %197 = vector.shape_cast %196 : vector<1x1x4xf32> to vector<1x4xf32>
    %cst_175 = arith.constant dense<0.000000e+00> : vector<1x64xf32>
    %198 = tpu.matmul %197, %192, %cst_175 {dimension_numbers = #tpu.dot_dimension_numbers<[1], [0], [0], [1], [0, 0, 1, 1], [], []>} : vector<1x4xf32>, vector<4x64xf32>, vector<1x64xf32> -> vector<1x64xf32>
    %c2_176 = arith.constant 2 : index
    %c0_177 = arith.constant 0 : index
    %c0_178 = arith.constant 0 : index
    %199 = vector.load %arg12[%c2_176, %c0_177, %c0_178] : memref<16x1x4xf32, #tpu.memory_space<vmem>>, vector<1x1x4xf32>
    %200 = vector.shape_cast %199 : vector<1x1x4xf32> to vector<1x4xf32>
    %cst_179 = arith.constant dense<0.000000e+00> : vector<1x64xf32>
    %201 = tpu.matmul %200, %192, %cst_179 {dimension_numbers = #tpu.dot_dimension_numbers<[1], [0], [0], [1], [0, 0, 1, 1], [], []>} : vector<1x4xf32>, vector<4x64xf32>, vector<1x64xf32> -> vector<1x64xf32>
    %c3_180 = arith.constant 3 : index
    %c0_181 = arith.constant 0 : index
    %c0_182 = arith.constant 0 : index
    %202 = vector.load %arg12[%c3_180, %c0_181, %c0_182] : memref<16x1x4xf32, #tpu.memory_space<vmem>>, vector<1x1x4xf32>
    %203 = vector.shape_cast %202 : vector<1x1x4xf32> to vector<1x4xf32>
    %cst_183 = arith.constant dense<0.000000e+00> : vector<1x64xf32>
    %204 = tpu.matmul %203, %192, %cst_183 {dimension_numbers = #tpu.dot_dimension_numbers<[1], [0], [0], [1], [0, 0, 1, 1], [], []>} : vector<1x4xf32>, vector<4x64xf32>, vector<1x64xf32> -> vector<1x64xf32>
    %c4_184 = arith.constant 4 : index
    %c0_185 = arith.constant 0 : index
    %c0_186 = arith.constant 0 : index
    %205 = vector.load %arg12[%c4_184, %c0_185, %c0_186] : memref<16x1x4xf32, #tpu.memory_space<vmem>>, vector<1x1x4xf32>
    %206 = vector.shape_cast %205 : vector<1x1x4xf32> to vector<1x4xf32>
    %cst_187 = arith.constant dense<0.000000e+00> : vector<1x64xf32>
    %207 = tpu.matmul %206, %192, %cst_187 {dimension_numbers = #tpu.dot_dimension_numbers<[1], [0], [0], [1], [0, 0, 1, 1], [], []>} : vector<1x4xf32>, vector<4x64xf32>, vector<1x64xf32> -> vector<1x64xf32>
    %c5_188 = arith.constant 5 : index
    %c0_189 = arith.constant 0 : index
    %c0_190 = arith.constant 0 : index
    %208 = vector.load %arg12[%c5_188, %c0_189, %c0_190] : memref<16x1x4xf32, #tpu.memory_space<vmem>>, vector<1x1x4xf32>
    %209 = vector.shape_cast %208 : vector<1x1x4xf32> to vector<1x4xf32>
    %cst_191 = arith.constant dense<0.000000e+00> : vector<1x64xf32>
    %210 = tpu.matmul %209, %192, %cst_191 {dimension_numbers = #tpu.dot_dimension_numbers<[1], [0], [0], [1], [0, 0, 1, 1], [], []>} : vector<1x4xf32>, vector<4x64xf32>, vector<1x64xf32> -> vector<1x64xf32>
    %c6_192 = arith.constant 6 : index
    %c0_193 = arith.constant 0 : index
    %c0_194 = arith.constant 0 : index
    %211 = vector.load %arg12[%c6_192, %c0_193, %c0_194] : memref<16x1x4xf32, #tpu.memory_space<vmem>>, vector<1x1x4xf32>
    %212 = vector.shape_cast %211 : vector<1x1x4xf32> to vector<1x4xf32>
    %cst_195 = arith.constant dense<0.000000e+00> : vector<1x64xf32>
    %213 = tpu.matmul %212, %192, %cst_195 {dimension_numbers = #tpu.dot_dimension_numbers<[1], [0], [0], [1], [0, 0, 1, 1], [], []>} : vector<1x4xf32>, vector<4x64xf32>, vector<1x64xf32> -> vector<1x64xf32>
    %c7_196 = arith.constant 7 : index
    %c0_197 = arith.constant 0 : index
    %c0_198 = arith.constant 0 : index
    %214 = vector.load %arg12[%c7_196, %c0_197, %c0_198] : memref<16x1x4xf32, #tpu.memory_space<vmem>>, vector<1x1x4xf32>
    %215 = vector.shape_cast %214 : vector<1x1x4xf32> to vector<1x4xf32>
    %cst_199 = arith.constant dense<0.000000e+00> : vector<1x64xf32>
    %216 = tpu.matmul %215, %192, %cst_199 {dimension_numbers = #tpu.dot_dimension_numbers<[1], [0], [0], [1], [0, 0, 1, 1], [], []>} : vector<1x4xf32>, vector<4x64xf32>, vector<1x64xf32> -> vector<1x64xf32>
    %c8_200 = arith.constant 8 : index
    %c0_201 = arith.constant 0 : index
    %c0_202 = arith.constant 0 : index
    %217 = vector.load %arg12[%c8_200, %c0_201, %c0_202] : memref<16x1x4xf32, #tpu.memory_space<vmem>>, vector<1x1x4xf32>
    %218 = vector.shape_cast %217 : vector<1x1x4xf32> to vector<1x4xf32>
    %cst_203 = arith.constant dense<0.000000e+00> : vector<1x64xf32>
    %219 = tpu.matmul %218, %192, %cst_203 {dimension_numbers = #tpu.dot_dimension_numbers<[1], [0], [0], [1], [0, 0, 1, 1], [], []>} : vector<1x4xf32>, vector<4x64xf32>, vector<1x64xf32> -> vector<1x64xf32>
    %c9_204 = arith.constant 9 : index
    %c0_205 = arith.constant 0 : index
    %c0_206 = arith.constant 0 : index
    %220 = vector.load %arg12[%c9_204, %c0_205, %c0_206] : memref<16x1x4xf32, #tpu.memory_space<vmem>>, vector<1x1x4xf32>
    %221 = vector.shape_cast %220 : vector<1x1x4xf32> to vector<1x4xf32>
    %cst_207 = arith.constant dense<0.000000e+00> : vector<1x64xf32>
    %222 = tpu.matmul %221, %192, %cst_207 {dimension_numbers = #tpu.dot_dimension_numbers<[1], [0], [0], [1], [0, 0, 1, 1], [], []>} : vector<1x4xf32>, vector<4x64xf32>, vector<1x64xf32> -> vector<1x64xf32>
    %c10_208 = arith.constant 10 : index
    %c0_209 = arith.constant 0 : index
    %c0_210 = arith.constant 0 : index
    %223 = vector.load %arg12[%c10_208, %c0_209, %c0_210] : memref<16x1x4xf32, #tpu.memory_space<vmem>>, vector<1x1x4xf32>
    %224 = vector.shape_cast %223 : vector<1x1x4xf32> to vector<1x4xf32>
    %cst_211 = arith.constant dense<0.000000e+00> : vector<1x64xf32>
    %225 = tpu.matmul %224, %192, %cst_211 {dimension_numbers = #tpu.dot_dimension_numbers<[1], [0], [0], [1], [0, 0, 1, 1], [], []>} : vector<1x4xf32>, vector<4x64xf32>, vector<1x64xf32> -> vector<1x64xf32>
    %c11_212 = arith.constant 11 : index
    %c0_213 = arith.constant 0 : index
    %c0_214 = arith.constant 0 : index
    %226 = vector.load %arg12[%c11_212, %c0_213, %c0_214] : memref<16x1x4xf32, #tpu.memory_space<vmem>>, vector<1x1x4xf32>
    %227 = vector.shape_cast %226 : vector<1x1x4xf32> to vector<1x4xf32>
    %cst_215 = arith.constant dense<0.000000e+00> : vector<1x64xf32>
    %228 = tpu.matmul %227, %192, %cst_215 {dimension_numbers = #tpu.dot_dimension_numbers<[1], [0], [0], [1], [0, 0, 1, 1], [], []>} : vector<1x4xf32>, vector<4x64xf32>, vector<1x64xf32> -> vector<1x64xf32>
    %c12_216 = arith.constant 12 : index
    %c0_217 = arith.constant 0 : index
    %c0_218 = arith.constant 0 : index
    %229 = vector.load %arg12[%c12_216, %c0_217, %c0_218] : memref<16x1x4xf32, #tpu.memory_space<vmem>>, vector<1x1x4xf32>
    %230 = vector.shape_cast %229 : vector<1x1x4xf32> to vector<1x4xf32>
    %cst_219 = arith.constant dense<0.000000e+00> : vector<1x64xf32>
    %231 = tpu.matmul %230, %192, %cst_219 {dimension_numbers = #tpu.dot_dimension_numbers<[1], [0], [0], [1], [0, 0, 1, 1], [], []>} : vector<1x4xf32>, vector<4x64xf32>, vector<1x64xf32> -> vector<1x64xf32>
    %c13_220 = arith.constant 13 : index
    %c0_221 = arith.constant 0 : index
    %c0_222 = arith.constant 0 : index
    %232 = vector.load %arg12[%c13_220, %c0_221, %c0_222] : memref<16x1x4xf32, #tpu.memory_space<vmem>>, vector<1x1x4xf32>
    %233 = vector.shape_cast %232 : vector<1x1x4xf32> to vector<1x4xf32>
    %cst_223 = arith.constant dense<0.000000e+00> : vector<1x64xf32>
    %234 = tpu.matmul %233, %192, %cst_223 {dimension_numbers = #tpu.dot_dimension_numbers<[1], [0], [0], [1], [0, 0, 1, 1], [], []>} : vector<1x4xf32>, vector<4x64xf32>, vector<1x64xf32> -> vector<1x64xf32>
    %c14_224 = arith.constant 14 : index
    %c0_225 = arith.constant 0 : index
    %c0_226 = arith.constant 0 : index
    %235 = vector.load %arg12[%c14_224, %c0_225, %c0_226] : memref<16x1x4xf32, #tpu.memory_space<vmem>>, vector<1x1x4xf32>
    %236 = vector.shape_cast %235 : vector<1x1x4xf32> to vector<1x4xf32>
    %cst_227 = arith.constant dense<0.000000e+00> : vector<1x64xf32>
    %237 = tpu.matmul %236, %192, %cst_227 {dimension_numbers = #tpu.dot_dimension_numbers<[1], [0], [0], [1], [0, 0, 1, 1], [], []>} : vector<1x4xf32>, vector<4x64xf32>, vector<1x64xf32> -> vector<1x64xf32>
    %c15_228 = arith.constant 15 : index
    %c0_229 = arith.constant 0 : index
    %c0_230 = arith.constant 0 : index
    %238 = vector.load %arg12[%c15_228, %c0_229, %c0_230] : memref<16x1x4xf32, #tpu.memory_space<vmem>>, vector<1x1x4xf32>
    %239 = vector.shape_cast %238 : vector<1x1x4xf32> to vector<1x4xf32>
    %cst_231 = arith.constant dense<0.000000e+00> : vector<1x64xf32>
    %240 = tpu.matmul %239, %192, %cst_231 {dimension_numbers = #tpu.dot_dimension_numbers<[1], [0], [0], [1], [0, 0, 1, 1], [], []>} : vector<1x4xf32>, vector<4x64xf32>, vector<1x64xf32> -> vector<1x64xf32>
    %241 = tpu.concatenate %195, %198, %201, %204, %207, %210, %213, %216, %219, %222, %225, %228, %231, %234, %237, %240 in 1 : vector<1x64xf32>, vector<1x64xf32>, vector<1x64xf32>, vector<1x64xf32>, vector<1x64xf32>, vector<1x64xf32>, vector<1x64xf32>, vector<1x64xf32>, vector<1x64xf32>, vector<1x64xf32>, vector<1x64xf32>, vector<1x64xf32>, vector<1x64xf32>, vector<1x64xf32>, vector<1x64xf32>, vector<1x64xf32> -> vector<1x1024xf32>
    %c0_232 = arith.constant 0 : index
    %c0_233 = arith.constant 0 : index
    %242 = vector.load %arg13[%c0_232, %c0_233] : memref<1024x32xf32, #tpu.memory_space<vmem>>, vector<1024x32xf32>
    %cst_234 = arith.constant dense<0.000000e+00> : vector<1x32xf32>
    %243 = tpu.matmul %241, %242, %cst_234 {dimension_numbers = #tpu.dot_dimension_numbers<[1], [0], [0], [1], [0, 0, 1, 1], [], []>} : vector<1x1024xf32>, vector<1024x32xf32>, vector<1x32xf32> -> vector<1x32xf32>
    %c0_235 = arith.constant 0 : index
    %c0_236 = arith.constant 0 : index
    %244 = vector.load %arg14[%c0_235, %c0_236] : memref<1x32xf32, #tpu.memory_space<vmem>>, vector<1x32xf32>
    %245 = arith.addf %243, %244 : vector<1x32xf32>
    %cst_237 = arith.constant 0.000000e+00 : f32
    %246 = vector.broadcast %cst_237 : f32 to vector<1x32xf32>
    %247 = arith.maximumf %245, %246 : vector<1x32xf32>
    %c0_238 = arith.constant 0 : index
    %c0_239 = arith.constant 0 : index
    %248 = vector.load %arg15[%c0_238, %c0_239] : memref<32x2304xf32, #tpu.memory_space<vmem>>, vector<32x2304xf32>
    %cst_240 = arith.constant dense<0.000000e+00> : vector<1x2304xf32>
    %249 = tpu.matmul %247, %248, %cst_240 {dimension_numbers = #tpu.dot_dimension_numbers<[1], [0], [0], [1], [0, 0, 1, 1], [], []>} : vector<1x32xf32>, vector<32x2304xf32>, vector<1x2304xf32> -> vector<1x2304xf32>
    %c0_241 = arith.constant 0 : index
    %c0_242 = arith.constant 0 : index
    %250 = vector.load %arg16[%c0_241, %c0_242] : memref<1x2304xf32, #tpu.memory_space<vmem>>, vector<1x2304xf32>
    %251 = arith.addf %249, %250 : vector<1x2304xf32>
    %c0_243 = arith.constant 0 : index
    %c0_244 = arith.constant 0 : index
    %c0_245 = arith.constant 0 : index
    %252 = vector.load %arg17[%c0_243, %c0_244, %c0_245] : memref<1x1x2304xf32, #tpu.memory_space<vmem>>, vector<1x1x2304xf32>
    %253 = vector.shape_cast %252 : vector<1x1x2304xf32> to vector<1x2304xf32>
    %254 = vector.shape_cast %251 : vector<1x2304xf32> to vector<1x1x2304xf32>
    tpu.vector_store %arg17[%c0_243, %c0_244, %c0_245], %254 {strides = array<i32>} : memref<1x1x2304xf32, #tpu.memory_space<vmem>>, vector<1x1x2304xf32>,
    return
  }
  func.func @transform_0(%arg0: i32) -> (i32, i32, i32) {
    %c0_i32 = arith.constant 0 : i32
    %c0_i32_0 = arith.constant 0 : i32
    %c0_i32_1 = arith.constant 0 : i32
    return %arg0, %c0_i32, %c0_i32_0 : i32, i32, i32
  }
  func.func @transform_1(%arg0: i32) -> (i32, i32) {
    %c0_i32 = arith.constant 0 : i32
    %c0_i32_0 = arith.constant 0 : i32
    %c0_i32_1 = arith.constant 0 : i32
    return %c0_i32, %c0_i32_0 : i32, i32
  }
  func.func @transform_2(%arg0: i32) -> (i32, i32, i32) {
    %c0_i32 = arith.constant 0 : i32
    %c0_i32_0 = arith.constant 0 : i32
    %c0_i32_1 = arith.constant 0 : i32
    %c0_i32_2 = arith.constant 0 : i32
    return %c0_i32, %c0_i32_0, %c0_i32_1 : i32, i32, i32
  }
  func.func @transform_3(%arg0: i32) -> (i32, i32) {
    %c0_i32 = arith.constant 0 : i32
    %c0_i32_0 = arith.constant 0 : i32
    %c0_i32_1 = arith.constant 0 : i32
    return %c0_i32, %c0_i32_0 : i32, i32
  }
  func.func @transform_4(%arg0: i32) -> (i32, i32) {
    %c0_i32 = arith.constant 0 : i32
    %c0_i32_0 = arith.constant 0 : i32
    %c0_i32_1 = arith.constant 0 : i32
    return %c0_i32, %c0_i32_0 : i32, i32
  }
  func.func @transform_5(%arg0: i32) -> (i32, i32, i32) {
    %c0_i32 = arith.constant 0 : i32
    %c0_i32_0 = arith.constant 0 : i32
    %c0_i32_1 = arith.constant 0 : i32
    %c0_i32_2 = arith.constant 0 : i32
    return %c0_i32, %c0_i32_0, %c0_i32_1 : i32, i32, i32
  }
  func.func @transform_6(%arg0: i32) -> (i32, i32) {
    %c0_i32 = arith.constant 0 : i32
    %c0_i32_0 = arith.constant 0 : i32
    %c0_i32_1 = arith.constant 0 : i32
    return %c0_i32, %c0_i32_0 : i32, i32
  }
  func.func @transform_7(%arg0: i32) -> (i32, i32) {
    %c0_i32 = arith.constant 0 : i32
    %c0_i32_0 = arith.constant 0 : i32
    %c0_i32_1 = arith.constant 0 : i32
    return %c0_i32, %c0_i32_0 : i32, i32
  }
  func.func @transform_8(%arg0: i32) -> (i32, i32, i32) {
    %c0_i32 = arith.constant 0 : i32
    %c0_i32_0 = arith.constant 0 : i32
    %c0_i32_1 = arith.constant 0 : i32
    %c0_i32_2 = arith.constant 0 : i32
    return %c0_i32, %c0_i32_0, %c0_i32_1 : i32, i32, i32
  }
  func.func @transform_9(%arg0: i32) -> (i32, i32) {
    %c0_i32 = arith.constant 0 : i32
    %c0_i32_0 = arith.constant 0 : i32
    %c0_i32_1 = arith.constant 0 : i32
    return %c0_i32, %c0_i32_0 : i32, i32
  }
  func.func @transform_10(%arg0: i32) -> (i32, i32) {
    %c0_i32 = arith.constant 0 : i32
    %c0_i32_0 = arith.constant 0 : i32
    %c0_i32_1 = arith.constant 0 : i32
    return %c0_i32, %c0_i32_0 : i32, i32
  }
  func.func @transform_11(%arg0: i32) -> (i32, i32, i32) {
    %c0_i32 = arith.constant 0 : i32
    %c0_i32_0 = arith.constant 0 : i32
    %c0_i32_1 = arith.constant 0 : i32
    %c0_i32_2 = arith.constant 0 : i32
    return %c0_i32, %c0_i32_0, %c0_i32_1 : i32, i32, i32
  }
  func.func @transform_12(%arg0: i32) -> (i32, i32) {
    %c0_i32 = arith.constant 0 : i32
    %c0_i32_0 = arith.constant 0 : i32
    %c0_i32_1 = arith.constant 0 : i32
    return %c0_i32, %c0_i32_0 : i32, i32
  }
  func.func @transform_13(%arg0: i32) -> (i32, i32) {
    %c0_i32 = arith.constant 0 : i32
    %c0_i32_0 = arith.constant 0 : i32
    %c0_i32_1 = arith.constant 0 : i32
    return %c0_i32, %c0_i32_0 : i32, i32
  }
  func.func @transform_14(%arg0: i32) -> (i32, i32) {
    %c0_i32 = arith.constant 0 : i32
    %c0_i32_0 = arith.constant 0 : i32
    %c0_i32_1 = arith.constant 0 : i32
    return %c0_i32, %c0_i32_0 : i32, i32
  }
  func.func @transform_15(%arg0: i32) -> (i32, i32) {
    %c0_i32 = arith.constant 0 : i32
    %c0_i32_0 = arith.constant 0 : i32
    %c0_i32_1 = arith.constant 0 : i32
    return %c0_i32, %c0_i32_0 : i32, i32
  }
  func.func @transform_16(%arg0: i32) -> (i32, i32, i32) {
    %c0_i32 = arith.constant 0 : i32
    %c0_i32_0 = arith.constant 0 : i32
    %c0_i32_1 = arith.constant 0 : i32
    return %arg0, %c0_i32, %c0_i32_0 : i32, i32, i32
  }
}

</mosaic_0001>

<bundles_post_ra>
// kernel: weight_regressor_forward.1
= control target key start
LH: loop header
LB: loop body
LE: loop exit
PB: predicated region body
PF: predicated region fallthrough
CT: control target
= control target key end

     0   :  { %s9280_s21 = smov 0   ;;  %s12162_s0 = inlined_call_operand.vmem [shape: f32[2,64,8], index: 0, kind: input, shape index: {}]   ;;  %s12163_s1 = inlined_call_operand.vmem [shape: f32[8,4], index: 1, kind: input, shape index: {}]   ;;  %s12164_s2 = inlined_call_operand.vmem [shape: f32[9,64,4], index: 2, kind: input, shape index: {}]   ;;  %s12165_s3 = inlined_call_operand.vmem [shape: f32[36,64], index: 3, kind: input, shape index: {}]   ;;  %s12166_s4 = inlined_call_operand.vmem [shape: f32[1,64], index: 4, kind: input, shape index: {}]   ;;  %s12167_s5 = inlined_call_operand.vmem [shape: f32[16,16,64], index: 5, kind: input, shape index: {}]   ;;  %s12168_s6 = inlined_call_operand.vmem [shape: f32[1024,64], index: 6, kind: input, shape index: {}]   ;;  %s12169_s7 = inlined_call_operand.vmem [shape: f32[1,64], index: 7, kind: input, shape index: {}]   ;;  %s12170_s8 = inlined_call_operand.vmem [shape: f32[16,4,16], index: 8, kind: input, shape index: {}]   ;;  %s12171_s9 = inlined_call_operand.vmem [shape: f32[1024,64], index: 9, kind: input, shape index: {}]   ;;  %s12172_s10 = inlined_call_operand.vmem [shape: f32[1,64], index: 10, kind: input, shape index: {}]   ;;  %s12173_s11 = inlined_call_operand.vmem [shape: f32[16,1,4], index: 11, kind: input, shape index: {}]   ;;  %s12174_s12 = inlined_call_operand.vmem [shape: f32[1024,32], index: 12, kind: input, shape index: {}]   ;;  %s12175_s13 = inlined_call_operand.vmem [shape: f32[1,32], index: 13, kind: input, shape index: {}]   ;;  %s12176_s14 = inlined_call_operand.vmem [shape: f32[32,2304], index: 14, kind: input, shape index: {}]   ;;  %s12177_s15 = inlined_call_operand.vmem [shape: f32[1,2304], index: 15, kind: input, shape index: {}]   ;;  %s12178_s16 = inlined_call_operand.vmem [shape: f32[2,1,2304], index: 16, kind: output, shape index: {}]  }
   0x1   :  { %12179 = sst [smem:[#allocation2_spill]] %s12162_s0 }
   0x2 LB: > { %s7603_s22 = sadd.s32 4294967295, %s9181_s21   ;;  %p7607_p0 = scmp.ge.s32.totalorder %s9181_s21, 1  ;;  %s9181_s21 = sphi %s9280_s21, %s26_s21  }
   0x3   : > { %p462_p1 = scmp.lt.s32.totalorder %s9181_s21, 3 }
   0x5   : > { %p463_p2 = pnand %p7607_p0, %p462_p1 }
   0x6   : > { %p511_p3 = scmp.lt.s32.totalorder (!%p463_p2), %s7603_s22, 1  ;;  %s12180_s28 = sld [smem:[#allocation2_spill]] (!%p463_p2) }
   0x7   : > { %466 = sbr.rel (%p463_p2) target bundleno = 2771 (0xad3), region = 84  ;;  %s9184_s30 = smov (!%p463_p2), 28  }
   0x8   : > { %s9185_s20 = smov (!%p463_p2), 16   ;;  %s9186_s26 = smov (!%p463_p2), 8  }
   0x9   : > { %s9187_s27 = smov (!%p463_p2), 12   ;;  %s9188_s18 = smov (!%p463_p2), 20  }
   0xa   : > { %s9191_s17 = smov (!%p463_p2), 64  }
   0xc   : > { %v528_v0 = vld [vmem:[%s12163_s1] sm:$0xff]  ;;  %s12182_s22 = smov (!%p511_p3, %s7603_s22), 1  ;;  %vm529_vm0 = vcmask 64512   ;;  %vm659_vm1 = vcmask 31744   ;;  %vm808_vm2 = vcmask 1046528   ;;  %vm741_vm3 = vcmask 1040384  }
   0xd   : > { %8540 = vmatprep.subr.mxu0 %v528_v0  ;;  %s7845_s25 = sshll.u32 %s12182_s22, 6  ;;  %vm1314_vm4 = vcmask 1043456   ;;  %vm1223_vm5 = vcmask 97280   ;;  %vm1232_vm6 = vcmask 130048   ;;  %vm1241_vm7 = vcmask 162816   ;;  %s9072_s0 = smul.u32 18, %s12182_s22 }
   0xe   : > { %8541 = vmatpush3.msra.mxu0 %v528_v0  ;;  %s515_s29 = scalar_lea.vmem %s12180_s28, %s7845_s25  ;;  %s9183_s25 = smov 4   ;;  %vm1250_vm8 = vcmask 195584   ;;  %vm1259_vm9 = vcmask 228352   ;;  %vm1268_vm10 = vcmask 261120   ;;  %vm1289_vm11 = vcmask 293888  }
   0xf   : > { %v520_v1 = vld [vmem:[%s515_s29] sm:$0xff]  ;;  %v521_v2 = vld [vmem:[%s515_s29 + $0x8] sm:$0xff]  ;;  %v522_v3 = vld [vmem:[%s515_s29 + $0x10] sm:$0xff]  ;;  %s9190_s28 = smov 32   ;;  %vm1433_vm12 = vcmask 523264   ;;  %vm9193_vm13 = vmmov 0  }
  0x10   : > { %8542 = vmatprep.mubr.msk.f32.mxu0 %vm529_vm0, %v520_v1  ;;  %v523_v4 = vld [vmem:[%s515_s29 + $0x18] sm:$0xff]  ;;  %v524_v5 = vld [vmem:[%s515_s29 + $0x20] sm:$0xff]  ;;  %v525_v6 = vld [vmem:[%s515_s29 + $0x28] sm:$0xff] }
  0x11   : > { %8543 = vmatmul.mubr.msk.f32.vlgmr.msra.gmra.mxu0 %vm529_vm0, %v521_v2  ;;  %v526_v7 = vld [vmem:[%s515_s29 + $0x30] sm:$0xff]  ;;  %v527_v8 = vld [vmem:[%s515_s29 + $0x38] sm:$0xff]  ;;  %s9189_s29 = smov 24  }
  0x12   : > { %8545 = vmatprep.mubr.msk.f32.mxu0 %vm529_vm0, %v522_v3 }
  0x15   : > { %8546 = vmatmul.mubr.msk.f32.gmra.mxu0 %vm529_vm0, %v523_v4 }
  0x16   : > { %8548 = vmatprep.mubr.msk.f32.mxu0 %vm529_vm0, %v524_v5 }
  0x19   : > { %8549 = vmatmul.mubr.msk.f32.gmra.mxu0 %vm529_vm0, %v525_v6 }
  0x1a   : > { %8551 = vmatprep.mubr.msk.f32.mxu0 %vm529_vm0, %v526_v7 }
  0x1d   : > { %8552 = vmatmul.mubr.msk.f32.gmra.mxu0 %vm529_vm0, %v527_v8 }
  0xd1   : > { %v8544_v9 = vpop.f32.mrf.mxu0 }
  0xd2   : > { %v661_v13 = vsel %vm659_vm1, %v8544_v9, 0.0 }
  0xd3   : > { %v620_v10 = vpop.f32.mrf.mxu0 }
  0xd4   : > { %v660_v11 = vsel %vm659_vm1, %v620_v10, 0.0 }
  0xd5   : > { %v8547_v12 = vpop.f32.mrf.mxu0  ;;  %v662_v14 = vadd.f32 %v661_v13, %v660_v11 }
  0xd6   : > { %v665_v19 = vsel %vm659_vm1, %v8547_v12, 0.0 }
  0xd7   : > { %v630_v15 = vpop.f32.mrf.mxu0 }
  0xd8   : > { %v663_v16 = vsel %vm659_vm1, %v630_v15, 0.0 }
  0xd9   : > { %v664_v17 = vadd.f32 %v663_v16, %v662_v14  ;;  %v8550_v18 = vpop.f32.mrf.mxu0 }
  0xda   : > { %v669_v25 = vsel %vm659_vm1, %v8550_v18, 0.0 }
  0xdb   : > { %v640_v20 = vpop.f32.mrf.mxu0  ;;  %v666_v21 = vadd.f32 %v665_v19, %v664_v17  ;;  %v7618_v17 = vld [vmem:[%s12164_s2 + $0x40] sm:$0xff] }
  0xdc   : > { %v667_v22 = vsel %vm659_vm1, %v640_v20, 0.0 }
  0xdd   : > { %v668_v23 = vadd.f32 %v667_v22, %v666_v21  ;;  %v8553_v24 = vpop.f32.mrf.mxu0 }
  0xde   : > { %v673_v30 = vsel %vm659_vm1, %v8553_v24, 0.0 }
  0xdf   : > { %v650_v26 = vpop.f32.mrf.mxu0  ;;  %v670_v27 = vadd.f32 %v669_v25, %v668_v23 }
  0xe0   : > { %v671_v28 = vsel %vm659_vm1, %v650_v26, 0.0 }
  0xe1   : > { %v672_v29 = vadd.f32 %v671_v28, %v670_v27  ;;  %v7619_v27 = vld [vmem:[%s12164_s2 + $0x48] sm:$0xff] }
  0xe3   : > { %v674_v31 = vadd.f32 %v673_v30, %v672_v29 }
  0xe5   : > { %v675_v32 = vrot.slane %v674_v31, 4 }
  0xe7   : > { %v676_v33 = vadd.f32 %v675_v32, %v674_v31  ;;  %v7644_v32 = vld [vmem:[%s12164_s2 + $0x110] sm:$0xff] }
  0xe9   : > { %v677_v34 = vrot.slane %v676_v33, 2 }
  0xeb   : > { %v678_v35 = vadd.f32 %v677_v34, %v676_v33  ;;  %v7642_v33 = vld [vmem:[%s12164_s2 + $0x100] sm:$0xff] }
  0xed   : > { %v679_v36 = vrot.slane %v678_v35, 1 }
  0xef   : > { %v680_v37 = vadd.f32 %v679_v36, %v678_v35 }
  0xf1   : > { %v682_v38 = vmul.f32 0.015625, %v680_v37 }
  0xf3   : > { %v683_v39 = vsub.f32 %v620_v10, %v682_v38  ;;  %v684_v40 = vsub.f32 %v8544_v9, %v682_v38  ;;  %v685_v41 = vsub.f32 %v630_v15, %v682_v38  ;;  %v686_v42 = vsub.f32 %v8547_v12, %v682_v38 }
  0xf4   : > { %v9313_v43 = vsub.f32 %v640_v20, %v682_v38  ;;  %v688_v47 = vsub.f32 %v8550_v18, %v682_v38  ;;  %v689_v52 = vsub.f32 %v650_v26, %v682_v38  ;;  %v690_v56 = vsub.f32 %v8553_v24, %v682_v38  ;;  %v7620_v18 = vld [vmem:[%s12164_s2 + $0x50] sm:$0xff]  ;;  %v7666_v26 = vld [vmem:[%s12164_s2 + $0x1c0] sm:$0xff]  ;;  %v7645_v38 = vld [vmem:[%s12164_s2 + $0x118] sm:$0xff] }
  0xf5   : > { %v691_v44 = vmul.f32 %v683_v39, %v683_v39  ;;  %v692_v45 = vmul.f32 %v684_v40, %v684_v40  ;;  %v693_v46 = vmul.f32 %v685_v41, %v685_v41  ;;  %v694_v48 = vmul.f32 %v686_v42, %v686_v42 }
  0xf6   : > { %v695_v53 = vmul.f32 %v9313_v43, %v9313_v43  ;;  %v696_v57 = vmul.f32 %v688_v47, %v688_v47  ;;  %v697_v60 = vmul.f32 %v689_v52, %v689_v52  ;;  %v698_v63 = vmul.f32 %v690_v56, %v690_v56 }
  0xf7   : > { %v699_v49 = vsel %vm659_vm1, %v691_v44, 0.0  ;;  %v700_v50 = vsel %vm659_vm1, %v692_v45, 0.0  ;;  %v702_v54 = vsel %vm659_vm1, %v693_v46, 0.0  ;;  %v704_v58 = vsel %vm659_vm1, %v694_v48, 0.0  ;;  %v7668_v46 = vld [vmem:[%s12164_s2 + $0x1d0] sm:$0xff] }
  0xf8   : > { %v701_v51 = vadd.f32 %v700_v50, %v699_v49  ;;  %v706_v61 = vsel %vm659_vm1, %v695_v53, 0.0  ;;  %v708_v0 = vsel %vm659_vm1, %v696_v57, 0.0  ;;  %v710_v2 = vsel %vm659_vm1, %v697_v60, 0.0  ;;  %v7646_v53 = vld [vmem:[%s12164_s2 + $0x120] sm:$0xff] }
  0xf9   : > { %v712_v4 = vsel %vm659_vm1, %v698_v63, 0.0  ;;  %v7647_v63 = vld [vmem:[%s12164_s2 + $0x128] sm:$0xff] }
  0xfa   : > { %v703_v55 = vadd.f32 %v702_v54, %v701_v51  ;;  %v7667_v54 = vld [vmem:[%s12164_s2 + $0x1c8] sm:$0xff] }
  0xfc   : > { %v705_v59 = vadd.f32 %v704_v58, %v703_v55 }
  0xfe   : > { %v707_v62 = vadd.f32 %v706_v61, %v705_v59 }
 0x100   : > { %v709_v1 = vadd.f32 %v708_v0, %v707_v62  ;;  %v7622_v0 = vld [vmem:[%s12164_s2 + $0x60] sm:$0xff] }
 0x102   : > { %v711_v3 = vadd.f32 %v710_v2, %v709_v1 }
 0x104   : > { %v713_v5 = vadd.f32 %v712_v4, %v711_v3 }
 0x106   : > { %v714_v6 = vrot.slane %v713_v5, 4 }
 0x108   : > { %v715_v7 = vadd.f32 %v714_v6, %v713_v5  ;;  %v7670_v5 = vld [vmem:[%s12164_s2 + $0x1e0] sm:$0xff]  ;;  %v7623_v6 = vld [vmem:[%s12164_s2 + $0x68] sm:$0xff] }
 0x10a   : > { %v716_v8 = vrot.slane %v715_v7, 2 }
 0x10c   : > { %v717_v9 = vadd.f32 %v716_v8, %v715_v7 }
 0x10e   : > { %v718_v10 = vrot.slane %v717_v9, 1 }
 0x110   : > { %v719_v11 = vadd.f32 %v718_v10, %v717_v9  ;;  %v7648_v9 = vld [vmem:[%s12164_s2 + $0x130] sm:$0xff]  ;;  %v7669_v10 = vld [vmem:[%s12164_s2 + $0x1d8] sm:$0xff] }
 0x112   : > { %v720_v12 = vmul.f32 0.015625, %v719_v11 }
 0x114   : > { %v721_v13 = vadd.f32 1e-05, %v720_v12 }
 0x116   : > { %9173 = vrsqrt.f32 %v721_v13  ;;  %v7673_v13 = vld [vmem:[%s12164_s2 + $0x1f8] sm:$0xff] }
 0x123   : > { %v9174_v14 = vpop.eup %9173 }
 0x124   : > { %v730_v15 = vmul.f32 %v9174_v14, %v690_v56  ;;  %v724_v16 = vmul.f32 %v9174_v14, %v684_v40  ;;  %v723_v19 = vmul.f32 %v9174_v14, %v683_v39  ;;  %v725_v25 = vmul.f32 %v9174_v14, %v685_v41  ;;  %v7643_v39 = vld [vmem:[%s12164_s2 + $0x108] sm:$0xff] }
 0x125   : > { %v726_v31 = vmul.f32 %v9174_v14, %v686_v42  ;;  %v728_v34 = vmul.f32 %v9174_v14, %v688_v47  ;;  %v729_v40 = vmul.f32 %v9174_v14, %v689_v52  ;;  %v727_v41 = vmul.f32 %v9174_v14, %v9313_v43  ;;  %v7621_v47 = vld [vmem:[%s12164_s2 + $0x58] sm:$0xff]  ;;  %v7624_v14 = vld [vmem:[%s12164_s2 + $0x70] sm:$0xff] }
 0x126   : > { %v9331_v20 = vmax.f32 %v730_v15, 0.0  ;;  %v9333_v21 = vmax.f32 %v724_v16, 0.0  ;;  %v9337_v24 = vmax.f32 %v723_v19, 0.0  ;;  %v9349_v30 = vmax.f32 %v725_v25, 0.0  ;;  %v7626_v19 = vld [vmem:[%s12164_s2 + $0x80] sm:$0xff] }
 0x127   : > { %v9361_v37 = vmax.f32 %v726_v31, 0.0  ;;  %v9372_v42 = vmax.f32 %v728_v34, 0.0  ;;  %v9382_v48 = vmax.f32 %v729_v40, 0.0  ;;  %v9386_v43 = vmax.f32 %v727_v41, 0.0  ;;  %v7650_v40 = vld [vmem:[%s12164_s2 + $0x140] sm:$0xff] }
 0x128   : > { %v798_v22 = vmul.f32 %v7618_v17, %v9331_v20  ;;  %v800_v23 = vmul.f32 %v7620_v18, %v9333_v21  ;;  %v926_v28 = vmul.f32 %v7666_v26, %v9333_v21  ;;  %v799_v29 = vmul.f32 %v7619_v27, %v9337_v24 }
 0x129   : > { %v877_v35 = vmul.f32 %v7644_v32, %v9349_v30  ;;  %v875_v36 = vmul.f32 %v7642_v33, %v9337_v24  ;;  %v878_v44 = vmul.f32 %v7645_v38, %v9361_v37  ;;  %v876_v45 = vmul.f32 %v7643_v39, %v9333_v21  ;;  %v7672_v39 = vld [vmem:[%s12164_s2 + $0x1f0] sm:$0xff] }
 0x12a   : > { %959 = vrot.lane.b32.xlu0 %v798_v22, %s9183_s25  ;;  %963 = vrot.lane.b32.xlu1 %v800_v23, %s9183_s25  ;;  %v928_v49 = vmul.f32 %v7668_v46, %v9361_v37  ;;  %v801_v50 = vmul.f32 %v7621_v47, %v9349_v30  ;;  %v806_v51 = vrot.slane %v9331_v20, 1  ;;  %v818_v52 = vrot.slane %v9372_v42, 1  ;;  %v7625_v22 = vld [vmem:[%s12164_s2 + $0x78] sm:$0xff] }
 0x12b   : > { %v762_v55 = vrot.slane %v9372_v42, 7  ;;  %v820_v56 = vrot.slane %v9382_v48, 1  ;;  %v743_v57 = vrot.slane %v9331_v20, 7  ;;  %v742_v58 = vrot.slane %v9382_v48, 7 }
 0x12c   : > { %v879_v59 = vmul.f32 %v7646_v53, %v9386_v43  ;;  %v927_v60 = vmul.f32 %v7667_v54, %v9349_v30  ;;  %v880_v3 = vmul.f32 %v7647_v63, %v9372_v42  ;;  %v802_v4 = vmul.f32 %v7622_v0, %v9361_v37 }
 0x12d   : > { %v9409_v61 = vsel %vm808_vm2, %v818_v52, %v820_v56  ;;  %v9412_v62 = vsel %vm808_vm2, %v820_v56, %v806_v51  ;;  %v9423_v1 = vsel %vm741_vm3, %v762_v55, %v742_v58  ;;  %v9430_v2 = vsel %vm741_vm3, %v742_v58, %v743_v57  ;;  %v7651_v56 = vld [vmem:[%s12164_s2 + $0x148] sm:$0xff] }
 0x12e   : > { %1151 = vrot.lane.b32.xlu1 %v926_v28, %s9184_s30  ;;  %961 = vrot.lane.b32.xlu0 %v799_v29, %s9183_s25  ;;  %v930_v7 = vmul.f32 %v7670_v5, %v9372_v42  ;;  %v803_v8 = vmul.f32 %v7623_v6, %v9386_v43  ;;  %v881_v11 = vmul.f32 %v7648_v9, %v9382_v48  ;;  %v809_v15 = vrot.slane %v9337_v24, 1  ;;  %v7627_v28 = vld [vmem:[%s12164_s2 + $0x88] sm:$0xff]  ;;  %v7636_v6 = vld [vmem:[%s12164_s2 + $0xd0] sm:$0xff] }
 0x12f   : > { %v929_v12 = vmul.f32 %v7669_v10, %v9386_v43  ;;  %v933_v16 = vmul.f32 %v7673_v13, %v9337_v24  ;;  %v804_v17 = vmul.f32 %v7624_v14, %v9372_v42  ;;  %v810_v23 = vrot.slane %v9333_v21, 1  ;;  %v7671_v29 = vld [vmem:[%s12164_s2 + $0x1e8] sm:$0xff]  ;;  %v7674_v10 = vld [vmem:[%s12164_s2 + $0x200] sm:$0xff] }
 0x130   : > { %v9466_v18 = vsel %vm808_vm2, %v806_v51, %v809_v15  ;;  %v805_v26 = vmul.f32 %v7625_v22, %v9382_v48  ;;  %v753_v31 = vrot.slane %v9337_v24, 7  ;;  %v754_v32 = vrot.slane %v9333_v21, 7  ;;  %v7635_v21 = vld [vmem:[%s12164_s2 + $0xc8] sm:$0xff]  ;;  %v1280_v51 = vld [vmem:[%s12165_s3 + $0x18] sm:$0xff]  ;;  %v7652_v22 = vld [vmem:[%s12164_s2 + $0x150] sm:$0xff] }
 0x131   : > { %v841_v25 = vmul.f32 %v7626_v19, %v9466_v18  ;;  %v9480_v27 = vsel %vm808_vm2, %v809_v15, %v810_v23  ;;  %v931_v34 = vmul.f32 %v7671_v29, %v9382_v48  ;;  %v812_v41 = vrot.slane %v9349_v30, 1  ;;  %v7634_v48 = vld [vmem:[%s12164_s2 + $0xc0] sm:$0xff]  ;;  %v7659_v9 = vld [vmem:[%s12164_s2 + $0x188] sm:$0xff]  ;;  %v7637_v15 = vld [vmem:[%s12164_s2 + $0xd8] sm:$0xff] }
 0x132   : > { %1059 = vrot.lane.b32.xlu1 %v877_v35, %s9185_s20  ;;  %1055 = vrot.lane.b32.xlu0 %v875_v36, %s9185_s20  ;;  %v842_v33 = vmul.f32 %v7627_v28, %v9480_v27  ;;  %v7649_v35 = vld [vmem:[%s12164_s2 + $0x138] sm:$0xff]  ;;  %v9498_v36 = vsel %vm741_vm3, %v753_v31, %v754_v32  ;;  %v892_v46 = vmul.f32 %v7650_v40, %v9480_v27  ;;  %v814_v58 = vrot.slane %v9361_v37, 1  ;;  %v7676_v40 = vld [vmem:[%s12164_s2 + $0x210] sm:$0xff] }
 0x133   : > { %v882_v24 = vmul.f32 %v7649_v35, %v9331_v20  ;;  %v859_v38 = vmul.f32 %v7635_v21, %v9498_v36  ;;  %v9526_v47 = vsel %vm741_vm3, %v743_v57, %v753_v31  ;;  %v7658_v57 = vld [vmem:[%s12164_s2 + $0x180] sm:$0xff]  ;;  %v7653_v29 = vld [vmem:[%s12164_s2 + $0x158] sm:$0xff]  ;;  %v7660_v31 = vld [vmem:[%s12164_s2 + $0x190] sm:$0xff] }
 0x134   : > { %v858_v53 = vmul.f32 %v7634_v48, %v9526_v47  ;;  %v909_v0 = vmul.f32 %v7658_v57, %v9498_v36  ;;  %v7631_v21 = vld [vmem:[%s12164_s2 + $0xa8] sm:$0xff]  ;;  %v7677_v48 = vld [vmem:[%s12164_s2 + $0x218] sm:$0xff]  ;;  %v7654_v42 = vld [vmem:[%s12164_s2 + $0x160] sm:$0xff] }
 0x136   : > { %1061 = vrot.lane.b32.xlu1 %v878_v44, %s9185_s20  ;;  %1057 = vrot.lane.b32.xlu0 %v876_v45, %s9185_s20  ;;  %v1281_v44 = vld [vmem:[%s12165_s3 + $0x20] sm:$0xf]  ;;  %v932_v45 = vmul.f32 %v7672_v39, %v9331_v20  ;;  %v1279_v20 = vld [vmem:[%s12165_s3 + $0x10] sm:$0xff] }
 0x137   : > { %8554 = vmatprep.subr.msk.mxu1 %vm1314_vm4, %v1281_v44 }
 0x138   : > { %8555 = vmatpush3.msk.msra.mxu1 %vm1314_vm4, %v1281_v44 }
 0x139   : > { %8556 = vmatprep.subr.mxu1 %v1280_v51 }
 0x13a   : > { %1155 = vrot.lane.b32.xlu1 %v928_v49, %s9184_s30  ;;  %965 = vrot.lane.b32.xlu0 %v801_v50, %s9183_s25  ;;  %v813_v49 = vsel %vm808_vm2, %v810_v23, %v812_v41  ;;  %v7628_v50 = vld [vmem:[%s12164_s2 + $0x90] sm:$0xff] }
 0x13b   : > { %v843_v54 = vmul.f32 %v7628_v50, %v813_v49  ;;  %8557 = vmatpush3.msra.mxu1 %v1280_v51  ;;  %v893_v63 = vmul.f32 %v7651_v56, %v813_v49  ;;  %v943_v13 = vmul.f32 %v7674_v10, %v813_v49  ;;  %v7679_v10 = vld [vmem:[%s12164_s2 + $0x228] sm:$0xff] }
 0x13c   : > { %8558 = vmatprep.subr.mxu1 %v1279_v20 }
 0x13d   : > { %8559 = vmatpush3.msra.mxu1 %v1279_v20 }
 0x13e   : > { %1063 = vrot.lane.b32.xlu1 %v879_v59, %s9185_s20  ;;  %1153 = vrot.lane.b32.xlu0 %v927_v60, %s9184_s30  ;;  %v756_v59 = vrot.slane %v9349_v30, 7  ;;  %v1278_v60 = vld [vmem:[%s12165_s3 + $0x8] sm:$0xff]  ;;  %v815_v30 = vsel %vm808_vm2, %v812_v41, %v814_v58 }
 0x13f   : > { %8560 = vmatprep.subr.mxu1 %v1278_v60 }
 0x140   : > { %v9566_v5 = vsel %vm741_vm3, %v754_v32, %v756_v59  ;;  %8561 = vmatpush3.msra.mxu1 %v1278_v60  ;;  %v760_v32 = vrot.slane %v9386_v43, 7 }
 0x142   : > { %1065 = vrot.lane.b32.xlu1 %v880_v3, %s9185_s20  ;;  %967 = vrot.lane.b32.xlu0 %v802_v4, %s9183_s25  ;;  %v1277_v3 = vld [vmem:[%s12165_s3] sm:$0xff]  ;;  %v7629_v4 = vld [vmem:[%s12164_s2 + $0x98] sm:$0xff] }
 0x143   : > { %8562 = vmatprep.subr.mxu1 %v1277_v3 }
 0x144   : > { %8563 = vmatpush3.msra.mxu1 %v1277_v3  ;;  %v7678_v3 = vld [vmem:[%s12164_s2 + $0x220] sm:$0xff] }
 0x146   : > { %1159 = vrot.lane.b32.xlu1 %v930_v7, %s9184_s30  ;;  %969 = vrot.lane.b32.xlu0 %v803_v8, %s9183_s25  ;;  %v844_v7 = vmul.f32 %v7629_v4, %v815_v30  ;;  %v860_v8 = vmul.f32 %v7636_v6, %v9566_v5  ;;  %v947_v4 = vmul.f32 %v7678_v3, %v9409_v61  ;;  %v7641_v6 = vld [vmem:[%s12164_s2 + $0xf8] sm:$0xff] }
 0x14a   : > { %1067 = vrot.lane.b32.xlu1 %v881_v11, %s9185_s20  ;;  %1157 = vrot.lane.b32.xlu0 %v929_v12, %s9184_s30  ;;  %v758_v11 = vrot.slane %v9361_v37, 7  ;;  %v910_v12 = vmul.f32 %v7659_v9, %v9566_v5  ;;  %v816_v37 = vrot.slane %v9386_v43, 1  ;;  %v7638_v43 = vld [vmem:[%s12164_s2 + $0xe0] sm:$0xff] }
 0x14c   : > { %v9585_v14 = vsel %vm741_vm3, %v756_v59, %v758_v11  ;;  %v817_v23 = vsel %vm808_vm2, %v814_v58, %v816_v37  ;;  %v819_v35 = vsel %vm808_vm2, %v816_v37, %v818_v52  ;;  %v7661_v52 = vld [vmem:[%s12164_s2 + $0x198] sm:$0xff]  ;;  %v7640_v59 = vld [vmem:[%s12164_s2 + $0xf0] sm:$0xff] }
 0x14d   : > { %v945_v44 = vmul.f32 %v7676_v40, %v817_v23  ;;  %v946_v50 = vmul.f32 %v7677_v48, %v819_v35  ;;  %v896_v51 = vmul.f32 %v7654_v42, %v819_v35  ;;  %v7633_v58 = vld [vmem:[%s12164_s2 + $0xb8] sm:$0xff]  ;;  %v777_v40 = vld [vmem:[%s12164_s2 + $0x20] sm:$0xff] }
 0x14e   : > { %1165 = vrot.lane.b32.xlu1 %v933_v16, %s9184_s30  ;;  %971 = vrot.lane.b32.xlu0 %v804_v17, %s9183_s25  ;;  %v7675_v16 = vld [vmem:[%s12164_s2 + $0x208] sm:$0xff]  ;;  %v861_v17 = vmul.f32 %v7637_v15, %v9585_v14  ;;  %v848_v60 = vmul.f32 %v7633_v58, %v9412_v62 }
 0x14f   : > { %v944_v19 = vmul.f32 %v7675_v16, %v815_v30  ;;  %v948_v16 = vmul.f32 %v7679_v10, %v9412_v62 }
 0x152   : > { %991 = vrot.lane.b32.xlu1 %v841_v25, %s9186_s26  ;;  %973 = vrot.lane.b32.xlu0 %v805_v26, %s9183_s25  ;;  %v7630_v25 = vld [vmem:[%s12164_s2 + $0xa0] sm:$0xff]  ;;  %v894_v26 = vmul.f32 %v7652_v22, %v815_v30  ;;  %v7665_v22 = vld [vmem:[%s12164_s2 + $0x1b8] sm:$0xff] }
 0x153   : > { %v845_v28 = vmul.f32 %v7630_v25, %v817_v23  ;;  %v916_v25 = vmul.f32 %v7665_v22, %v9526_v47 }
 0x156   : > { %993 = vrot.lane.b32.xlu1 %v842_v33, %s9186_s26  ;;  %1161 = vrot.lane.b32.xlu0 %v931_v34, %s9184_s30  ;;  %v895_v33 = vmul.f32 %v7653_v29, %v817_v23  ;;  %v911_v34 = vmul.f32 %v7660_v31, %v9585_v14 }
 0x15a   : > { %1069 = vrot.lane.b32.xlu0 %v882_v24, %s9185_s20  ;;  %1025 = vrot.lane.b32.xlu1 %v859_v38, %s9187_s27  ;;  %v9623_v24 = vsel %vm741_vm3, %v758_v11, %v760_v32  ;;  %v846_v38 = vmul.f32 %v7631_v21, %v819_v35  ;;  %v7657_v11 = vld [vmem:[%s12164_s2 + $0x178] sm:$0xff] }
 0x15b   : > { %v862_v39 = vmul.f32 %v7638_v43, %v9623_v24  ;;  %v912_v41 = vmul.f32 %v7661_v52, %v9623_v24  ;;  %v899_v37 = vmul.f32 %v7657_v11, %v9466_v18  ;;  %v776_v21 = vld [vmem:[%s12164_s2 + $0x18] sm:$0xff]  ;;  %v774_v11 = vld [vmem:[%s12164_s2 + $0x8] sm:$0xff] }
 0x15c   : > { %v784_v43 = vmul.f32 %v776_v21, %v9566_v5  ;;  %v778_v5 = vld [vmem:[%s12164_s2 + $0x28] sm:$0xff] }
 0x15e   : > { %1163 = vrot.lane.b32.xlu0 %v932_v45, %s9184_s30  ;;  %1087 = vrot.lane.b32.xlu1 %v892_v46, %s9188_s18  ;;  %v9643_v45 = vsel %vm741_vm3, %v760_v32, %v762_v55  ;;  %v7639_v46 = vld [vmem:[%s12164_s2 + $0xe8] sm:$0xff]  ;;  %v7632_v55 = vld [vmem:[%s12164_s2 + $0xb0] sm:$0xff] }
 0x15f   : > { %v863_v49 = vmul.f32 %v7639_v46, %v9643_v45  ;;  %v847_v20 = vmul.f32 %v7632_v55, %v9409_v61 }
 0x162   : > { %1023 = vrot.lane.b32.xlu0 %v858_v53, %s9187_s27  ;;  %995 = vrot.lane.b32.xlu1 %v843_v54, %s9186_s26  ;;  %v7655_v53 = vld [vmem:[%s12164_s2 + $0x168] sm:$0xff]  ;;  %v7662_v54 = vld [vmem:[%s12164_s2 + $0x1a0] sm:$0xff] }
 0x163   : > { %v897_v56 = vmul.f32 %v7655_v53, %v9409_v61  ;;  %v913_v57 = vmul.f32 %v7662_v54, %v9643_v45  ;;  %v775_v61 = vld [vmem:[%s12164_s2 + $0x10] sm:$0xff] }
 0x166   : > { %1089 = vrot.lane.b32.xlu0 %v893_v63, %s9188_s18  ;;  %1119 = vrot.lane.b32.xlu1 %v909_v0, %s9189_s29  ;;  %v864_v63 = vmul.f32 %v7640_v59, %v9423_v1  ;;  %v7663_v0 = vld [vmem:[%s12164_s2 + $0x1a8] sm:$0xff] }
 0x167   : > { %v914_v30 = vmul.f32 %v7663_v0, %v9423_v1 }
 0x16a   : > { %997 = vrot.lane.b32.xlu0 %v844_v7, %s9186_s26  ;;  %1027 = vrot.lane.b32.xlu1 %v860_v8, %s9187_s27  ;;  %v7656_v7 = vld [vmem:[%s12164_s2 + $0x170] sm:$0xff]  ;;  %v865_v8 = vmul.f32 %v7641_v6, %v9430_v2 }
 0x16b   : > { %v898_v9 = vmul.f32 %v7656_v7, %v9412_v62 }
 0x16e   : > { %1121 = vrot.lane.b32.xlu0 %v910_v12, %s9189_s29  ;;  %1183 = vrot.lane.b32.xlu1 %v943_v13, %s9190_s28  ;;  %v783_v12 = vmul.f32 %v775_v61, %v9498_v36 }
 0x172   : > { %1029 = vrot.lane.b32.xlu0 %v861_v17, %s9187_s27  ;;  %1185 = vrot.lane.b32.xlu1 %v944_v19, %s9190_s28  ;;  %v7664_v19 = vld [vmem:[%s12164_s2 + $0x1b0] sm:$0xff] }
 0x173   : > { %v915_v23 = vmul.f32 %v7664_v19, %v9430_v2 }
 0x176   : > { %1091 = vrot.lane.b32.xlu0 %v894_v26, %s9188_s18  ;;  %999 = vrot.lane.b32.xlu1 %v845_v28, %s9186_s26  ;;  %v7680_v26 = vld [vmem:[%s12164_s2 + $0x230] sm:$0xff]  ;;  %v7681_v28 = vld [vmem:[%s12164_s2 + $0x238] sm:$0xff] }
 0x177   : > { %v949_v32 = vmul.f32 %v7680_v26, %v9466_v18 }
 0x17a   : > { %1093 = vrot.lane.b32.xlu0 %v895_v33, %s9188_s18  ;;  %1123 = vrot.lane.b32.xlu1 %v911_v34, %s9189_s29  ;;  %v950_v33 = vmul.f32 %v7681_v28, %v9480_v27 }
 0x17e   : > { %1001 = vrot.lane.b32.xlu0 %v846_v38, %s9186_s26  ;;  %1031 = vrot.lane.b32.xlu1 %v862_v39, %s9187_s27 }
 0x182   : > { %1125 = vrot.lane.b32.xlu0 %v912_v41, %s9189_s29  ;;  %1187 = vrot.lane.b32.xlu1 %v945_v44, %s9190_s28  ;;  %v785_v41 = vmul.f32 %v777_v40, %v9585_v14 }
 0x186   : > { %1033 = vrot.lane.b32.xlu0 %v863_v49, %s9187_s27  ;;  %1189 = vrot.lane.b32.xlu1 %v946_v50, %s9190_s28  ;;  %v786_v49 = vmul.f32 %v778_v5, %v9623_v24  ;;  %v780_v24 = vld [vmem:[%s12164_s2 + $0x38] sm:$0xff] }
 0x187   : > { %v788_v58 = vmul.f32 %v780_v24, %v9423_v1 }
 0x18a   : > { %1095 = vrot.lane.b32.xlu0 %v896_v51, %s9188_s18  ;;  %1003 = vrot.lane.b32.xlu1 %v847_v20, %s9186_s26  ;;  %v779_v20 = vld [vmem:[%s12164_s2 + $0x30] sm:$0xff] }
 0x18b   : > { %v787_v53 = vmul.f32 %v779_v20, %v9643_v45 }
 0x18e   : > { %1097 = vrot.lane.b32.xlu0 %v897_v56, %s9188_s18  ;;  %1127 = vrot.lane.b32.xlu1 %v913_v57, %s9189_s29 }
 0x192   : > { %1005 = vrot.lane.b32.xlu0 %v848_v60, %s9186_s26  ;;  %1035 = vrot.lane.b32.xlu1 %v864_v63, %s9187_s27 }
 0x196   : > { %1129 = vrot.lane.b32.xlu0 %v914_v30, %s9189_s29  ;;  %1191 = vrot.lane.b32.xlu1 %v947_v4, %s9190_s28  ;;  %v773_v4 = vld [vmem:[%s12164_s2] sm:$0xff] }
 0x197   : > { %v781_v1 = vmul.f32 %v773_v4, %v9430_v2  ;;  %v782_v2 = vmul.f32 %v774_v11, %v9526_v47 }
 0x19a   : > { %1037 = vrot.lane.b32.xlu0 %v865_v8, %s9187_s27  ;;  %1099 = vrot.lane.b32.xlu1 %v898_v9, %s9188_s18 }
 0x19c   : > { %v9715_v13 = vpop.permute.xlu0 %959  ;;  %v964_v15 = vpop.permute.xlu1 %963 }
 0x19d   : > { %v9720_v17 = vsel %vm659_vm1, %v783_v12, %v964_v15  ;;  %v1207_v8 = vsel %vm659_vm1, %v781_v1, %v9715_v13 }
 0x19e   : > { %1193 = vrot.lane.b32.xlu0 %v948_v16, %s9190_s28  ;;  %1101 = vrot.lane.b32.xlu1 %v899_v37, %s9188_s18 }
 0x1a0   : > { %v9730_v36 = vpop.permute.xlu1 %1151  ;;  %v9732_v62 = vpop.permute.xlu0 %961 }
 0x1a1   : > { %v1208_v13 = vsel %vm659_vm1, %v782_v2, %v9732_v62 }
 0x1a2   : > { %1131 = vrot.lane.b32.xlu0 %v915_v23, %s9189_s29  ;;  %1133 = vrot.lane.b32.xlu1 %v916_v25, %s9189_s29 }
 0x1a4   : > { %v9744_v29 = vpop.permute.xlu1 %1059  ;;  %v1056_v31 = vpop.permute.xlu0 %1055 }
 0x1a6   : > { %1195 = vrot.lane.b32.xlu0 %v949_v32, %s9190_s28  ;;  %1197 = vrot.lane.b32.xlu1 %v950_v33, %s9190_s28  ;;  %s12139_s28 = scalar_lea.vmem %s12178_s16, %s9072_s0 }
 0x1a8   : > { %v9750_v34 = vpop.permute.xlu1 %1061  ;;  %v9752_v35 = vpop.permute.xlu0 %1057 }
 0x1ac   : > { %v9758_v38 = vpop.permute.xlu1 %1155  ;;  %v966_v39 = vpop.permute.xlu0 %965 }
 0x1ad   : > { %v9761_v18 = vsel %vm659_vm1, %v784_v43, %v966_v39 }
 0x1b0   : > { %v9763_v27 = vpop.permute.xlu1 %1063  ;;  %v9765_v52 = vpop.permute.xlu0 %1153 }
 0x1b4   : > { %v9771_v44 = vpop.permute.xlu1 %1065  ;;  %v968_v46 = vpop.permute.xlu0 %967 }
 0x1b5   : > { %v9777_v48 = vsel %vm659_vm1, %v785_v41, %v968_v46 }
 0x1b8   : > { %v9780_v50 = vpop.permute.xlu1 %1159  ;;  %v970_v42 = vpop.permute.xlu0 %969 }
 0x1b9   : > { %v9783_v55 = vsel %vm659_vm1, %v786_v49, %v970_v42 }
 0x1bc   : > { %v9785_v51 = vpop.permute.xlu1 %1067  ;;  %v9787_v14 = vpop.permute.xlu0 %1157 }
 0x1c0   : > { %v9793_v54 = vpop.permute.xlu1 %1165  ;;  %v972_v56 = vpop.permute.xlu0 %971 }
 0x1c1   : > { %v9799_v57 = vsel %vm659_vm1, %v787_v53, %v972_v56 }
 0x1c4   : > { %v992_v59 = vpop.permute.xlu1 %991  ;;  %v974_v60 = vpop.permute.xlu0 %973 }
 0x1c5   : > { %v9803_v63 = vsel %vm659_vm1, %v788_v58, %v974_v60  ;;  %v1215_v9 = vsel %vm529_vm0, %v1207_v8, %v992_v59 }
 0x1c8   : > { %v994_v0 = vpop.permute.xlu1 %993  ;;  %v9805_v3 = vpop.permute.xlu0 %1161 }
 0x1c9   : > { %v1216_v22 = vsel %vm529_vm0, %v1208_v13, %v994_v0 }
 0x1cc   : > { %v9807_v45 = vpop.permute.xlu0 %1069  ;;  %v1026_v30 = vpop.permute.xlu1 %1025 }
 0x1cd   : > { %v1225_v23 = vsel %vm1223_vm5, %v1216_v22, %v1026_v30 }
 0x1ce   : > { %v1234_v32 = vsel %vm1232_vm6, %v1225_v23, %v9752_v35 }
 0x1d0   : > { %v9812_v6 = vpop.permute.xlu0 %1163  ;;  %v1088_v7 = vpop.permute.xlu1 %1087 }
 0x1d4   : > { %v1024_v61 = vpop.permute.xlu0 %1023  ;;  %v996_v10 = vpop.permute.xlu1 %995 }
 0x1d5   : > { %v1224_v12 = vsel %vm1223_vm5, %v1215_v9, %v1024_v61  ;;  %v1217_v25 = vsel %vm529_vm0, %v9720_v17, %v996_v10 }
 0x1d6   : > { %v1233_v15 = vsel %vm1232_vm6, %v1224_v12, %v1056_v31 }
 0x1d7   : > { %v1242_v19 = vsel %vm1241_vm7, %v1233_v15, %v1088_v7 }
 0x1d8   : > { %v1090_v16 = vpop.permute.xlu0 %1089  ;;  %v1120_v37 = vpop.permute.xlu1 %1119 }
 0x1d9   : > { %v1251_v31 = vsel %vm1250_vm8, %v1242_v19, %v1120_v37  ;;  %v1243_v33 = vsel %vm1241_vm7, %v1234_v32, %v1090_v16 }
 0x1da   : > { %v1260_v17 = vsel %vm1259_vm9, %v1251_v31, %v9730_v36 }
 0x1dc   : > { %v998_v26 = vpop.permute.xlu0 %997  ;;  %v1028_v28 = vpop.permute.xlu1 %1027 }
 0x1dd   : > { %v1226_v47 = vsel %vm1223_vm5, %v1217_v25, %v1028_v28 }
 0x1de   : > { %v1235_v62 = vsel %vm1232_vm6, %v1226_v47, %v9744_v29  ;;  %v1218_v29 = vsel %vm529_vm0, %v9761_v18, %v998_v26 }
 0x1e0   : > { %v1122_v21 = vpop.permute.xlu0 %1121  ;;  %v1184_v43 = vpop.permute.xlu1 %1183 }
 0x1e1   : > { %v1252_v39 = vsel %vm1250_vm8, %v1243_v33, %v1122_v21  ;;  %v1269_v40 = vsel %vm1268_vm10, %v1260_v17, %v1184_v43 }
 0x1e2   : > { %8564 = vmatprep.mubr.msk.f32.mxu1 %vm1289_vm11, %v1269_v40  ;;  %v1261_v35 = vsel %vm1259_vm9, %v1252_v39, %v9765_v52 }
 0x1e4   : > { %v1030_v41 = vpop.permute.xlu0 %1029  ;;  %v1186_v46 = vpop.permute.xlu1 %1185 }
 0x1e5   : > { %v1227_v5 = vsel %vm1223_vm5, %v1218_v29, %v1030_v41  ;;  %v1270_v49 = vsel %vm1268_vm10, %v1261_v35, %v1186_v46 }
 0x1e6   : > { %8565 = vmatmul.mubr.msk.f32.vlgmr.msra.gmra.mxu1 %vm1289_vm11, %v1270_v49  ;;  %v1236_v36 = vsel %vm1232_vm6, %v1227_v5, %v9750_v34 }
 0x1e8   : > { %v1092_v42 = vpop.permute.xlu0 %1091  ;;  %v1000_v20 = vpop.permute.xlu1 %999 }
 0x1e9   : > { %v1244_v53 = vsel %vm1241_vm7, %v1235_v62, %v1092_v42  ;;  %v1219_v58 = vsel %vm529_vm0, %v9777_v48, %v1000_v20  ;;  %v7694_v42 = vld [vmem:[%s12167_s5 + $0x10] sm:$0xff] }
 0x1ec   : > { %v1094_v56 = vpop.permute.xlu0 %1093  ;;  %v1124_v18 = vpop.permute.xlu1 %1123 }
 0x1ed   : > { %v1253_v24 = vsel %vm1250_vm8, %v1244_v53, %v1124_v18  ;;  %v1245_v30 = vsel %vm1241_vm7, %v1236_v36, %v1094_v56 }
 0x1ee   : > { %v1262_v52 = vsel %vm1259_vm9, %v1253_v24, %v9758_v38 }
 0x1f0   : > { %v1002_v59 = vpop.permute.xlu0 %1001  ;;  %v1032_v60 = vpop.permute.xlu1 %1031 }
 0x1f1   : > { %v1228_v0 = vsel %vm1223_vm5, %v1219_v58, %v1032_v60  ;;  %v1220_v15 = vsel %vm529_vm0, %v9783_v55, %v1002_v59 }
 0x1f2   : > { %v1237_v34 = vsel %vm1232_vm6, %v1228_v0, %v9763_v27 }
 0x1f4   : > { %v1126_v4 = vpop.permute.xlu0 %1125  ;;  %v1188_v7 = vpop.permute.xlu1 %1187 }
 0x1f5   : > { %v1254_v1 = vsel %vm1250_vm8, %v1245_v30, %v1126_v4  ;;  %v1271_v8 = vsel %vm1268_vm10, %v1262_v52, %v1188_v7  ;;  %v7682_v52 = vld [vmem:[%s12166_s4] ss:$0 sm:$0xff] }
 0x1f6   : > { %8567 = vmatprep.mubr.msk.f32.mxu1 %vm1289_vm11, %v1271_v8  ;;  %v1263_v48 = vsel %vm1259_vm9, %v1254_v1, %v9787_v14 }
 0x1f8   : > { %v1034_v38 = vpop.permute.xlu0 %1033  ;;  %v1190_v9 = vpop.permute.xlu1 %1189 }
 0x1f9   : > { %v1272_v61 = vsel %vm1268_vm10, %v1263_v48, %v1190_v9  ;;  %v1229_v2 = vsel %vm1223_vm5, %v1220_v15, %v1034_v38  ;;  %v7695_v15 = vld [vmem:[%s12167_s5 + $0x18] sm:$0xff] }
 0x1fa   : > { %8568 = vmatmul.mubr.msk.f32.gmra.mxu1 %vm1289_vm11, %v1272_v61  ;;  %v1238_v19 = vsel %vm1232_vm6, %v1229_v2, %v9771_v44  ;;  %v1432_v2 = vld [vmem:[%s12167_s5 + $0x8] sm:$0xff] }
 0x1fc   : > { %v1096_v27 = vpop.permute.xlu0 %1095  ;;  %v1004_v10 = vpop.permute.xlu1 %1003 }
 0x1fd   : > { %v1246_v16 = vsel %vm1241_vm7, %v1237_v34, %v1096_v27  ;;  %v1221_v33 = vsel %vm529_vm0, %v9799_v57, %v1004_v10 }
 0x200   : > { %v1098_v11 = vpop.permute.xlu0 %1097  ;;  %v1128_v12 = vpop.permute.xlu1 %1127 }
 0x201   : > { %v1255_v14 = vsel %vm1250_vm8, %v1246_v16, %v1128_v12  ;;  %v1247_v22 = vsel %vm1241_vm7, %v1238_v19, %v1098_v11  ;;  %v7702_v16 = vld [vmem:[%s12167_s5 + $0x30] sm:$0xff] }
 0x202   : > { %v1264_v25 = vsel %vm1259_vm9, %v1255_v14, %v9780_v50  ;;  %v7699_v14 = vld [vmem:[%s12167_s5 + $0x28] sm:$0xff]  ;;  %v7710_v19 = vld [vmem:[%s12167_s5 + $0x50] sm:$0xff] }
 0x204   : > { %v1006_v37 = vpop.permute.xlu0 %1005  ;;  %v1036_v13 = vpop.permute.xlu1 %1035 }
 0x205   : > { %v1222_v47 = vsel %vm529_vm0, %v9803_v63, %v1006_v37  ;;  %v1230_v21 = vsel %vm1223_vm5, %v1221_v33, %v1036_v13  ;;  %v7698_v37 = vld [vmem:[%s12167_s5 + $0x20] sm:$0xff]  ;;  %v7703_v13 = vld [vmem:[%s12167_s5 + $0x38] sm:$0xff] }
 0x206   : > { %v1239_v63 = vsel %vm1232_vm6, %v1230_v21, %v9785_v51  ;;  %v7730_v33 = vld [vmem:[%s12167_s5 + $0xa0] sm:$0xff]  ;;  %v7735_v21 = vld [vmem:[%s12167_s5 + $0xb8] sm:$0xff] }
 0x208   : > { %v1130_v23 = vpop.permute.xlu0 %1129  ;;  %v1192_v26 = vpop.permute.xlu1 %1191 }
 0x209   : > { %v1256_v55 = vsel %vm1250_vm8, %v1247_v22, %v1130_v23  ;;  %v1273_v28 = vsel %vm1268_vm10, %v1264_v25, %v1192_v26  ;;  %v7706_v22 = vld [vmem:[%s12167_s5 + $0x40] sm:$0xff]  ;;  %v7711_v23 = vld [vmem:[%s12167_s5 + $0x58] sm:$0xff]  ;;  %v7707_v25 = vld [vmem:[%s12167_s5 + $0x48] sm:$0xff] }
 0x20a   : > { %8570 = vmatprep.mubr.msk.f32.mxu1 %vm1289_vm11, %v1273_v28  ;;  %v1265_v31 = vsel %vm1259_vm9, %v1256_v55, %v9805_v3  ;;  %v7718_v26 = vld [vmem:[%s12167_s5 + $0x70] sm:$0xff]  ;;  %v7714_v55 = vld [vmem:[%s12167_s5 + $0x60] sm:$0xff]  ;;  %v7719_v28 = vld [vmem:[%s12167_s5 + $0x78] sm:$0xff] }
 0x20c   : > { %v1038_v44 = vpop.permute.xlu0 %1037  ;;  %v1100_v62 = vpop.permute.xlu1 %1099 }
 0x20d   : > { %v1231_v32 = vsel %vm1223_vm5, %v1222_v47, %v1038_v44  ;;  %v1248_v3 = vsel %vm1241_vm7, %v1239_v63, %v1100_v62  ;;  %v7726_v47 = vld [vmem:[%s12167_s5 + $0x90] sm:$0xff]  ;;  %v7722_v44 = vld [vmem:[%s12167_s5 + $0x80] sm:$0xff]  ;;  %v7727_v62 = vld [vmem:[%s12167_s5 + $0x98] sm:$0xff] }
 0x20e   : > { %v1240_v50 = vsel %vm1232_vm6, %v1231_v32, %v9807_v45  ;;  %v7723_v32 = vld [vmem:[%s12167_s5 + $0x88] sm:$0xff]  ;;  %v7743_v63 = vld [vmem:[%s12167_s5 + $0xd8] sm:$0xff] }
 0x210   : > { %v1194_v43 = vpop.permute.xlu0 %1193  ;;  %v1102_v17 = vpop.permute.xlu1 %1101 }
 0x211   : > { %v1274_v39 = vsel %vm1268_vm10, %v1265_v31, %v1194_v43  ;;  %v1249_v40 = vsel %vm1241_vm7, %v1240_v50, %v1102_v17  ;;  %v7715_v31 = vld [vmem:[%s12167_s5 + $0x68] sm:$0xff]  ;;  %v7734_v50 = vld [vmem:[%s12167_s5 + $0xb0] sm:$0xff] }
 0x212   : > { %8571 = vmatmul.mubr.msk.f32.gmra.mxu1 %vm1289_vm11, %v1274_v39  ;;  %v7731_v43 = vld [vmem:[%s12167_s5 + $0xa8] sm:$0xff]  ;;  %v7742_v17 = vld [vmem:[%s12167_s5 + $0xd0] sm:$0xff]  ;;  %v7738_v39 = vld [vmem:[%s12167_s5 + $0xc0] sm:$0xff] }
 0x214   : > { %v1132_v29 = vpop.permute.xlu0 %1131  ;;  %v1134_v45 = vpop.permute.xlu1 %1133 }
 0x215   : > { %v1257_v41 = vsel %vm1250_vm8, %v1248_v3, %v1132_v29  ;;  %v1258_v57 = vsel %vm1250_vm8, %v1249_v40, %v1134_v45  ;;  %v7739_v3 = vld [vmem:[%s12167_s5 + $0xc8] sm:$0xff]  ;;  %v7750_v40 = vld [vmem:[%s12167_s5 + $0xf0] sm:$0xff]  ;;  %v7746_v29 = vld [vmem:[%s12167_s5 + $0xe0] sm:$0xff] }
 0x216   : > { %v1266_v46 = vsel %vm1259_vm9, %v1257_v41, %v9812_v6  ;;  %v1267_v5 = vsel %vm1259_vm9, %v1258_v57, %v9793_v54  ;;  %v1431_v6 = vld [vmem:[%s12167_s5] sm:$0xff]  ;;  %v7751_v45 = vld [vmem:[%s12167_s5 + $0xf8] sm:$0xff]  ;;  %v7747_v41 = vld [vmem:[%s12167_s5 + $0xe8] sm:$0xff] }
 0x217   : > { %8592 = vmatprep.mubr.msk.f32.mxu0 %vm1433_vm12, %v1431_v6  ;;  %v2886_v57 = vld [vmem:[%s12168_s6 + $0xf8] sm:$0xff] }
 0x218   : > { %v1196_v35 = vpop.permute.xlu0 %1195  ;;  %v1198_v49 = vpop.permute.xlu1 %1197  ;;  %v2882_v6 = vld [vmem:[%s12168_s6 + $0xd8] sm:$0xff] }
 0x219   : > { %v1275_v51 = vsel %vm1268_vm10, %v1266_v46, %v1196_v35  ;;  %v1276_v36 = vsel %vm1268_vm10, %v1267_v5, %v1198_v49  ;;  %v2870_v35 = vld [vmem:[%s12168_s6 + $0x78] sm:$0xff]  ;;  %v2885_v46 = vld [vmem:[%s12168_s6 + $0xf0] sm:$0xff]  ;;  %v2884_v49 = vld [vmem:[%s12168_s6 + $0xe8] sm:$0xff] }
 0x21a   : > { %8573 = vmatprep.mubr.msk.f32.mxu1 %vm1289_vm11, %v1275_v51  ;;  %v2869_v5 = vld [vmem:[%s12168_s6 + $0x70] sm:$0xff]  ;;  %v2868_v51 = vld [vmem:[%s12168_s6 + $0x68] sm:$0xff] }
 0x21b   : > { %8574 = vmatmul.mubr.msk.f32.gmra.mxu1 %vm1289_vm11, %v1276_v36  ;;  %v2883_v36 = vld [vmem:[%s12168_s6 + $0xe0] sm:$0xff] }
 0x21c   : > { %8611 = vmatprep.mubr.msk.f32.mxu1 %vm1433_vm12, %v7694_v42  ;;  %v2867_v42 = vld [vmem:[%s12168_s6 + $0x60] sm:$0xff] }
 0x2a6   : > { %v8566_v54 = vpop.f32.mrf.mxu1 }
 0x2a7   : > { %v1390_v9 = vadd.f32 %v8566_v54, %v7682_v52  ;;  %v2866_v54 = vld [vmem:[%s12168_s6 + $0x58] sm:$0xff] }
 0x2a8   : > { %v1384_v20 = vpop.f32.mrf.mxu1 }
 0x2a9   : > { %v1385_v27 = vadd.f32 %v7682_v52, %v1384_v20  ;;  %v9951_v11 = vmax.f32 %v1390_v9, 0.0  ;;  %v2881_v20 = vld [vmem:[%s12168_s6 + $0xd0] sm:$0xff]  ;;  %v2859_v9 = vld [vmem:[%s12168_s6 + $0x20] sm:$0xff] }
 0x2ab   : > { %v9957_v12 = vmax.f32 %v1385_v27, 0.0  ;;  %v2858_v27 = vld [vmem:[%s12168_s6 + $0x18] sm:$0xff] }
 0x2ba   : > { %v8569_v53 = vpop.f32.mrf.mxu1 }
 0x2bb   : > { %v1400_v1 = vadd.f32 %v8569_v53, %v7682_v52  ;;  %v2865_v53 = vld [vmem:[%s12168_s6 + $0x50] sm:$0xff] }
 0x2bc   : > { %v1394_v56 = vpop.f32.mrf.mxu1 }
 0x2bd   : > { %v1395_v38 = vadd.f32 %v7682_v52, %v1394_v56  ;;  %v9939_v61 = vmax.f32 %v1400_v1, 0.0  ;;  %v2880_v56 = vld [vmem:[%s12168_s6 + $0xc8] sm:$0xff]  ;;  %v2902_v1 = vld [vmem:[%s12168_s6 + $0x178] sm:$0xff] }
 0x2bf   : > { %v9945_v10 = vmax.f32 %v1395_v38, 0.0  ;;  %v2917_v38 = vld [vmem:[%s12168_s6 + $0x1f0] sm:$0xff] }
 0x2d2   : > { %v8572_v18 = vpop.f32.mrf.mxu1 }
 0x2d3   : > { %v1410_v0 = vadd.f32 %v8572_v18, %v7682_v52  ;;  %v2864_v18 = vld [vmem:[%s12168_s6 + $0x48] sm:$0xff] }
 0x2d4   : > { %v1404_v24 = vpop.f32.mrf.mxu1 }
 0x2d5   : > { %v1405_v4 = vadd.f32 %v7682_v52, %v1404_v24  ;;  %v9927_v8 = vmax.f32 %v1410_v0, 0.0  ;;  %v2879_v24 = vld [vmem:[%s12168_s6 + $0xc0] sm:$0xff] }
 0x2d7   : > { %v9933_v48 = vmax.f32 %v1405_v4, 0.0  ;;  %v2860_v4 = vld [vmem:[%s12168_s6 + $0x28] sm:$0xff] }
 0x2db   : > { %v8575_v58 = vpop.f32.mrf.mxu1 }
 0x2dc   : > { %v1420_v59 = vadd.f32 %v8575_v58, %v7682_v52  ;;  %v2878_v58 = vld [vmem:[%s12168_s6 + $0xb8] sm:$0xff] }
 0x2dd   : > { %v1414_v60 = vpop.f32.mrf.mxu1 }
 0x2de   : > { %v9919_v34 = vmax.f32 %v1420_v59, 0.0  ;;  %v1415_v30 = vadd.f32 %v7682_v52, %v1414_v60  ;;  %v2863_v52 = vld [vmem:[%s12168_s6 + $0x40] sm:$0xff]  ;;  %v2862_v59 = vld [vmem:[%s12168_s6 + $0x38] sm:$0xff]  ;;  %v2877_v60 = vld [vmem:[%s12168_s6 + $0xb0] sm:$0xff] }
 0x2e0   : > { %v9921_v7 = vmax.f32 %v1415_v30, 0.0  ;;  %8576 = vmatprep.subr.mxu0 %v9919_v34  ;;  %8595 = vmatprep.subr.mxu1 %v9919_v34  ;;  %v2876_v30 = vld [vmem:[%s12168_s6 + $0xa8] sm:$0xff] }
 0x2e1   : > { %8577 = vmatpush3.msra.mxu0 %v9919_v34  ;;  %8596 = vmatpush3.msra.mxu1 %v9919_v34 }
 0x2e2   : > { %8578 = vmatprep.subr.mxu0 %v9921_v7  ;;  %8597 = vmatprep.subr.mxu1 %v9921_v7 }
 0x2e3   : > { %8579 = vmatpush3.msra.mxu0 %v9921_v7  ;;  %8598 = vmatpush3.msra.mxu1 %v9921_v7 }
 0x2e4   : > { %8580 = vmatprep.subr.mxu0 %v9927_v8  ;;  %8599 = vmatprep.subr.mxu1 %v9927_v8 }
 0x2e5   : > { %8581 = vmatpush3.msra.mxu0 %v9927_v8  ;;  %8600 = vmatpush3.msra.mxu1 %v9927_v8 }
 0x2e6   : > { %8582 = vmatprep.subr.mxu0 %v9933_v48  ;;  %8601 = vmatprep.subr.mxu1 %v9933_v48 }
 0x2e7   : > { %8583 = vmatpush3.msra.mxu0 %v9933_v48  ;;  %8602 = vmatpush3.msra.mxu1 %v9933_v48 }
 0x2e8   : > { %8584 = vmatprep.subr.mxu0 %v9939_v61  ;;  %8603 = vmatprep.subr.mxu1 %v9939_v61 }
 0x2e9   : > { %8585 = vmatpush3.msra.mxu0 %v9939_v61  ;;  %8604 = vmatpush3.msra.mxu1 %v9939_v61 }
 0x2ea   : > { %8586 = vmatprep.subr.mxu0 %v9945_v10  ;;  %8605 = vmatprep.subr.mxu1 %v9945_v10 }
 0x2eb   : > { %8587 = vmatpush3.msra.mxu0 %v9945_v10  ;;  %8606 = vmatpush3.msra.mxu1 %v9945_v10 }
 0x2ec   : > { %8588 = vmatprep.subr.mxu0 %v9951_v11  ;;  %8607 = vmatprep.subr.mxu1 %v9951_v11 }
 0x2ed   : > { %8589 = vmatpush3.msra.mxu0 %v9951_v11  ;;  %8608 = vmatpush3.msra.mxu1 %v9951_v11 }
 0x2ee   : > { %8590 = vmatprep.subr.mxu0 %v9957_v12  ;;  %8609 = vmatprep.subr.mxu1 %v9957_v12 }
 0x2ef   : > { %8591 = vmatpush3.msra.mxu0 %v9957_v12  ;;  %8610 = vmatpush3.msra.mxu1 %v9957_v12 }
 0x2f0   : > { %8612 = vmatmul.mubr.msk.f32.vlgmr.msra.gmra.mxu1 %vm1433_vm12, %v7695_v15  ;;  %8614 = vmatprep.subr.mxu0 %v9919_v34  ;;  %v2900_v15 = vld [vmem:[%s12168_s6 + $0x168] sm:$0xff] }
 0x2f1   : > { %8633 = vmatprep.subr.mxu1 %v9919_v34  ;;  %8593 = vmatmul.mubr.msk.f32.vlgmr.msra.gmra.mxu0 %vm1433_vm12, %v1432_v2  ;;  %v2915_v2 = vld [vmem:[%s12168_s6 + $0x1e0] sm:$0xff] }
 0x2f2   : > { %8615 = vmatpush3.msra.mxu0 %v9919_v34  ;;  %8634 = vmatpush3.msra.mxu1 %v9919_v34 }
 0x2f3   : > { %8616 = vmatprep.subr.mxu0 %v9921_v7  ;;  %8635 = vmatprep.subr.mxu1 %v9921_v7 }
 0x2f4   : > { %8617 = vmatpush3.msra.mxu0 %v9921_v7  ;;  %8636 = vmatpush3.msra.mxu1 %v9921_v7 }
 0x2f5   : > { %8618 = vmatprep.subr.mxu0 %v9927_v8  ;;  %8637 = vmatprep.subr.mxu1 %v9927_v8 }
 0x2f6   : > { %8619 = vmatpush3.msra.mxu0 %v9927_v8  ;;  %8638 = vmatpush3.msra.mxu1 %v9927_v8 }
 0x2f7   : > { %8620 = vmatprep.subr.mxu0 %v9933_v48  ;;  %8639 = vmatprep.subr.mxu1 %v9933_v48 }
 0x2f8   : > { %8621 = vmatpush3.msra.mxu0 %v9933_v48  ;;  %8640 = vmatpush3.msra.mxu1 %v9933_v48 }
 0x2f9   : > { %8622 = vmatprep.subr.mxu0 %v9939_v61  ;;  %8641 = vmatprep.subr.mxu1 %v9939_v61 }
 0x2fa   : > { %8623 = vmatpush3.msra.mxu0 %v9939_v61  ;;  %8642 = vmatpush3.msra.mxu1 %v9939_v61 }
 0x2fb   : > { %8624 = vmatprep.subr.mxu0 %v9945_v10  ;;  %8643 = vmatprep.subr.mxu1 %v9945_v10 }
 0x2fc   : > { %8625 = vmatpush3.msra.mxu0 %v9945_v10  ;;  %8644 = vmatpush3.msra.mxu1 %v9945_v10 }
 0x2fd   : > { %8626 = vmatprep.subr.mxu0 %v9951_v11  ;;  %8645 = vmatprep.subr.mxu1 %v9951_v11 }
 0x2fe   : > { %8627 = vmatpush3.msra.mxu0 %v9951_v11  ;;  %8646 = vmatpush3.msra.mxu1 %v9951_v11 }
 0x2ff   : > { %8628 = vmatprep.subr.mxu0 %v9957_v12  ;;  %8647 = vmatprep.subr.mxu1 %v9957_v12 }
 0x300   : > { %8629 = vmatpush3.msra.mxu0 %v9957_v12  ;;  %8648 = vmatpush3.msra.mxu1 %v9957_v12 }
 0x301   : > { %8649 = vmatprep.mubr.msk.f32.mxu1 %vm1433_vm12, %v7702_v16  ;;  %8630 = vmatprep.mubr.msk.f32.mxu0 %vm1433_vm12, %v7698_v37  ;;  %v2873_v16 = vld [vmem:[%s12168_s6 + $0x90] sm:$0xff]  ;;  %v2899_v37 = vld [vmem:[%s12168_s6 + $0x160] sm:$0xff] }
 0x302   : > { %8650 = vmatmul.mubr.msk.f32.vlgmr.msra.gmra.mxu1 %vm1433_vm12, %v7703_v13  ;;  %8652 = vmatprep.subr.mxu0 %v9919_v34 }
 0x303   : > { %8671 = vmatprep.subr.mxu1 %v9919_v34  ;;  %8631 = vmatmul.mubr.msk.f32.vlgmr.msra.gmra.mxu0 %vm1433_vm12, %v7699_v14  ;;  %v2857_v14 = vld [vmem:[%s12168_s6 + $0x10] sm:$0xff] }
 0x304   : > { %8653 = vmatpush3.msra.mxu0 %v9919_v34  ;;  %8672 = vmatpush3.msra.mxu1 %v9919_v34 }
 0x305   : > { %8654 = vmatprep.subr.mxu0 %v9921_v7  ;;  %8673 = vmatprep.subr.mxu1 %v9921_v7 }
 0x306   : > { %8655 = vmatpush3.msra.mxu0 %v9921_v7  ;;  %8674 = vmatpush3.msra.mxu1 %v9921_v7 }
 0x307   : > { %8656 = vmatprep.subr.mxu0 %v9927_v8  ;;  %8675 = vmatprep.subr.mxu1 %v9927_v8 }
 0x308   : > { %8657 = vmatpush3.msra.mxu0 %v9927_v8  ;;  %8676 = vmatpush3.msra.mxu1 %v9927_v8 }
 0x309   : > { %8658 = vmatprep.subr.mxu0 %v9933_v48  ;;  %8677 = vmatprep.subr.mxu1 %v9933_v48 }
 0x30a   : > { %8659 = vmatpush3.msra.mxu0 %v9933_v48  ;;  %8678 = vmatpush3.msra.mxu1 %v9933_v48 }
 0x30b   : > { %8660 = vmatprep.subr.mxu0 %v9939_v61  ;;  %8679 = vmatprep.subr.mxu1 %v9939_v61 }
 0x30c   : > { %8661 = vmatpush3.msra.mxu0 %v9939_v61  ;;  %8680 = vmatpush3.msra.mxu1 %v9939_v61 }
 0x30d   : > { %8662 = vmatprep.subr.mxu0 %v9945_v10  ;;  %8681 = vmatprep.subr.mxu1 %v9945_v10 }
 0x30e   : > { %8663 = vmatpush3.msra.mxu0 %v9945_v10  ;;  %8682 = vmatpush3.msra.mxu1 %v9945_v10 }
 0x30f   : > { %8664 = vmatprep.subr.mxu0 %v9951_v11  ;;  %8683 = vmatprep.subr.mxu1 %v9951_v11 }
 0x310   : > { %8665 = vmatpush3.msra.mxu0 %v9951_v11  ;;  %8684 = vmatpush3.msra.mxu1 %v9951_v11 }
 0x311   : > { %8666 = vmatprep.subr.mxu0 %v9957_v12  ;;  %8685 = vmatprep.subr.mxu1 %v9957_v12 }
 0x312   : > { %8667 = vmatpush3.msra.mxu0 %v9957_v12  ;;  %8686 = vmatpush3.msra.mxu1 %v9957_v12 }
 0x313   : > { %8687 = vmatprep.mubr.msk.f32.mxu1 %vm1433_vm12, %v7710_v19  ;;  %8668 = vmatprep.mubr.msk.f32.mxu0 %vm1433_vm12, %v7706_v22  ;;  %v2872_v22 = vld [vmem:[%s12168_s6 + $0x88] sm:$0xff] }
 0x314   : > { %8688 = vmatmul.mubr.msk.f32.vlgmr.msra.gmra.mxu1 %vm1433_vm12, %v7711_v23  ;;  %8690 = vmatprep.subr.mxu0 %v9919_v34  ;;  %v2914_v23 = vld [vmem:[%s12168_s6 + $0x1d8] sm:$0xff] }
 0x315   : > { %8709 = vmatprep.subr.mxu1 %v9919_v34  ;;  %8669 = vmatmul.mubr.msk.f32.vlgmr.msra.gmra.mxu0 %vm1433_vm12, %v7707_v25  ;;  %v2856_v25 = vld [vmem:[%s12168_s6 + $0x8] sm:$0xff] }
 0x316   : > { %8691 = vmatpush3.msra.mxu0 %v9919_v34  ;;  %8710 = vmatpush3.msra.mxu1 %v9919_v34 }
 0x317   : > { %8692 = vmatprep.subr.mxu0 %v9921_v7  ;;  %8711 = vmatprep.subr.mxu1 %v9921_v7 }
 0x318   : > { %8693 = vmatpush3.msra.mxu0 %v9921_v7  ;;  %8712 = vmatpush3.msra.mxu1 %v9921_v7 }
 0x319   : > { %8694 = vmatprep.subr.mxu0 %v9927_v8  ;;  %8713 = vmatprep.subr.mxu1 %v9927_v8 }
 0x31a   : > { %8695 = vmatpush3.msra.mxu0 %v9927_v8  ;;  %8714 = vmatpush3.msra.mxu1 %v9927_v8 }
 0x31b   : > { %8696 = vmatprep.subr.mxu0 %v9933_v48  ;;  %8715 = vmatprep.subr.mxu1 %v9933_v48 }
 0x31c   : > { %8697 = vmatpush3.msra.mxu0 %v9933_v48  ;;  %8716 = vmatpush3.msra.mxu1 %v9933_v48 }
 0x31d   : > { %8698 = vmatprep.subr.mxu0 %v9939_v61  ;;  %8717 = vmatprep.subr.mxu1 %v9939_v61 }
 0x31e   : > { %8699 = vmatpush3.msra.mxu0 %v9939_v61  ;;  %8718 = vmatpush3.msra.mxu1 %v9939_v61 }
 0x31f   : > { %8700 = vmatprep.subr.mxu0 %v9945_v10  ;;  %8719 = vmatprep.subr.mxu1 %v9945_v10 }
 0x320   : > { %8701 = vmatpush3.msra.mxu0 %v9945_v10  ;;  %8720 = vmatpush3.msra.mxu1 %v9945_v10 }
 0x321   : > { %8702 = vmatprep.subr.mxu0 %v9951_v11  ;;  %8721 = vmatprep.subr.mxu1 %v9951_v11 }
 0x322   : > { %8703 = vmatpush3.msra.mxu0 %v9951_v11  ;;  %8722 = vmatpush3.msra.mxu1 %v9951_v11 }
 0x323   : > { %8704 = vmatprep.subr.mxu0 %v9957_v12  ;;  %8723 = vmatprep.subr.mxu1 %v9957_v12 }
 0x324   : > { %8705 = vmatpush3.msra.mxu0 %v9957_v12  ;;  %8724 = vmatpush3.msra.mxu1 %v9957_v12 }
 0x325   : > { %8725 = vmatprep.mubr.msk.f32.mxu1 %vm1433_vm12, %v7718_v26  ;;  %8706 = vmatprep.mubr.msk.f32.mxu0 %vm1433_vm12, %v7714_v55  ;;  %v2898_v26 = vld [vmem:[%s12168_s6 + $0x158] sm:$0xff]  ;;  %v2871_v55 = vld [vmem:[%s12168_s6 + $0x80] sm:$0xff] }
 0x326   : > { %8726 = vmatmul.mubr.msk.f32.vlgmr.msra.gmra.mxu1 %vm1433_vm12, %v7719_v28  ;;  %8728 = vmatprep.subr.mxu0 %v9919_v34  ;;  %v2913_v28 = vld [vmem:[%s12168_s6 + $0x1d0] sm:$0xff] }
 0x327   : > { %8747 = vmatprep.subr.mxu1 %v9919_v34  ;;  %8707 = vmatmul.mubr.msk.f32.vlgmr.msra.gmra.mxu0 %vm1433_vm12, %v7715_v31  ;;  %v2855_v31 = vld [vmem:[%s12168_s6] sm:$0xff] }
 0x328   : > { %8729 = vmatpush3.msra.mxu0 %v9919_v34  ;;  %8748 = vmatpush3.msra.mxu1 %v9919_v34 }
 0x329   : > { %8730 = vmatprep.subr.mxu0 %v9921_v7  ;;  %8749 = vmatprep.subr.mxu1 %v9921_v7 }
 0x32a   : > { %8731 = vmatpush3.msra.mxu0 %v9921_v7  ;;  %8750 = vmatpush3.msra.mxu1 %v9921_v7 }
 0x32b   : > { %8732 = vmatprep.subr.mxu0 %v9927_v8  ;;  %8751 = vmatprep.subr.mxu1 %v9927_v8 }
 0x32c   : > { %8733 = vmatpush3.msra.mxu0 %v9927_v8  ;;  %8752 = vmatpush3.msra.mxu1 %v9927_v8 }
 0x32d   : > { %8734 = vmatprep.subr.mxu0 %v9933_v48  ;;  %8753 = vmatprep.subr.mxu1 %v9933_v48 }
 0x32e   : > { %8735 = vmatpush3.msra.mxu0 %v9933_v48  ;;  %8754 = vmatpush3.msra.mxu1 %v9933_v48 }
 0x32f   : > { %8736 = vmatprep.subr.mxu0 %v9939_v61  ;;  %8755 = vmatprep.subr.mxu1 %v9939_v61 }
 0x330   : > { %8737 = vmatpush3.msra.mxu0 %v9939_v61  ;;  %8756 = vmatpush3.msra.mxu1 %v9939_v61 }
 0x331   : > { %8738 = vmatprep.subr.mxu0 %v9945_v10  ;;  %8757 = vmatprep.subr.mxu1 %v9945_v10 }
 0x332   : > { %8739 = vmatpush3.msra.mxu0 %v9945_v10  ;;  %8758 = vmatpush3.msra.mxu1 %v9945_v10 }
 0x333   : > { %8740 = vmatprep.subr.mxu0 %v9951_v11  ;;  %8759 = vmatprep.subr.mxu1 %v9951_v11 }
 0x334   : > { %8741 = vmatpush3.msra.mxu0 %v9951_v11  ;;  %8760 = vmatpush3.msra.mxu1 %v9951_v11 }
 0x335   : > { %8742 = vmatprep.subr.mxu0 %v9957_v12  ;;  %8761 = vmatprep.subr.mxu1 %v9957_v12 }
 0x336   : > { %8743 = vmatpush3.msra.mxu0 %v9957_v12  ;;  %8762 = vmatpush3.msra.mxu1 %v9957_v12 }
 0x337   : > { %8763 = vmatprep.mubr.msk.f32.mxu1 %vm1433_vm12, %v7726_v47  ;;  %8744 = vmatprep.mubr.msk.f32.mxu0 %vm1433_vm12, %v7722_v44  ;;  %v2897_v44 = vld [vmem:[%s12168_s6 + $0x150] sm:$0xff] }
 0x338   : > { %8764 = vmatmul.mubr.msk.f32.vlgmr.msra.gmra.mxu1 %vm1433_vm12, %v7727_v62  ;;  %8766 = vmatprep.subr.mxu0 %v9919_v34  ;;  %v2912_v62 = vld [vmem:[%s12168_s6 + $0x1c8] sm:$0xff] }
 0x339   : > { %8785 = vmatprep.subr.mxu1 %v9919_v34  ;;  %8745 = vmatmul.mubr.msk.f32.vlgmr.msra.gmra.mxu0 %vm1433_vm12, %v7723_v32  ;;  %v2896_v32 = vld [vmem:[%s12168_s6 + $0x148] sm:$0xff] }
 0x33a   : > { %8767 = vmatpush3.msra.mxu0 %v9919_v34  ;;  %8786 = vmatpush3.msra.mxu1 %v9919_v34 }
 0x33b   : > { %8768 = vmatprep.subr.mxu0 %v9921_v7  ;;  %8787 = vmatprep.subr.mxu1 %v9921_v7 }
 0x33c   : > { %8769 = vmatpush3.msra.mxu0 %v9921_v7  ;;  %8788 = vmatpush3.msra.mxu1 %v9921_v7 }
 0x33d   : > { %8770 = vmatprep.subr.mxu0 %v9927_v8  ;;  %8789 = vmatprep.subr.mxu1 %v9927_v8 }
 0x33e   : > { %8771 = vmatpush3.msra.mxu0 %v9927_v8  ;;  %8790 = vmatpush3.msra.mxu1 %v9927_v8 }
 0x33f   : > { %8772 = vmatprep.subr.mxu0 %v9933_v48  ;;  %8791 = vmatprep.subr.mxu1 %v9933_v48 }
 0x340   : > { %8773 = vmatpush3.msra.mxu0 %v9933_v48  ;;  %8792 = vmatpush3.msra.mxu1 %v9933_v48 }
 0x341   : > { %8774 = vmatprep.subr.mxu0 %v9939_v61  ;;  %8793 = vmatprep.subr.mxu1 %v9939_v61 }
 0x342   : > { %8775 = vmatpush3.msra.mxu0 %v9939_v61  ;;  %8794 = vmatpush3.msra.mxu1 %v9939_v61 }
 0x343   : > { %8776 = vmatprep.subr.mxu0 %v9945_v10  ;;  %8795 = vmatprep.subr.mxu1 %v9945_v10 }
 0x344   : > { %8777 = vmatpush3.msra.mxu0 %v9945_v10  ;;  %8796 = vmatpush3.msra.mxu1 %v9945_v10 }
 0x345   : > { %8778 = vmatprep.subr.mxu0 %v9951_v11  ;;  %8797 = vmatprep.subr.mxu1 %v9951_v11 }
 0x346   : > { %8779 = vmatpush3.msra.mxu0 %v9951_v11  ;;  %8798 = vmatpush3.msra.mxu1 %v9951_v11 }
 0x347   : > { %8780 = vmatprep.subr.mxu0 %v9957_v12  ;;  %8799 = vmatprep.subr.mxu1 %v9957_v12 }
 0x348   : > { %8781 = vmatpush3.msra.mxu0 %v9957_v12  ;;  %8800 = vmatpush3.msra.mxu1 %v9957_v12 }
 0x349   : > { %8801 = vmatprep.mubr.msk.f32.mxu1 %vm1433_vm12, %v7734_v50  ;;  %8782 = vmatprep.mubr.msk.f32.mxu0 %vm1433_vm12, %v7730_v33  ;;  %v2911_v50 = vld [vmem:[%s12168_s6 + $0x1c0] sm:$0xff] }
 0x34a   : > { %8802 = vmatmul.mubr.msk.f32.vlgmr.msra.gmra.mxu1 %vm1433_vm12, %v7735_v21  ;;  %8804 = vmatprep.subr.mxu0 %v9919_v34  ;;  %v2895_v33 = vld [vmem:[%s12168_s6 + $0x140] sm:$0xff]  ;;  %v2910_v21 = vld [vmem:[%s12168_s6 + $0x1b8] sm:$0xff] }
 0x34b   : > { %8823 = vmatprep.subr.mxu1 %v9919_v34  ;;  %8783 = vmatmul.mubr.msk.f32.vlgmr.msra.gmra.mxu0 %vm1433_vm12, %v7731_v43  ;;  %v2894_v43 = vld [vmem:[%s12168_s6 + $0x138] sm:$0xff] }
 0x34c   : > { %8805 = vmatpush3.msra.mxu0 %v9919_v34  ;;  %8824 = vmatpush3.msra.mxu1 %v9919_v34 }
 0x34d   : > { %8806 = vmatprep.subr.mxu0 %v9921_v7  ;;  %8825 = vmatprep.subr.mxu1 %v9921_v7 }
 0x34e   : > { %8807 = vmatpush3.msra.mxu0 %v9921_v7  ;;  %8826 = vmatpush3.msra.mxu1 %v9921_v7 }
 0x34f   : > { %8808 = vmatprep.subr.mxu0 %v9927_v8  ;;  %8827 = vmatprep.subr.mxu1 %v9927_v8 }
 0x350   : > { %8809 = vmatpush3.msra.mxu0 %v9927_v8  ;;  %8828 = vmatpush3.msra.mxu1 %v9927_v8 }
 0x351   : > { %8810 = vmatprep.subr.mxu0 %v9933_v48  ;;  %8829 = vmatprep.subr.mxu1 %v9933_v48 }
 0x352   : > { %8811 = vmatpush3.msra.mxu0 %v9933_v48  ;;  %8830 = vmatpush3.msra.mxu1 %v9933_v48 }
 0x353   : > { %8812 = vmatprep.subr.mxu0 %v9939_v61  ;;  %8831 = vmatprep.subr.mxu1 %v9939_v61 }
 0x354   : > { %8813 = vmatpush3.msra.mxu0 %v9939_v61  ;;  %8832 = vmatpush3.msra.mxu1 %v9939_v61 }
 0x355   : > { %8814 = vmatprep.subr.mxu0 %v9945_v10  ;;  %8833 = vmatprep.subr.mxu1 %v9945_v10 }
 0x356   : > { %8815 = vmatpush3.msra.mxu0 %v9945_v10  ;;  %8834 = vmatpush3.msra.mxu1 %v9945_v10 }
 0x357   : > { %8816 = vmatprep.subr.mxu0 %v9951_v11  ;;  %8835 = vmatprep.subr.mxu1 %v9951_v11 }
 0x358   : > { %8817 = vmatpush3.msra.mxu0 %v9951_v11  ;;  %8836 = vmatpush3.msra.mxu1 %v9951_v11 }
 0x359   : > { %8818 = vmatprep.subr.mxu0 %v9957_v12  ;;  %8837 = vmatprep.subr.mxu1 %v9957_v12 }
 0x35a   : > { %8819 = vmatpush3.msra.mxu0 %v9957_v12  ;;  %8838 = vmatpush3.msra.mxu1 %v9957_v12 }
 0x35b   : > { %8839 = vmatprep.mubr.msk.f32.mxu1 %vm1433_vm12, %v7742_v17  ;;  %8820 = vmatprep.mubr.msk.f32.mxu0 %vm1433_vm12, %v7738_v39  ;;  %v2909_v17 = vld [vmem:[%s12168_s6 + $0x1b0] sm:$0xff] }
 0x35c   : > { %8840 = vmatmul.mubr.msk.f32.vlgmr.msra.gmra.mxu1 %vm1433_vm12, %v7743_v63  ;;  %8842 = vmatprep.subr.mxu0 %v9919_v34  ;;  %v2893_v39 = vld [vmem:[%s12168_s6 + $0x130] sm:$0xff]  ;;  %v2908_v63 = vld [vmem:[%s12168_s6 + $0x1a8] sm:$0xff] }
 0x35d   : > { %8861 = vmatprep.subr.mxu1 %v9919_v34  ;;  %8821 = vmatmul.mubr.msk.f32.vlgmr.msra.gmra.mxu0 %vm1433_vm12, %v7739_v3  ;;  %v2892_v3 = vld [vmem:[%s12168_s6 + $0x128] sm:$0xff] }
 0x35e   : > { %8843 = vmatpush3.msra.mxu0 %v9919_v34  ;;  %8862 = vmatpush3.msra.mxu1 %v9919_v34  ;;  %v2861_v34 = vld [vmem:[%s12168_s6 + $0x30] sm:$0xff] }
 0x35f   : > { %8844 = vmatprep.subr.mxu0 %v9921_v7  ;;  %8863 = vmatprep.subr.mxu1 %v9921_v7 }
 0x360   : > { %8845 = vmatpush3.msra.mxu0 %v9921_v7  ;;  %8864 = vmatpush3.msra.mxu1 %v9921_v7  ;;  %v2918_v7 = vld [vmem:[%s12168_s6 + $0x1f8] sm:$0xff] }
 0x361   : > { %8846 = vmatprep.subr.mxu0 %v9927_v8  ;;  %8865 = vmatprep.subr.mxu1 %v9927_v8 }
 0x362   : > { %8847 = vmatpush3.msra.mxu0 %v9927_v8  ;;  %8866 = vmatpush3.msra.mxu1 %v9927_v8  ;;  %v2875_v8 = vld [vmem:[%s12168_s6 + $0xa0] sm:$0xff] }
 0x363   : > { %8848 = vmatprep.subr.mxu0 %v9933_v48  ;;  %8867 = vmatprep.subr.mxu1 %v9933_v48 }
 0x364   : > { %8849 = vmatpush3.msra.mxu0 %v9933_v48  ;;  %8868 = vmatpush3.msra.mxu1 %v9933_v48 }
 0x365   : > { %8850 = vmatprep.subr.mxu0 %v9939_v61  ;;  %8869 = vmatprep.subr.mxu1 %v9939_v61 }
 0x366   : > { %8851 = vmatpush3.msra.mxu0 %v9939_v61  ;;  %8870 = vmatpush3.msra.mxu1 %v9939_v61  ;;  %v2874_v61 = vld [vmem:[%s12168_s6 + $0x98] sm:$0xff] }
 0x367   : > { %8852 = vmatprep.subr.mxu0 %v9945_v10  ;;  %8871 = vmatprep.subr.mxu1 %v9945_v10 }
 0x368   : > { %8853 = vmatpush3.msra.mxu0 %v9945_v10  ;;  %8872 = vmatpush3.msra.mxu1 %v9945_v10  ;;  %v2901_v10 = vld [vmem:[%s12168_s6 + $0x170] sm:$0xff] }
 0x369   : > { %8854 = vmatprep.subr.mxu0 %v9951_v11  ;;  %8873 = vmatprep.subr.mxu1 %v9951_v11 }
 0x36a   : > { %8855 = vmatpush3.msra.mxu0 %v9951_v11  ;;  %8874 = vmatpush3.msra.mxu1 %v9951_v11 }
 0x36b   : > { %8856 = vmatprep.subr.mxu0 %v9957_v12  ;;  %8875 = vmatprep.subr.mxu1 %v9957_v12 }
 0x36c   : > { %8857 = vmatpush3.msra.mxu0 %v9957_v12  ;;  %8876 = vmatpush3.msra.mxu1 %v9957_v12  ;;  %v2916_v12 = vld [vmem:[%s12168_s6 + $0x1e8] sm:$0xff] }
 0x36d   : > { %8877 = vmatprep.mubr.msk.f32.mxu1 %vm1433_vm12, %v7750_v40  ;;  %8858 = vmatprep.mubr.msk.f32.mxu0 %vm1433_vm12, %v7746_v29  ;;  %v2907_v40 = vld [vmem:[%s12168_s6 + $0x1a0] sm:$0xff] }
 0x36e   : > { %8878 = vmatmul.mubr.msk.f32.vlgmr.msra.gmra.mxu1 %vm1433_vm12, %v7751_v45  ;;  %8859 = vmatmul.mubr.msk.f32.vlgmr.msra.gmra.mxu0 %vm1433_vm12, %v7747_v41  ;;  %v2891_v29 = vld [vmem:[%s12168_s6 + $0x120] sm:$0xff]  ;;  %v2906_v45 = vld [vmem:[%s12168_s6 + $0x198] sm:$0xff] }
 0x36f   : > { %8028 = vmatprep.subr.mxu0 %v2886_v57  ;;  %8066 = vmatprep.subr.mxu1 %v2918_v7  ;;  %v2890_v41 = vld [vmem:[%s12168_s6 + $0x118] sm:$0xff]  ;;  %v2905_v57 = vld [vmem:[%s12168_s6 + $0x190] sm:$0xff] }
 0x370   : > { %8029 = vmatpush3.msra.mxu0 %v2870_v35  ;;  %8067 = vmatpush3.msra.mxu1 %v2902_v1  ;;  %v2889_v35 = vld [vmem:[%s12168_s6 + $0x110] sm:$0xff] }
 0x371   : > { %8030 = vmatprep.subr.mxu0 %v2885_v46  ;;  %8068 = vmatprep.subr.mxu1 %v2917_v38  ;;  %v2904_v46 = vld [vmem:[%s12168_s6 + $0x188] sm:$0xff] }
 0x372   : > { %8031 = vmatpush3.msra.mxu0 %v2869_v5  ;;  %8069 = vmatpush3.msra.mxu1 %v2901_v10  ;;  %v2888_v5 = vld [vmem:[%s12168_s6 + $0x108] sm:$0xff] }
 0x373   : > { %8032 = vmatprep.subr.mxu0 %v2884_v49  ;;  %8070 = vmatprep.subr.mxu1 %v2916_v12  ;;  %v2903_v49 = vld [vmem:[%s12168_s6 + $0x180] sm:$0xff] }
 0x374   : > { %8033 = vmatpush3.msra.mxu0 %v2868_v51  ;;  %8071 = vmatpush3.msra.mxu1 %v2900_v15  ;;  %v2887_v51 = vld [vmem:[%s12168_s6 + $0x100] sm:$0xff] }
 0x375   : > { %8034 = vmatprep.subr.mxu0 %v2883_v36  ;;  %8072 = vmatprep.subr.mxu1 %v2915_v2  ;;  %v2934_v2 = vld [vmem:[%s12168_s6 + $0x278] sm:$0xff] }
 0x376   : > { %8035 = vmatpush3.msra.mxu0 %v2867_v42  ;;  %8073 = vmatpush3.msra.mxu1 %v2899_v37  ;;  %v2950_v42 = vld [vmem:[%s12168_s6 + $0x2f8] sm:$0xff]  ;;  %v2949_v37 = vld [vmem:[%s12168_s6 + $0x2f0] sm:$0xff] }
 0x377   : > { %8036 = vmatprep.subr.mxu0 %v2882_v6  ;;  %8074 = vmatprep.subr.mxu1 %v2914_v23 }
 0x378   : > { %8037 = vmatpush3.msra.mxu0 %v2866_v54  ;;  %8075 = vmatpush3.msra.mxu1 %v2898_v26  ;;  %v2932_v26 = vld [vmem:[%s12168_s6 + $0x268] sm:$0xff] }
 0x379   : > { %8038 = vmatprep.subr.mxu0 %v2881_v20  ;;  %8076 = vmatprep.subr.mxu1 %v2913_v28  ;;  %v2931_v28 = vld [vmem:[%s12168_s6 + $0x260] sm:$0xff] }
 0x37a   : > { %8039 = vmatpush3.msra.mxu0 %v2865_v53  ;;  %8077 = vmatpush3.msra.mxu1 %v2897_v44  ;;  %v2945_v44 = vld [vmem:[%s12168_s6 + $0x2d0] sm:$0xff] }
 0x37b   : > { %8040 = vmatprep.subr.mxu0 %v2880_v56  ;;  %8078 = vmatprep.subr.mxu1 %v2912_v62  ;;  %v2929_v62 = vld [vmem:[%s12168_s6 + $0x250] sm:$0xff] }
 0x37c   : > { %8041 = vmatpush3.msra.mxu0 %v2864_v18  ;;  %8079 = vmatpush3.msra.mxu1 %v2896_v32  ;;  %v2944_v32 = vld [vmem:[%s12168_s6 + $0x2c8] sm:$0xff] }
 0x37d   : > { %8042 = vmatprep.subr.mxu0 %v2879_v24  ;;  %8080 = vmatprep.subr.mxu1 %v2911_v50  ;;  %v2982_v24 = vld [vmem:[%s12168_s6 + $0x3f8] sm:$0xff]  ;;  %v2928_v50 = vld [vmem:[%s12168_s6 + $0x248] sm:$0xff] }
 0x37e   : > { %8043 = vmatpush3.msra.mxu0 %v2863_v52  ;;  %8081 = vmatpush3.msra.mxu1 %v2895_v33  ;;  %v2943_v33 = vld [vmem:[%s12168_s6 + $0x2c0] sm:$0xff] }
 0x37f   : > { %8044 = vmatprep.subr.mxu0 %v2878_v58  ;;  %8082 = vmatprep.subr.mxu1 %v2910_v21  ;;  %v2927_v21 = vld [vmem:[%s12168_s6 + $0x240] sm:$0xff] }
 0x380   : > { %8045 = vmatpush3.msra.mxu0 %v2862_v59  ;;  %8083 = vmatpush3.msra.mxu1 %v2894_v43  ;;  %v2942_v43 = vld [vmem:[%s12168_s6 + $0x2b8] sm:$0xff] }
 0x381   : > { %8046 = vmatprep.subr.mxu0 %v2877_v60  ;;  %8084 = vmatprep.subr.mxu1 %v2909_v17  ;;  %v2926_v17 = vld [vmem:[%s12168_s6 + $0x238] sm:$0xff] }
 0x382   : > { %8047 = vmatpush3.msra.mxu0 %v2861_v34  ;;  %8085 = vmatpush3.msra.mxu1 %v2893_v39  ;;  %v2941_v39 = vld [vmem:[%s12168_s6 + $0x2b0] sm:$0xff] }
 0x383   : > { %8048 = vmatprep.subr.mxu0 %v2876_v30  ;;  %8086 = vmatprep.subr.mxu1 %v2908_v63  ;;  %v2925_v63 = vld [vmem:[%s12168_s6 + $0x230] sm:$0xff] }
 0x384   : > { %8049 = vmatpush3.msra.mxu0 %v2860_v4  ;;  %8087 = vmatpush3.msra.mxu1 %v2892_v3  ;;  %v2940_v3 = vld [vmem:[%s12168_s6 + $0x2a8] sm:$0xff] }
 0x385   : > { %8050 = vmatprep.subr.mxu0 %v2875_v8  ;;  %8088 = vmatprep.subr.mxu1 %v2907_v40  ;;  %v2924_v40 = vld [vmem:[%s12168_s6 + $0x228] sm:$0xff] }
 0x386   : > { %8051 = vmatpush3.msra.mxu0 %v2859_v9  ;;  %8089 = vmatpush3.msra.mxu1 %v2891_v29  ;;  %v2939_v29 = vld [vmem:[%s12168_s6 + $0x2a0] sm:$0xff] }
 0x387   : > { %8052 = vmatprep.subr.mxu0 %v2874_v61  ;;  %8090 = vmatprep.subr.mxu1 %v2906_v45  ;;  %v2923_v45 = vld [vmem:[%s12168_s6 + $0x220] sm:$0xff] }
 0x388   : > { %8053 = vmatpush3.msra.mxu0 %v2858_v27  ;;  %8091 = vmatpush3.msra.mxu1 %v2890_v41 }
 0x389   : > { %8054 = vmatprep.subr.mxu0 %v2873_v16  ;;  %8092 = vmatprep.subr.mxu1 %v2905_v57  ;;  %v2938_v57 = vld [vmem:[%s12168_s6 + $0x298] sm:$0xff] }
 0x38a   : > { %8055 = vmatpush3.msra.mxu0 %v2857_v14  ;;  %8093 = vmatpush3.msra.mxu1 %v2889_v35  ;;  %v2922_v35 = vld [vmem:[%s12168_s6 + $0x218] sm:$0xff] }
 0x38b   : > { %8056 = vmatprep.subr.mxu0 %v2872_v22  ;;  %8094 = vmatprep.subr.mxu1 %v2904_v46  ;;  %v2948_v22 = vld [vmem:[%s12168_s6 + $0x2e8] sm:$0xff]  ;;  %v2937_v46 = vld [vmem:[%s12168_s6 + $0x290] sm:$0xff] }
 0x38c   : > { %8057 = vmatpush3.msra.mxu0 %v2856_v25  ;;  %8095 = vmatpush3.msra.mxu1 %v2888_v5  ;;  %v2921_v5 = vld [vmem:[%s12168_s6 + $0x210] sm:$0xff] }
 0x38d   : > { %8058 = vmatprep.subr.mxu0 %v2871_v55  ;;  %8096 = vmatprep.subr.mxu1 %v2903_v49  ;;  %v2947_v55 = vld [vmem:[%s12168_s6 + $0x2e0] sm:$0xff] }
 0x38e   : > { %8059 = vmatpush3.msra.mxu0 %v2855_v31  ;;  %8097 = vmatpush3.msra.mxu1 %v2887_v51  ;;  %v2946_v31 = vld [vmem:[%s12168_s6 + $0x2d8] sm:$0xff]  ;;  %v2936_v51 = vld [vmem:[%s12168_s6 + $0x288] sm:$0xff] }
 0x38f   : > { %8104 = vmatprep.subr.mxu0 %v2950_v42  ;;  %8142 = vmatprep.subr.mxu1 %v2982_v24 }
 0x3b0   : > { %v8613_v0 = vpop.f32.mrf.mxu1 }
 0x3b1   : > { %v8594_v7 = vpop.f32.mrf.mxu0 }
 0x3b2   : > { %v1590_v48 = vpop.f32.mrf.mxu1 }
 0x3b3   : > { %v1506_v38 = vpop.f32.mrf.mxu0 }
 0x3c2   : > { %v8651_v11 = vpop.f32.mrf.mxu1 }
 0x3c3   : > { %v9103_v47 = vpack.i.bf16 %v8613_v0, %v8651_v11  ;;  %v8632_v9 = vpop.f32.mrf.mxu0 }
 0x3c4   : > { %v1758_v13 = vpop.f32.mrf.mxu1 }
 0x3c5   : > { %v9093_v19 = vpack.i.bf16 %v1590_v48, %v1758_v13  ;;  %v1674_v27 = vpop.f32.mrf.mxu0 }
 0x3c7   : > { %9094 = vrot.lane.b32.xlu0 %v9093_v19, %s9191_s17  ;;  %v2933_v19 = vld [vmem:[%s12168_s6 + $0x270] sm:$0xff] }
 0x3cb   : > { %9104 = vrot.lane.b32.xlu0 %v9103_v47, %s9191_s17  ;;  %v2930_v47 = vld [vmem:[%s12168_s6 + $0x258] sm:$0xff] }
 0x3d4   : > { %v8689_v36 = vpop.f32.mrf.mxu1 }
 0x3d5   : > { %v8670_v41 = vpop.f32.mrf.mxu0 }
 0x3d6   : > { %v1926_v6 = vpop.f32.mrf.mxu1 }
 0x3d7   : > { %v1842_v49 = vpop.f32.mrf.mxu0 }
 0x3e6   : > { %v8727_v54 = vpop.f32.mrf.mxu1 }
 0x3e7   : > { %v9108_v56 = vpack.i.bf16 %v8689_v36, %v8727_v54  ;;  %v2920_v36 = vld [vmem:[%s12168_s6 + $0x208] sm:$0xff]  ;;  %v8708_v42 = vpop.f32.mrf.mxu0  ;;  %v2919_v54 = vld [vmem:[%s12168_s6 + $0x200] sm:$0xff] }
 0x3e8   : > { %v2094_v20 = vpop.f32.mrf.mxu1 }
 0x3e9   : > { %v9098_v53 = vpack.i.bf16 %v1926_v6, %v2094_v20  ;;  %v2935_v6 = vld [vmem:[%s12168_s6 + $0x280] sm:$0xff] }
 0x3eb   : > { %9099 = vrot.lane.b32.xlu1 %v9098_v53, %s9191_s17  ;;  %v2010_v53 = vpop.f32.mrf.mxu0 }
 0x3ef   : > { %9109 = vrot.lane.b32.xlu1 %v9108_v56, %s9191_s17 }
 0x3f8   : > { %v8765_v18 = vpop.f32.mrf.mxu1 }
 0x3fa   : > { %v2262_v52 = vpop.f32.mrf.mxu1 }
 0x40a   : > { %v8803_v58 = vpop.f32.mrf.mxu1 }
 0x40b   : > { %v9118_v0 = vpack.i.bf16 %v8765_v18, %v8803_v58  ;;  %v2966_v58 = vld [vmem:[%s12168_s6 + $0x378] sm:$0xff] }
 0x40c   : > { %v2430_v59 = vpop.f32.mrf.mxu1 }
 0x40d   : > { %v9113_v60 = vpack.i.bf16 %v2262_v52, %v2430_v59 }
 0x40f   : > { %9114 = vrot.lane.b32.xlu0 %v9113_v60, %s9191_s17  ;;  %v2981_v60 = vld [vmem:[%s12168_s6 + $0x3f0] sm:$0xff] }
 0x413   : > { %9119 = vrot.lane.b32.xlu0 %v9118_v0, %s9191_s17 }
 0x41c   : > { %v8841_v34 = vpop.f32.mrf.mxu1 }
 0x41e   : > { %v2598_v30 = vpop.f32.mrf.mxu1 }
 0x42e   : > { %v8879_v4 = vpop.f32.mrf.mxu1 }
 0x42f   : > { %v9128_v48 = vpack.i.bf16 %v8841_v34, %v8879_v4  ;;  %v2980_v4 = vld [vmem:[%s12168_s6 + $0x3e8] sm:$0xff] }
 0x430   : > { %v2766_v1 = vpop.f32.mrf.mxu1 }
 0x431   : > { %v9123_v8 = vpack.i.bf16 %v2598_v30, %v2766_v1  ;;  %v2965_v30 = vld [vmem:[%s12168_s6 + $0x370] sm:$0xff] }
 0x433   : > { %9124 = vrot.lane.b32.xlu1 %v9123_v8, %s9191_s17  ;;  %v2964_v8 = vld [vmem:[%s12168_s6 + $0x368] sm:$0xff] }
 0x437   : > { %9129 = vrot.lane.b32.xlu1 %v9128_v48, %s9191_s17  ;;  %v2963_v48 = vld [vmem:[%s12168_s6 + $0x360] sm:$0xff] }
 0x439   : > { %v9095_v61 = vpop.permute.xlu0 %9094 }
 0x43a   : > { %v9097_v10 = vunpack.i.h.bf16 %v9095_v61  ;;  %v9096_v11 = vunpack.i.l.bf16 %v9095_v61  ;;  %v2962_v61 = vld [vmem:[%s12168_s6 + $0x358] sm:$0xff] }
 0x43c   : > { %v2841_v12 = vsel %vm1433_vm12, %v1674_v27, %v9096_v11  ;;  %v2839_v15 = vsel %vm1433_vm12, %v1506_v38, %v9097_v10  ;;  %v2979_v38 = vld [vmem:[%s12168_s6 + $0x3e0] sm:$0xff]  ;;  %v2977_v27 = vld [vmem:[%s12168_s6 + $0x3d0] sm:$0xff]  ;;  %v2976_v11 = vld [vmem:[%s12168_s6 + $0x3c8] sm:$0xff] }
 0x43d   : > { %v9105_v16 = vpop.permute.xlu0 %9104  ;;  %3054 = vmatprep.mubr.f32.mxu0 %v2841_v12  ;;  %v2961_v10 = vld [vmem:[%s12168_s6 + $0x350] sm:$0xff]  ;;  %v2960_v12 = vld [vmem:[%s12168_s6 + $0x348] sm:$0xff] }
 0x43e   : > { %v9107_v13 = vunpack.i.h.bf16 %v9105_v16  ;;  %v9106_v14 = vunpack.i.l.bf16 %v9105_v16  ;;  %3055 = vmatmul.mubr.f32.vlgmr.msra.gmra.mxu0 %v2839_v15  ;;  %v2975_v15 = vld [vmem:[%s12168_s6 + $0x3c0] sm:$0xff]  ;;  %v2974_v16 = vld [vmem:[%s12168_s6 + $0x3b8] sm:$0xff] }
 0x43f   : > { %8105 = vmatpush3.msra.mxu0 %v2934_v2  ;;  %v2959_v2 = vld [vmem:[%s12168_s6 + $0x340] sm:$0xff] }
 0x440   : > { %v2842_v23 = vsel %vm1433_vm12, %v8632_v9, %v9106_v14  ;;  %v2840_v25 = vsel %vm1433_vm12, %v8594_v7, %v9107_v13  ;;  %8106 = vmatprep.subr.mxu0 %v2949_v37  ;;  %v2978_v9 = vld [vmem:[%s12168_s6 + $0x3d8] sm:$0xff]  ;;  %v2973_v13 = vld [vmem:[%s12168_s6 + $0x3b0] sm:$0xff] }
 0x441   : > { %3059 = vmatprep.mubr.f32.mxu0 %v2842_v23  ;;  %8107 = vmatpush3.msra.mxu0 %v2933_v19  ;;  %v2958_v37 = vld [vmem:[%s12168_s6 + $0x338] sm:$0xff]  ;;  %v2957_v14 = vld [vmem:[%s12168_s6 + $0x330] sm:$0xff]  ;;  %v2972_v19 = vld [vmem:[%s12168_s6 + $0x3a8] sm:$0xff] }
 0x442   : > { %3060 = vmatmul.mubr.f32.gmra.mxu0 %v2840_v25  ;;  %8108 = vmatprep.subr.mxu0 %v2948_v22  ;;  %v2956_v22 = vld [vmem:[%s12168_s6 + $0x328] sm:$0xff]  ;;  %v2971_v23 = vld [vmem:[%s12168_s6 + $0x3a0] sm:$0xff] }
 0x443   : > { %8109 = vmatpush3.msra.mxu0 %v2932_v26  ;;  %v2955_v25 = vld [vmem:[%s12168_s6 + $0x320] sm:$0xff]  ;;  %v8746_v26 = vpop.f32.mrf.mxu0 }
 0x444   : > { %8110 = vmatprep.subr.mxu0 %v2947_v55  ;;  %v2970_v55 = vld [vmem:[%s12168_s6 + $0x398] sm:$0xff] }
 0x445   : > { %8111 = vmatpush3.msra.mxu0 %v2931_v28  ;;  %v2954_v28 = vld [vmem:[%s12168_s6 + $0x318] sm:$0xff] }
 0x446   : > { %8112 = vmatprep.subr.mxu0 %v2946_v31  ;;  %v2969_v31 = vld [vmem:[%s12168_s6 + $0x390] sm:$0xff] }
 0x447   : > { %8113 = vmatpush3.msra.mxu0 %v2930_v47  ;;  %v2953_v47 = vld [vmem:[%s12168_s6 + $0x310] sm:$0xff] }
 0x448   : > { %8114 = vmatprep.subr.mxu0 %v2945_v44  ;;  %v2178_v44 = vpop.f32.mrf.mxu0 }
 0x449   : > { %8115 = vmatpush3.msra.mxu0 %v2929_v62  ;;  %v2968_v62 = vld [vmem:[%s12168_s6 + $0x388] sm:$0xff] }
 0x44a   : > { %8116 = vmatprep.subr.mxu0 %v2944_v32  ;;  %v2952_v32 = vld [vmem:[%s12168_s6 + $0x308] sm:$0xff] }
 0x44b   : > { %8117 = vmatpush3.msra.mxu0 %v2928_v50  ;;  %v8784_v50 = vpop.f32.mrf.mxu0 }
 0x44c   : > { %8118 = vmatprep.subr.mxu0 %v2943_v33  ;;  %v2967_v33 = vld [vmem:[%s12168_s6 + $0x380] sm:$0xff] }
 0x44d   : > { %8119 = vmatpush3.msra.mxu0 %v2927_v21  ;;  %v2951_v21 = vld [vmem:[%s12168_s6 + $0x300] sm:$0xff] }
 0x44e   : > { %8120 = vmatprep.subr.mxu0 %v2942_v43 }
 0x44f   : > { %8121 = vmatpush3.msra.mxu0 %v2926_v17  ;;  %v2346_v17 = vpop.f32.mrf.mxu0 }
 0x450   : > { %8122 = vmatprep.subr.mxu0 %v2941_v39 }
 0x451   : > { %8123 = vmatpush3.msra.mxu0 %v2925_v63 }
 0x452   : > { %8124 = vmatprep.subr.mxu0 %v2940_v3 }
 0x453   : > { %8125 = vmatpush3.msra.mxu0 %v2924_v40 }
 0x454   : > { %8126 = vmatprep.subr.mxu0 %v2939_v29 }
 0x455   : > { %8127 = vmatpush3.msra.mxu0 %v2923_v45 }
 0x456   : > { %8128 = vmatprep.subr.mxu0 %v2938_v57 }
 0x457   : > { %8129 = vmatpush3.msra.mxu0 %v2922_v35 }
 0x458   : > { %8130 = vmatprep.subr.mxu0 %v2937_v46  ;;  %v8822_v46 = vpop.f32.mrf.mxu0 }
 0x459   : > { %8131 = vmatpush3.msra.mxu0 %v2921_v5 }
 0x45a   : > { %8132 = vmatprep.subr.mxu0 %v2936_v51  ;;  %v2514_v5 = vpop.f32.mrf.mxu0 }
 0x45b   : > { %8133 = vmatpush3.msra.mxu0 %v2920_v36 }
 0x45c   : > { %8134 = vmatprep.subr.mxu0 %v2935_v6 }
 0x45d   : > { %v9100_v20 = vpop.permute.xlu1 %9099  ;;  %8135 = vmatpush3.msra.mxu0 %v2919_v54 }
 0x45e   : > { %v9102_v56 = vunpack.i.h.bf16 %v9100_v20  ;;  %v9101_v18 = vunpack.i.l.bf16 %v9100_v20 }
 0x460   : > { %v2845_v24 = vsel %vm1433_vm12, %v2010_v53, %v9101_v18  ;;  %v2843_v52 = vsel %vm1433_vm12, %v1842_v49, %v9102_v56  ;;  %v8860_v49 = vpop.f32.mrf.mxu0 }
 0x461   : > { %v9110_v59 = vpop.permute.xlu1 %9109  ;;  %3129 = vmatprep.mubr.f32.mxu1 %v2845_v24 }
 0x462   : > { %v9112_v0 = vunpack.i.h.bf16 %v9110_v59  ;;  %v9111_v34 = vunpack.i.l.bf16 %v9110_v59  ;;  %3130 = vmatmul.mubr.f32.vlgmr.msra.gmra.mxu1 %v2843_v52  ;;  %v2682_v6 = vpop.f32.mrf.mxu0 }
 0x463   : > { %8143 = vmatpush3.msra.mxu1 %v2966_v58  ;;  %v9192_v58 = vmov 0.0  }
 0x464   : > { %v2846_v7 = vsel %vm1433_vm12, %v8708_v42, %v9111_v34  ;;  %v2844_v1 = vsel %vm1433_vm12, %v8670_v41, %v9112_v0  ;;  %8144 = vmatprep.subr.mxu1 %v2981_v60  ;;  %8887 = vmatprep.subr.mxu0 %v9192_v58 }
 0x465   : > { %3134 = vmatprep.mubr.f32.mxu1 %v2846_v7  ;;  %8145 = vmatpush3.msra.mxu1 %v2965_v30 }
 0x466   : > { %3135 = vmatmul.mubr.f32.gmra.mxu1 %v2844_v1  ;;  %8146 = vmatprep.subr.mxu1 %v2980_v4 }
 0x467   : > { %8147 = vmatpush3.msra.mxu1 %v2964_v8 }
 0x468   : > { %8148 = vmatprep.subr.mxu1 %v2979_v38 }
 0x469   : > { %8149 = vmatpush3.msra.mxu1 %v2963_v48 }
 0x46a   : > { %8150 = vmatprep.subr.mxu1 %v2978_v9 }
 0x46b   : > { %8151 = vmatpush3.msra.mxu1 %v2962_v61 }
 0x46c   : > { %8152 = vmatprep.subr.mxu1 %v2977_v27  ;;  %v7754_v27 = vld [vmem:[%s12169_s7] ss:$0 sm:$0xff] }
 0x46d   : > { %8153 = vmatpush3.msra.mxu1 %v2961_v10 }
 0x46e   : > { %8154 = vmatprep.subr.mxu1 %v2976_v11 }
 0x46f   : > { %8155 = vmatpush3.msra.mxu1 %v2960_v12 }
 0x470   : > { %8156 = vmatprep.subr.mxu1 %v2975_v15 }
 0x471   : > { %8157 = vmatpush3.msra.mxu1 %v2959_v2 }
 0x472   : > { %8158 = vmatprep.subr.mxu1 %v2974_v16 }
 0x473   : > { %8159 = vmatpush3.msra.mxu1 %v2958_v37 }
 0x474   : > { %8160 = vmatprep.subr.mxu1 %v2973_v13 }
 0x475   : > { %8161 = vmatpush3.msra.mxu1 %v2957_v14 }
 0x476   : > { %8162 = vmatprep.subr.mxu1 %v2972_v19 }
 0x477   : > { %8163 = vmatpush3.msra.mxu1 %v2956_v22 }
 0x478   : > { %8164 = vmatprep.subr.mxu1 %v2971_v23 }
 0x479   : > { %8165 = vmatpush3.msra.mxu1 %v2955_v25 }
 0x47a   : > { %8166 = vmatprep.subr.mxu1 %v2970_v55 }
 0x47b   : > { %8167 = vmatpush3.msra.mxu1 %v2954_v28 }
 0x47c   : > { %8168 = vmatprep.subr.mxu1 %v2969_v31 }
 0x47d   : > { %8169 = vmatpush3.msra.mxu1 %v2953_v47 }
 0x47e   : > { %8170 = vmatprep.subr.mxu1 %v2968_v62 }
 0x47f   : > { %8171 = vmatpush3.msra.mxu1 %v2952_v32 }
 0x480   : > { %8172 = vmatprep.subr.mxu1 %v2967_v33  ;;  %v7756_v33 = vld [vmem:[%s12170_s8 + $0x4] sm:$0xf] }
 0x481   : > { %v9115_v43 = vpop.permute.xlu0 %9114  ;;  %8173 = vmatpush3.msra.mxu1 %v2951_v21  ;;  %v7760_v21 = vld [vmem:[%s12170_s8 + $0xc] sm:$0xf] }
 0x482   : > { %v9117_v39 = vunpack.i.h.bf16 %v9115_v43  ;;  %v9116_v63 = vunpack.i.l.bf16 %v9115_v43  ;;  %8880 = vmatprep.subr.mxu1 %v9192_v58  ;;  %v7758_v43 = vld [vmem:[%s12170_s8 + $0x8] sm:$0xf] }
 0x484   : > { %v2849_v3 = vsel %vm1433_vm12, %v2346_v17, %v9116_v63  ;;  %v2847_v40 = vsel %vm1433_vm12, %v2178_v44, %v9117_v39  ;;  %v7764_v17 = vld [vmem:[%s12170_s8 + $0x14] sm:$0xf]  ;;  %v7762_v39 = vld [vmem:[%s12170_s8 + $0x10] sm:$0xf]  ;;  %v7768_v63 = vld [vmem:[%s12170_s8 + $0x1c] sm:$0xf] }
 0x485   : > { %v9120_v29 = vpop.permute.xlu0 %9119  ;;  %3204 = vmatprep.mubr.f32.mxu0 %v2849_v3  ;;  %v7766_v3 = vld [vmem:[%s12170_s8 + $0x18] sm:$0xf] }
 0x486   : > { %v9122_v45 = vunpack.i.h.bf16 %v9120_v29  ;;  %v9121_v41 = vunpack.i.l.bf16 %v9120_v29  ;;  %3205 = vmatmul.mubr.f32.vlgmr.msra.gmra.mxu0 %v2847_v40  ;;  %v7770_v40 = vld [vmem:[%s12170_s8 + $0x20] sm:$0xf]  ;;  %v7772_v29 = vld [vmem:[%s12170_s8 + $0x24] sm:$0xf] }
 0x488   : > { %v2850_v57 = vsel %vm1433_vm12, %v8784_v50, %v9121_v41  ;;  %v2848_v35 = vsel %vm1433_vm12, %v8746_v26, %v9122_v45  ;;  %v3292_v50 = vld [vmem:[%s12170_s8] sm:$0xf]  ;;  %v7774_v45 = vld [vmem:[%s12170_s8 + $0x28] sm:$0xf]  ;;  %v7776_v41 = vld [vmem:[%s12170_s8 + $0x2c] sm:$0xf] }
 0x489   : > { %3209 = vmatprep.mubr.f32.mxu0 %v2850_v57  ;;  %v7778_v57 = vld [vmem:[%s12170_s8 + $0x30] sm:$0xf] }
 0x48a   : > { %3210 = vmatmul.mubr.f32.gmra.mxu0 %v2848_v35  ;;  %v7780_v35 = vld [vmem:[%s12170_s8 + $0x34] sm:$0xf] }
 0x48b   : > { %8891 = vmatprep.mubr.msk.f32.mxu0 %vm9193_vm13, %v9192_v58 }
 0x4a5   : > { %v9125_v51 = vpop.permute.xlu1 %9124 }
 0x4a6   : > { %v9127_v36 = vunpack.i.h.bf16 %v9125_v51  ;;  %v9126_v42 = vunpack.i.l.bf16 %v9125_v51  ;;  %v4546_v51 = vld [vmem:[%s12171_s9 + $0x78] sm:$0xff] }
 0x4a8   : > { %v2853_v54 = vsel %vm1433_vm12, %v2682_v6, %v9126_v42  ;;  %v2851_v20 = vsel %vm1433_vm12, %v2514_v5, %v9127_v36  ;;  %v7782_v5 = vld [vmem:[%s12170_s8 + $0x38] sm:$0xf]  ;;  %v4561_v36 = vld [vmem:[%s12171_s9 + $0xf0] sm:$0xff]  ;;  %v4560_v6 = vld [vmem:[%s12171_s9 + $0xe8] sm:$0xff] }
 0x4a9   : > { %v9130_v53 = vpop.permute.xlu1 %9129  ;;  %3279 = vmatprep.mubr.f32.mxu1 %v2853_v54  ;;  %v4545_v42 = vld [vmem:[%s12171_s9 + $0x70] sm:$0xff]  ;;  %v4544_v54 = vld [vmem:[%s12171_s9 + $0x68] sm:$0xff] }
 0x4aa   : > { %v9132_v56 = vunpack.i.h.bf16 %v9130_v53  ;;  %v9131_v18 = vunpack.i.l.bf16 %v9130_v53  ;;  %3280 = vmatmul.mubr.f32.vlgmr.msra.gmra.mxu1 %v2851_v20  ;;  %v4594_v20 = vld [vmem:[%s12171_s9 + $0x1f8] sm:$0xff] }
 0x4ab   : > { %v4578_v53 = vld [vmem:[%s12171_s9 + $0x178] sm:$0xff] }
 0x4ac   : > { %v2854_v24 = vsel %vm1433_vm12, %v8860_v49, %v9131_v18  ;;  %v2852_v52 = vsel %vm1433_vm12, %v8822_v46, %v9132_v56  ;;  %v7784_v46 = vld [vmem:[%s12170_s8 + $0x3c] sm:$0xf]  ;;  %v4559_v56 = vld [vmem:[%s12171_s9 + $0xe0] sm:$0xff]  ;;  %v4593_v18 = vld [vmem:[%s12171_s9 + $0x1f0] sm:$0xff] }
 0x4ad   : > { %3284 = vmatprep.mubr.f32.mxu1 %v2854_v24  ;;  %v4562_v49 = vld [vmem:[%s12171_s9 + $0xf8] sm:$0xff]  ;;  %v4543_v24 = vld [vmem:[%s12171_s9 + $0x60] sm:$0xff] }
 0x4ae   : > { %3285 = vmatmul.mubr.f32.gmra.mxu1 %v2852_v52  ;;  %v4577_v52 = vld [vmem:[%s12171_s9 + $0x170] sm:$0xff] }
 0x4af   : > { %8884 = vmatprep.mubr.msk.f32.mxu1 %vm9193_vm13, %v9192_v58 }
 0x4fe   : > { %v8060_v59 = vpop.f32.mrf.mxu0 }
 0x500   : > { %v8061_v60 = vpop.f32.mrf.mxu0 }
 0x501   : > { %v8062_v9 = vadd.f32 %v8061_v60, %v8060_v59  ;;  %v4592_v59 = vld [vmem:[%s12171_s9 + $0x1e8] sm:$0xff]  ;;  %v4558_v60 = vld [vmem:[%s12171_s9 + $0xd8] sm:$0xff] }
 0x502   : > { %v8063_v0 = vpop.f32.mrf.mxu0 }
 0x503   : > { %v3057_v16 = vadd.f32 %v8062_v9, %v7754_v27  ;;  %v4540_v9 = vld [vmem:[%s12171_s9 + $0x48] sm:$0xff] }
 0x504   : > { %v8064_v34 = vpop.f32.mrf.mxu0 }
 0x505   : > { %v8065_v61 = vadd.f32 %v8064_v34, %v8063_v0  ;;  %v4576_v0 = vld [vmem:[%s12171_s9 + $0x168] sm:$0xff]  ;;  %v4542_v34 = vld [vmem:[%s12171_s9 + $0x58] sm:$0xff] }
 0x507   : > { %v3062_v37 = vadd.f32 %v8065_v61, %v7754_v27  ;;  %v4589_v61 = vld [vmem:[%s12171_s9 + $0x1d0] sm:$0xff]  ;;  %v4555_v27 = vld [vmem:[%s12171_s9 + $0xc0] sm:$0xff] }
 0x522   : > { %v8098_v30 = vpop.f32.mrf.mxu1 }
 0x524   : > { %v8099_v7 = vpop.f32.mrf.mxu1 }
 0x525   : > { %v8100_v12 = vadd.f32 %v8099_v7, %v8098_v30  ;;  %v4591_v30 = vld [vmem:[%s12171_s9 + $0x1e0] sm:$0xff] }
 0x526   : > { %v8101_v8 = vpop.f32.mrf.mxu1  ;;  %v4575_v7 = vld [vmem:[%s12171_s9 + $0x160] sm:$0xff] }
 0x527   : > { %v3132_v22 = vadd.f32 %v8100_v12, %v3057_v16  ;;  %v4588_v12 = vld [vmem:[%s12171_s9 + $0x1c8] sm:$0xff]  ;;  %v4538_v16 = vld [vmem:[%s12171_s9 + $0x38] sm:$0xff] }
 0x528   : > { %v8102_v48 = vpop.f32.mrf.mxu1 }
 0x529   : > { %v8103_v15 = vadd.f32 %v8102_v48, %v8101_v8  ;;  %v4590_v8 = vld [vmem:[%s12171_s9 + $0x1d8] sm:$0xff] }
 0x52a   : > { %v4574_v48 = vld [vmem:[%s12171_s9 + $0x158] sm:$0xff] }
 0x52b   : > { %v3137_v23 = vadd.f32 %v8103_v15, %v3062_v37  ;;  %v4554_v15 = vld [vmem:[%s12171_s9 + $0xb8] sm:$0xff]  ;;  %v4587_v37 = vld [vmem:[%s12171_s9 + $0x1c0] sm:$0xff] }
 0x546   : > { %v8136_v4 = vpop.f32.mrf.mxu0 }
 0x548   : > { %v8137_v1 = vpop.f32.mrf.mxu0 }
 0x549   : > { %v8138_v13 = vadd.f32 %v8137_v1, %v8136_v4  ;;  %v4557_v4 = vld [vmem:[%s12171_s9 + $0xd0] sm:$0xff] }
 0x54a   : > { %v8139_v38 = vpop.f32.mrf.mxu0  ;;  %v4541_v1 = vld [vmem:[%s12171_s9 + $0x50] sm:$0xff] }
 0x54b   : > { %v3207_v55 = vadd.f32 %v8138_v13, %v3132_v22  ;;  %v4553_v13 = vld [vmem:[%s12171_s9 + $0xb0] sm:$0xff]  ;;  %v4586_v22 = vld [vmem:[%s12171_s9 + $0x1b8] sm:$0xff] }
 0x54c   : > { %v8140_v10 = vpop.f32.mrf.mxu0 }
 0x54d   : > { %v8141_v14 = vadd.f32 %v8140_v10, %v8139_v38  ;;  %v4556_v38 = vld [vmem:[%s12171_s9 + $0xc8] sm:$0xff]  ;;  %v4573_v10 = vld [vmem:[%s12171_s9 + $0x150] sm:$0xff] }
 0x54f   : > { %v3212_v28 = vadd.f32 %v8141_v14, %v3137_v23  ;;  %v4571_v14 = vld [vmem:[%s12171_s9 + $0x140] sm:$0xff]  ;;  %v4552_v23 = vld [vmem:[%s12171_s9 + $0xa8] sm:$0xff] }
 0x56a   : > { %v8174_v11 = vpop.f32.mrf.mxu1 }
 0x56c   : > { %v8175_v2 = vpop.f32.mrf.mxu1 }
 0x56d   : > { %v8176_v25 = vadd.f32 %v8175_v2, %v8174_v11  ;;  %v4539_v11 = vld [vmem:[%s12171_s9 + $0x40] sm:$0xff]  ;;  %v4572_v2 = vld [vmem:[%s12171_s9 + $0x148] sm:$0xff] }
 0x56e   : > { %v8177_v19 = vpop.f32.mrf.mxu1 }
 0x56f   : > { %v3282_v47 = vadd.f32 %v8176_v25, %v3207_v55  ;;  %v4570_v25 = vld [vmem:[%s12171_s9 + $0x138] sm:$0xff]  ;;  %v4585_v55 = vld [vmem:[%s12171_s9 + $0x1b0] sm:$0xff] }
 0x570   : > { %v8178_v26 = vpop.f32.mrf.mxu1 }
 0x571   : > { %v8179_v31 = vadd.f32 %v8178_v26, %v8177_v19  ;;  %v10730_v32 = vmax.f32 %v3282_v47, 0.0  ;;  %v4537_v19 = vld [vmem:[%s12171_s9 + $0x30] sm:$0xff]  ;;  %v4536_v26 = vld [vmem:[%s12171_s9 + $0x28] sm:$0xff]  ;;  %v4535_v47 = vld [vmem:[%s12171_s9 + $0x20] sm:$0xff] }
 0x573   : > { %v3287_v44 = vadd.f32 %v8179_v31, %v3212_v28  ;;  %v4551_v28 = vld [vmem:[%s12171_s9 + $0xa0] sm:$0xff]  ;;  %v4569_v31 = vld [vmem:[%s12171_s9 + $0x130] sm:$0xff] }
 0x575   : > { %v10728_v62 = vmax.f32 %v3287_v44, 0.0  ;;  %v4584_v44 = vld [vmem:[%s12171_s9 + $0x1a8] sm:$0xff] }
 0x577   : > { %8881 = vmatpush3.msra.mxu1 %v10728_v62  ;;  %8888 = vmatpush3.msra.mxu0 %v10728_v62 }
 0x578   : > { %8882 = vmatprep.subr.mxu1 %v9192_v58  ;;  %8889 = vmatprep.subr.mxu0 %v9192_v58 }
 0x579   : > { %8883 = vmatpush3.msra.mxu1 %v10730_v32  ;;  %8890 = vmatpush3.msra.mxu0 %v10730_v32 }
 0x57a   : > { %8885 = vmatmul.mubr.msk.f32.vlgmr.msra.gmra.mxu1 %vm1232_vm6, %v3292_v50  ;;  %8894 = vmatprep.subr.mxu0 %v9192_v58  ;;  %v4549_v50 = vld [vmem:[%s12171_s9 + $0x90] sm:$0xff] }
 0x57b   : > { %8901 = vmatprep.subr.mxu1 %v9192_v58  ;;  %8892 = vmatmul.mubr.msk.f32.vlgmr.msra.gmra.mxu0 %vm1232_vm6, %v7756_v33  ;;  %v4533_v33 = vld [vmem:[%s12171_s9 + $0x10] sm:$0xff] }
 0x57c   : > { %8895 = vmatpush3.msra.mxu0 %v10728_v62  ;;  %8902 = vmatpush3.msra.mxu1 %v10728_v62 }
 0x57d   : > { %8896 = vmatprep.subr.mxu0 %v9192_v58  ;;  %8903 = vmatprep.subr.mxu1 %v9192_v58 }
 0x57e   : > { %8897 = vmatpush3.msra.mxu0 %v10730_v32  ;;  %8904 = vmatpush3.msra.mxu1 %v10730_v32 }
 0x57f   : > { %8905 = vmatprep.mubr.msk.f32.mxu1 %vm9193_vm13, %v9192_v58  ;;  %8898 = vmatprep.mubr.msk.f32.mxu0 %vm9193_vm13, %v9192_v58 }
 0x580   : > { %8906 = vmatmul.mubr.msk.f32.vlgmr.msra.gmra.mxu1 %vm1232_vm6, %v7760_v21  ;;  %8908 = vmatprep.subr.mxu0 %v9192_v58  ;;  %v4548_v21 = vld [vmem:[%s12171_s9 + $0x88] sm:$0xff] }
 0x581   : > { %8915 = vmatprep.subr.mxu1 %v9192_v58  ;;  %8899 = vmatmul.mubr.msk.f32.vlgmr.msra.gmra.mxu0 %vm1232_vm6, %v7758_v43  ;;  %v4532_v43 = vld [vmem:[%s12171_s9 + $0x8] sm:$0xff] }
 0x582   : > { %8909 = vmatpush3.msra.mxu0 %v10728_v62  ;;  %8916 = vmatpush3.msra.mxu1 %v10728_v62 }
 0x583   : > { %8910 = vmatprep.subr.mxu0 %v9192_v58  ;;  %8917 = vmatprep.subr.mxu1 %v9192_v58 }
 0x584   : > { %8911 = vmatpush3.msra.mxu0 %v10730_v32  ;;  %8918 = vmatpush3.msra.mxu1 %v10730_v32 }
 0x585   : > { %8919 = vmatprep.mubr.msk.f32.mxu1 %vm9193_vm13, %v9192_v58  ;;  %8912 = vmatprep.mubr.msk.f32.mxu0 %vm9193_vm13, %v9192_v58 }
 0x586   : > { %8920 = vmatmul.mubr.msk.f32.vlgmr.msra.gmra.mxu1 %vm1232_vm6, %v7764_v17  ;;  %8922 = vmatprep.subr.mxu0 %v9192_v58  ;;  %v4568_v17 = vld [vmem:[%s12171_s9 + $0x128] sm:$0xff] }
 0x587   : > { %8929 = vmatprep.subr.mxu1 %v9192_v58  ;;  %8913 = vmatmul.mubr.msk.f32.vlgmr.msra.gmra.mxu0 %vm1232_vm6, %v7762_v39  ;;  %v4547_v39 = vld [vmem:[%s12171_s9 + $0x80] sm:$0xff] }
 0x588   : > { %8923 = vmatpush3.msra.mxu0 %v10728_v62  ;;  %8930 = vmatpush3.msra.mxu1 %v10728_v62 }
 0x589   : > { %8924 = vmatprep.subr.mxu0 %v9192_v58  ;;  %8931 = vmatprep.subr.mxu1 %v9192_v58 }
 0x58a   : > { %8925 = vmatpush3.msra.mxu0 %v10730_v32  ;;  %8932 = vmatpush3.msra.mxu1 %v10730_v32 }
 0x58b   : > { %8933 = vmatprep.mubr.msk.f32.mxu1 %vm9193_vm13, %v9192_v58  ;;  %8926 = vmatprep.mubr.msk.f32.mxu0 %vm9193_vm13, %v9192_v58 }
 0x58c   : > { %8934 = vmatmul.mubr.msk.f32.vlgmr.msra.gmra.mxu1 %vm1232_vm6, %v7768_v63  ;;  %8936 = vmatprep.subr.mxu0 %v9192_v58  ;;  %v4583_v63 = vld [vmem:[%s12171_s9 + $0x1a0] sm:$0xff] }
 0x58d   : > { %8943 = vmatprep.subr.mxu1 %v9192_v58  ;;  %8927 = vmatmul.mubr.msk.f32.vlgmr.msra.gmra.mxu0 %vm1232_vm6, %v7766_v3  ;;  %v4531_v3 = vld [vmem:[%s12171_s9] sm:$0xff] }
 0x58e   : > { %8937 = vmatpush3.msra.mxu0 %v10728_v62  ;;  %8944 = vmatpush3.msra.mxu1 %v10728_v62 }
 0x58f   : > { %8938 = vmatprep.subr.mxu0 %v9192_v58  ;;  %8945 = vmatprep.subr.mxu1 %v9192_v58 }
 0x590   : > { %8939 = vmatpush3.msra.mxu0 %v10730_v32  ;;  %8946 = vmatpush3.msra.mxu1 %v10730_v32 }
 0x591   : > { %8940 = vmatprep.mubr.msk.f32.mxu0 %vm9193_vm13, %v9192_v58  ;;  %8947 = vmatprep.mubr.msk.f32.mxu1 %vm9193_vm13, %v9192_v58 }
 0x592   : > { %8950 = vmatprep.subr.mxu0 %v9192_v58  ;;  %8957 = vmatprep.subr.mxu1 %v9192_v58 }
 0x593   : > { %8941 = vmatmul.mubr.msk.f32.vlgmr.msra.gmra.mxu0 %vm1232_vm6, %v7770_v40  ;;  %8948 = vmatmul.mubr.msk.f32.vlgmr.msra.gmra.mxu1 %vm1232_vm6, %v7772_v29  ;;  %v4567_v40 = vld [vmem:[%s12171_s9 + $0x120] sm:$0xff]  ;;  %v4582_v29 = vld [vmem:[%s12171_s9 + $0x198] sm:$0xff] }
 0x594   : > { %8951 = vmatpush3.msra.mxu0 %v10728_v62  ;;  %8958 = vmatpush3.msra.mxu1 %v10728_v62 }
 0x595   : > { %8952 = vmatprep.subr.mxu0 %v9192_v58  ;;  %8959 = vmatprep.subr.mxu1 %v9192_v58 }
 0x596   : > { %8953 = vmatpush3.msra.mxu0 %v10730_v32  ;;  %8960 = vmatpush3.msra.mxu1 %v10730_v32 }
 0x597   : > { %8954 = vmatprep.mubr.msk.f32.mxu0 %vm9193_vm13, %v9192_v58  ;;  %8961 = vmatprep.mubr.msk.f32.mxu1 %vm9193_vm13, %v9192_v58 }
 0x598   : > { %8964 = vmatprep.subr.mxu0 %v9192_v58  ;;  %8971 = vmatprep.subr.mxu1 %v9192_v58 }
 0x599   : > { %8955 = vmatmul.mubr.msk.f32.vlgmr.msra.gmra.mxu0 %vm1232_vm6, %v7774_v45  ;;  %8962 = vmatmul.mubr.msk.f32.vlgmr.msra.gmra.mxu1 %vm1232_vm6, %v7776_v41  ;;  %v4626_v45 = vld [vmem:[%s12171_s9 + $0x2f8] sm:$0xff] }
 0x59a   : > { %8965 = vmatpush3.msra.mxu0 %v10728_v62  ;;  %8972 = vmatpush3.msra.mxu1 %v10728_v62 }
 0x59b   : > { %8966 = vmatprep.subr.mxu0 %v9192_v58  ;;  %8973 = vmatprep.subr.mxu1 %v9192_v58 }
 0x59c   : > { %8967 = vmatpush3.msra.mxu0 %v10730_v32  ;;  %8974 = vmatpush3.msra.mxu1 %v10730_v32 }
 0x59d   : > { %8968 = vmatprep.mubr.msk.f32.mxu0 %vm9193_vm13, %v9192_v58  ;;  %8975 = vmatprep.mubr.msk.f32.mxu1 %vm9193_vm13, %v9192_v58 }
 0x59e   : > { %8978 = vmatprep.subr.mxu0 %v9192_v58  ;;  %8985 = vmatprep.subr.mxu1 %v9192_v58 }
 0x59f   : > { %8969 = vmatmul.mubr.msk.f32.vlgmr.msra.gmra.mxu0 %vm1232_vm6, %v7778_v57  ;;  %8976 = vmatmul.mubr.msk.f32.vlgmr.msra.gmra.mxu1 %vm1232_vm6, %v7780_v35  ;;  %v4566_v57 = vld [vmem:[%s12171_s9 + $0x118] sm:$0xff] }
 0x5a0   : > { %8979 = vmatpush3.msra.mxu0 %v10728_v62  ;;  %8986 = vmatpush3.msra.mxu1 %v10728_v62  ;;  %v4550_v62 = vld [vmem:[%s12171_s9 + $0x98] sm:$0xff] }
 0x5a1   : > { %8980 = vmatprep.subr.mxu0 %v9192_v58  ;;  %8987 = vmatprep.subr.mxu1 %v9192_v58 }
 0x5a2   : > { %8981 = vmatpush3.msra.mxu0 %v10730_v32  ;;  %8988 = vmatpush3.msra.mxu1 %v10730_v32  ;;  %v4534_v32 = vld [vmem:[%s12171_s9 + $0x18] sm:$0xff] }
 0x5a3   : > { %8989 = vmatprep.mubr.msk.f32.mxu1 %vm9193_vm13, %v9192_v58  ;;  %8982 = vmatprep.mubr.msk.f32.mxu0 %vm9193_vm13, %v9192_v58 }
 0x5a4   : > { %8990 = vmatmul.mubr.msk.f32.vlgmr.msra.gmra.mxu1 %vm1232_vm6, %v7784_v46  ;;  %8983 = vmatmul.mubr.msk.f32.vlgmr.msra.gmra.mxu0 %vm1232_vm6, %v7782_v5  ;;  %v4581_v46 = vld [vmem:[%s12171_s9 + $0x190] sm:$0xff] }
 0x5a5   : > { %8228 = vmatprep.subr.mxu0 %v4562_v49  ;;  %8263 = vmatprep.subr.mxu1 %v4594_v20  ;;  %v4565_v49 = vld [vmem:[%s12171_s9 + $0x110] sm:$0xff] }
 0x5a6   : > { %8229 = vmatpush3.msra.mxu0 %v4546_v51  ;;  %8264 = vmatpush3.msra.mxu1 %v4578_v53  ;;  %v4564_v53 = vld [vmem:[%s12171_s9 + $0x108] sm:$0xff] }
 0x5a7   : > { %8230 = vmatprep.subr.mxu0 %v4561_v36  ;;  %8265 = vmatprep.subr.mxu1 %v4593_v18  ;;  %v4580_v36 = vld [vmem:[%s12171_s9 + $0x188] sm:$0xff] }
 0x5a8   : > { %8231 = vmatpush3.msra.mxu0 %v4545_v42  ;;  %8266 = vmatpush3.msra.mxu1 %v4577_v52  ;;  %v4658_v52 = vld [vmem:[%s12171_s9 + $0x3f8] sm:$0xff] }
 0x5a9   : > { %8232 = vmatprep.subr.mxu0 %v4560_v6  ;;  %8267 = vmatprep.subr.mxu1 %v4592_v59 }
 0x5aa   : > { %8233 = vmatpush3.msra.mxu0 %v4544_v54  ;;  %8268 = vmatpush3.msra.mxu1 %v4576_v0 }
 0x5ab   : > { %8234 = vmatprep.subr.mxu0 %v4559_v56  ;;  %8269 = vmatprep.subr.mxu1 %v4591_v30  ;;  %v4579_v56 = vld [vmem:[%s12171_s9 + $0x180] sm:$0xff] }
 0x5ac   : > { %8235 = vmatpush3.msra.mxu0 %v4543_v24  ;;  %8270 = vmatpush3.msra.mxu1 %v4575_v7  ;;  %v4563_v24 = vld [vmem:[%s12171_s9 + $0x100] sm:$0xff] }
 0x5ad   : > { %8236 = vmatprep.subr.mxu0 %v4558_v60  ;;  %8271 = vmatprep.subr.mxu1 %v4590_v8 }
 0x5ae   : > { %8237 = vmatpush3.msra.mxu0 %v4542_v34  ;;  %8272 = vmatpush3.msra.mxu1 %v4574_v48 }
 0x5af   : > { %8238 = vmatprep.subr.mxu0 %v4557_v4  ;;  %8273 = vmatprep.subr.mxu1 %v4589_v61 }
 0x5b0   : > { %8239 = vmatpush3.msra.mxu0 %v4541_v1  ;;  %8274 = vmatpush3.msra.mxu1 %v4573_v10 }
 0x5b1   : > { %8240 = vmatprep.subr.mxu0 %v4556_v38  ;;  %8275 = vmatprep.subr.mxu1 %v4588_v12 }
 0x5b2   : > { %8241 = vmatpush3.msra.mxu0 %v4540_v9  ;;  %8276 = vmatpush3.msra.mxu1 %v4572_v2 }
 0x5b3   : > { %8242 = vmatprep.subr.mxu0 %v4555_v27  ;;  %8277 = vmatprep.subr.mxu1 %v4587_v37 }
 0x5b4   : > { %8243 = vmatpush3.msra.mxu0 %v4539_v11  ;;  %8278 = vmatpush3.msra.mxu1 %v4571_v14 }
 0x5b5   : > { %8244 = vmatprep.subr.mxu0 %v4554_v15  ;;  %8279 = vmatprep.subr.mxu1 %v4586_v22 }
 0x5b6   : > { %8245 = vmatpush3.msra.mxu0 %v4538_v16  ;;  %8280 = vmatpush3.msra.mxu1 %v4570_v25 }
 0x5b7   : > { %8246 = vmatprep.subr.mxu0 %v4553_v13  ;;  %8281 = vmatprep.subr.mxu1 %v4585_v55 }
 0x5b8   : > { %8247 = vmatpush3.msra.mxu0 %v4537_v19  ;;  %8282 = vmatpush3.msra.mxu1 %v4569_v31 }
 0x5b9   : > { %8248 = vmatprep.subr.mxu0 %v4552_v23  ;;  %8283 = vmatprep.subr.mxu1 %v4584_v44  ;;  %v4610_v44 = vld [vmem:[%s12171_s9 + $0x278] sm:$0xff] }
 0x5ba   : > { %8249 = vmatpush3.msra.mxu0 %v4536_v26  ;;  %8284 = vmatpush3.msra.mxu1 %v4568_v17  ;;  %v4622_v17 = vld [vmem:[%s12171_s9 + $0x2d8] sm:$0xff] }
 0x5bb   : > { %8250 = vmatprep.subr.mxu0 %v4551_v28  ;;  %8285 = vmatprep.subr.mxu1 %v4583_v63 }
 0x5bc   : > { %8251 = vmatpush3.msra.mxu0 %v4535_v47  ;;  %8286 = vmatpush3.msra.mxu1 %v4567_v40 }
 0x5bd   : > { %8252 = vmatprep.subr.mxu0 %v4550_v62  ;;  %8287 = vmatprep.subr.mxu1 %v4582_v29  ;;  %v4625_v62 = vld [vmem:[%s12171_s9 + $0x2f0] sm:$0xff] }
 0x5be   : > { %8253 = vmatpush3.msra.mxu0 %v4534_v32  ;;  %8288 = vmatpush3.msra.mxu1 %v4566_v57  ;;  %v4609_v32 = vld [vmem:[%s12171_s9 + $0x270] sm:$0xff] }
 0x5bf   : > { %8254 = vmatprep.subr.mxu0 %v4549_v50  ;;  %8289 = vmatprep.subr.mxu1 %v4581_v46  ;;  %v4624_v50 = vld [vmem:[%s12171_s9 + $0x2e8] sm:$0xff]  ;;  %v4642_v46 = vld [vmem:[%s12171_s9 + $0x378] sm:$0xff] }
 0x5c0   : > { %8255 = vmatpush3.msra.mxu0 %v4533_v33  ;;  %8290 = vmatpush3.msra.mxu1 %v4565_v49  ;;  %v4608_v33 = vld [vmem:[%s12171_s9 + $0x268] sm:$0xff]  ;;  %v4657_v49 = vld [vmem:[%s12171_s9 + $0x3f0] sm:$0xff] }
 0x5c1   : > { %8256 = vmatprep.subr.mxu0 %v4548_v21  ;;  %8291 = vmatprep.subr.mxu1 %v4580_v36  ;;  %v4623_v21 = vld [vmem:[%s12171_s9 + $0x2e0] sm:$0xff]  ;;  %v4641_v36 = vld [vmem:[%s12171_s9 + $0x370] sm:$0xff] }
 0x5c2   : > { %8257 = vmatpush3.msra.mxu0 %v4532_v43  ;;  %8292 = vmatpush3.msra.mxu1 %v4564_v53  ;;  %v4607_v43 = vld [vmem:[%s12171_s9 + $0x260] sm:$0xff]  ;;  %v4602_v53 = vld [vmem:[%s12171_s9 + $0x238] sm:$0xff] }
 0x5c3   : > { %8258 = vmatprep.subr.mxu0 %v4547_v39  ;;  %8293 = vmatprep.subr.mxu1 %v4579_v56  ;;  %v4606_v39 = vld [vmem:[%s12171_s9 + $0x258] sm:$0xff]  ;;  %v4655_v56 = vld [vmem:[%s12171_s9 + $0x3e0] sm:$0xff] }
 0x5c4   : > { %8259 = vmatpush3.msra.mxu0 %v4531_v3  ;;  %8294 = vmatpush3.msra.mxu1 %v4563_v24  ;;  %v4621_v3 = vld [vmem:[%s12171_s9 + $0x2d0] sm:$0xff]  ;;  %v4639_v24 = vld [vmem:[%s12171_s9 + $0x360] sm:$0xff] }
 0x5c5   : > { %8298 = vmatprep.subr.mxu0 %v4626_v45  ;;  %8333 = vmatprep.subr.mxu1 %v4658_v52  ;;  %v4605_v45 = vld [vmem:[%s12171_s9 + $0x250] sm:$0xff] }
 0x5c6   : > { %v4601_v52 = vld [vmem:[%s12171_s9 + $0x230] sm:$0xff] }
 0x63a   : > { %v11060_v41 = vpop.f32.mrf.mxu1 }
 0x63b   : > { %v3437_v35 = vpop.f32.mrf.mxu0 }
 0x63c   : > { %v8886_v5 = vpop.f32.mrf.mxu1 }
 0x63d   : > { %v8893_v51 = vpop.f32.mrf.mxu0  ;;  %v4604_v5 = vld [vmem:[%s12171_s9 + $0x248] sm:$0xff] }
 0x63e   : > { %v4619_v51 = vld [vmem:[%s12171_s9 + $0x2c0] sm:$0xff] }
 0x640   : > { %v3587_v42 = vpop.f32.mrf.mxu1 }
 0x641   : > { %v9133_v6 = vpack.i.bf16 %v3437_v35, %v3587_v42  ;;  %v3512_v54 = vpop.f32.mrf.mxu0  ;;  %v4603_v42 = vld [vmem:[%s12171_s9 + $0x240] sm:$0xff] }
 0x642   : > { %v8907_v20 = vpop.f32.mrf.mxu1 }
 0x643   : > { %9134 = vrot.lane.b32.xlu0 %v9133_v6, %s9191_s17  ;;  %v8900_v18 = vpop.f32.mrf.mxu0  ;;  %v4656_v6 = vld [vmem:[%s12171_s9 + $0x3e8] sm:$0xff] }
 0x644   : > { %v4640_v20 = vld [vmem:[%s12171_s9 + $0x368] sm:$0xff]  ;;  %v4617_v18 = vld [vmem:[%s12171_s9 + $0x2b0] sm:$0xff] }
 0x646   : > { %v3737_v59 = vpop.f32.mrf.mxu1 }
 0x647   : > { %v3662_v60 = vpop.f32.mrf.mxu0 }
 0x648   : > { %v8921_v0 = vpop.f32.mrf.mxu1 }
 0x649   : > { %v8914_v34 = vpop.f32.mrf.mxu0  ;;  %v4638_v0 = vld [vmem:[%s12171_s9 + $0x358] sm:$0xff] }
 0x64a   : > { %v4600_v34 = vld [vmem:[%s12171_s9 + $0x228] sm:$0xff] }
 0x64c   : > { %v3887_v30 = vpop.f32.mrf.mxu1 }
 0x64d   : > { %v9138_v4 = vpack.i.bf16 %v3737_v59, %v3887_v30  ;;  %v3812_v7 = vpop.f32.mrf.mxu0  ;;  %v4654_v59 = vld [vmem:[%s12171_s9 + $0x3d8] sm:$0xff]  ;;  %v4653_v30 = vld [vmem:[%s12171_s9 + $0x3d0] sm:$0xff] }
 0x64e   : > { %v8935_v1 = vpop.f32.mrf.mxu1 }
 0x64f   : > { %9139 = vrot.lane.b32.xlu1 %v9138_v4, %s9191_s17  ;;  %v8928_v8 = vpop.f32.mrf.mxu0  ;;  %v4615_v4 = vld [vmem:[%s12171_s9 + $0x2a0] sm:$0xff] }
 0x650   : > { %v4599_v1 = vld [vmem:[%s12171_s9 + $0x220] sm:$0xff] }
 0x653   : > { %v4037_v38 = vpop.f32.mrf.mxu1  ;;  %v11088_v48 = vpop.f32.mrf.mxu0 }
 0x655   : > { %v8949_v9 = vpop.f32.mrf.mxu1  ;;  %v8942_v61 = vpop.f32.mrf.mxu0 }
 0x656   : > { %v4614_v9 = vld [vmem:[%s12171_s9 + $0x298] sm:$0xff]  ;;  %v4636_v61 = vld [vmem:[%s12171_s9 + $0x348] sm:$0xff] }
 0x659   : > { %v4187_v27 = vpop.f32.mrf.mxu1  ;;  %v11090_v10 = vpop.f32.mrf.mxu0 }
 0x65a   : > { %v9143_v11 = vpack.i.bf16 %v4037_v38, %v4187_v27  ;;  %v4652_v38 = vld [vmem:[%s12171_s9 + $0x3c8] sm:$0xff]  ;;  %v4598_v27 = vld [vmem:[%s12171_s9 + $0x218] sm:$0xff] }
 0x65b   : > { %v8963_v12 = vpop.f32.mrf.mxu1  ;;  %v8956_v15 = vpop.f32.mrf.mxu0 }
 0x65c   : > { %9144 = vrot.lane.b32.xlu0 %v9143_v11, %s9191_s17  ;;  %v4651_v11 = vld [vmem:[%s12171_s9 + $0x3c0] sm:$0xff]  ;;  %v4613_v15 = vld [vmem:[%s12171_s9 + $0x290] sm:$0xff] }
 0x65f   : > { %v4337_v2 = vpop.f32.mrf.mxu1  ;;  %v11093_v16 = vpop.f32.mrf.mxu0 }
 0x661   : > { %v8977_v37 = vpop.f32.mrf.mxu1  ;;  %v8970_v13 = vpop.f32.mrf.mxu0 }
 0x662   : > { %v4597_v37 = vld [vmem:[%s12171_s9 + $0x210] sm:$0xff]  ;;  %v4650_v13 = vld [vmem:[%s12171_s9 + $0x3b8] sm:$0xff] }
 0x664   : > { %v4487_v14 = vpop.f32.mrf.mxu1  ;;  %v11095_v19 = vpop.f32.mrf.mxu0 }
 0x665   : > { %v9148_v22 = vpack.i.bf16 %v4337_v2, %v4487_v14  ;;  %v4635_v2 = vld [vmem:[%s12171_s9 + $0x340] sm:$0xff]  ;;  %v4612_v14 = vld [vmem:[%s12171_s9 + $0x288] sm:$0xff] }
 0x666   : > { %v8991_v23 = vpop.f32.mrf.mxu1  ;;  %v8984_v25 = vpop.f32.mrf.mxu0 }
 0x667   : > { %9149 = vrot.lane.b32.xlu1 %v9148_v22, %s9191_s17  ;;  %v4634_v22 = vld [vmem:[%s12171_s9 + $0x338] sm:$0xff]  ;;  %v4596_v23 = vld [vmem:[%s12171_s9 + $0x208] sm:$0xff]  ;;  %v4649_v25 = vld [vmem:[%s12171_s9 + $0x3b0] sm:$0xff] }
 0x6b5   : > { %v9135_v26 = vpop.permute.xlu0 %9134 }
 0x6b6   : > { %v9137_v55 = vunpack.i.h.bf16 %v9135_v26  ;;  %v9136_v28 = vunpack.i.l.bf16 %v9135_v26 }
 0x6b8   : > { %v4524_v31 = vsel %vm1433_vm12, %v3512_v54, %v9136_v28  ;;  %v4523_v47 = vsel %vm1433_vm12, %v11060_v41, %v9137_v55  ;;  %v4620_v41 = vld [vmem:[%s12171_s9 + $0x2c8] sm:$0xff]  ;;  %v4618_v54 = vld [vmem:[%s12171_s9 + $0x2b8] sm:$0xff]  ;;  %v4633_v28 = vld [vmem:[%s12171_s9 + $0x330] sm:$0xff] }
 0x6b9   : > { %4730 = vmatprep.mubr.f32.mxu0 %v4524_v31  ;;  %v4611_v31 = vld [vmem:[%s12171_s9 + $0x280] sm:$0xff] }
 0x6ba   : > { %4731 = vmatmul.mubr.f32.vlgmr.msra.gmra.mxu0 %v4523_v47  ;;  %v4648_v47 = vld [vmem:[%s12171_s9 + $0x3a8] sm:$0xff] }
 0x6bb   : > { %8299 = vmatpush3.msra.mxu0 %v4610_v44  ;;  %v4632_v44 = vld [vmem:[%s12171_s9 + $0x328] sm:$0xff] }
 0x6bc   : > { %8300 = vmatprep.subr.mxu0 %v4625_v62  ;;  %v4647_v62 = vld [vmem:[%s12171_s9 + $0x3a0] sm:$0xff] }
 0x6bd   : > { %8301 = vmatpush3.msra.mxu0 %v4609_v32 }
 0x6be   : > { %8302 = vmatprep.subr.mxu0 %v4624_v50  ;;  %v4631_v50 = vld [vmem:[%s12171_s9 + $0x320] sm:$0xff] }
 0x6bf   : > { %8303 = vmatpush3.msra.mxu0 %v4608_v33 }
 0x6c0   : > { %8304 = vmatprep.subr.mxu0 %v4623_v21 }
 0x6c1   : > { %v9140_v63 = vpop.permute.xlu1 %9139  ;;  %8305 = vmatpush3.msra.mxu0 %v4607_v43  ;;  %v4646_v43 = vld [vmem:[%s12171_s9 + $0x398] sm:$0xff] }
 0x6c2   : > { %v9142_v40 = vunpack.i.h.bf16 %v9140_v63  ;;  %v9141_v29 = vunpack.i.l.bf16 %v9140_v63  ;;  %8306 = vmatprep.subr.mxu0 %v4622_v17  ;;  %v4630_v17 = vld [vmem:[%s12171_s9 + $0x318] sm:$0xff]  ;;  %v4629_v63 = vld [vmem:[%s12171_s9 + $0x310] sm:$0xff] }
 0x6c3   : > { %8307 = vmatpush3.msra.mxu0 %v4606_v39 }
 0x6c4   : > { %v4526_v57 = vsel %vm1433_vm12, %v3812_v7, %v9141_v29  ;;  %v4525_v35 = vsel %vm1433_vm12, %v3662_v60, %v9142_v40  ;;  %8308 = vmatprep.subr.mxu0 %v4621_v3  ;;  %v4616_v60 = vld [vmem:[%s12171_s9 + $0x2a8] sm:$0xff]  ;;  %v4637_v7 = vld [vmem:[%s12171_s9 + $0x350] sm:$0xff]  ;;  %v4643_v29 = vld [vmem:[%s12171_s9 + $0x380] sm:$0xff] }
 0x6c5   : > { %4800 = vmatprep.mubr.f32.mxu1 %v4526_v57  ;;  %8309 = vmatpush3.msra.mxu0 %v4605_v45  ;;  %v4628_v3 = vld [vmem:[%s12171_s9 + $0x308] sm:$0xff]  ;;  %v4627_v45 = vld [vmem:[%s12171_s9 + $0x300] sm:$0xff] }
 0x6c6   : > { %4801 = vmatmul.mubr.f32.vlgmr.msra.gmra.mxu1 %v4525_v35  ;;  %8310 = vmatprep.subr.mxu0 %v4620_v41 }
 0x6c7   : > { %8334 = vmatpush3.msra.mxu1 %v4642_v46  ;;  %8311 = vmatpush3.msra.mxu0 %v4604_v5 }
 0x6c8   : > { %8335 = vmatprep.subr.mxu1 %v4657_v49  ;;  %8312 = vmatprep.subr.mxu0 %v4619_v51 }
 0x6c9   : > { %8336 = vmatpush3.msra.mxu1 %v4641_v36  ;;  %8313 = vmatpush3.msra.mxu0 %v4603_v42  ;;  %v7786_v36 = vld [vmem:[%s12172_s10] ss:$0 sm:$0xff] }
 0x6ca   : > { %8337 = vmatprep.subr.mxu1 %v4656_v6  ;;  %8314 = vmatprep.subr.mxu0 %v4618_v54 }
 0x6cb   : > { %8338 = vmatpush3.msra.mxu1 %v4640_v20  ;;  %8315 = vmatpush3.msra.mxu0 %v4602_v53 }
 0x6cc   : > { %8339 = vmatprep.subr.mxu1 %v4655_v56  ;;  %8316 = vmatprep.subr.mxu0 %v4617_v18 }
 0x6cd   : > { %8340 = vmatpush3.msra.mxu1 %v4639_v24  ;;  %8317 = vmatpush3.msra.mxu0 %v4601_v52 }
 0x6ce   : > { %8341 = vmatprep.subr.mxu1 %v4654_v59  ;;  %8318 = vmatprep.subr.mxu0 %v4616_v60  ;;  %v9145_v8 = vpop.permute.xlu0 %9144  ;;  %v4947_v60 = vld [vmem:[%s12173_s11] sm:$0x1] }
 0x6cf   : > { %8342 = vmatpush3.msra.mxu1 %v4638_v0  ;;  %8319 = vmatpush3.msra.mxu0 %v4600_v34  ;;  %v9146_v12 = vunpack.i.l.bf16 %v9145_v8  ;;  %v9147_v55 = vunpack.i.h.bf16 %v9145_v8  ;;  %v7789_v0 = vld [vmem:[%s12173_s11 + $0x1] sm:$0x1]  ;;  %v7792_v34 = vld [vmem:[%s12173_s11 + $0x2] sm:$0x1]  ;;  %v7807_v8 = vld [vmem:[%s12173_s11 + $0x7] sm:$0x1] }
 0x6d0   : > { %8343 = vmatprep.subr.mxu1 %v4653_v30  ;;  %8320 = vmatprep.subr.mxu0 %v4615_v4  ;;  %v7795_v30 = vld [vmem:[%s12173_s11 + $0x3] sm:$0x1]  ;;  %v7798_v4 = vld [vmem:[%s12173_s11 + $0x4] sm:$0x1] }
 0x6d1   : > { %8344 = vmatpush3.msra.mxu1 %v4637_v7  ;;  %8321 = vmatpush3.msra.mxu0 %v4599_v1  ;;  %v4528_v26 = vsel %vm1433_vm12, %v11090_v10, %v9146_v12  ;;  %v4595_v10 = vld [vmem:[%s12171_s9 + $0x200] sm:$0xff]  ;;  %v4527_v33 = vsel %vm1433_vm12, %v11088_v48, %v9147_v55  ;;  %v4645_v48 = vld [vmem:[%s12171_s9 + $0x390] sm:$0xff]  ;;  %v7825_v12 = vld [vmem:[%s12173_s11 + $0xd] sm:$0x1] }
 0x6d2   : > { %8345 = vmatprep.subr.mxu1 %v4652_v38  ;;  %8322 = vmatprep.subr.mxu0 %v4614_v9  ;;  %v7801_v7 = vld [vmem:[%s12173_s11 + $0x5] sm:$0x1]  ;;  %v7804_v1 = vld [vmem:[%s12173_s11 + $0x6] sm:$0x1]  ;;  %v7810_v38 = vld [vmem:[%s12173_s11 + $0x8] sm:$0x1] }
 0x6d3   : > { %8346 = vmatpush3.msra.mxu1 %v4636_v61  ;;  %8323 = vmatpush3.msra.mxu0 %v4598_v27  ;;  %v7813_v9 = vld [vmem:[%s12173_s11 + $0x9] sm:$0x1]  ;;  %v7816_v61 = vld [vmem:[%s12173_s11 + $0xa] sm:$0x1]  ;;  %v7819_v27 = vld [vmem:[%s12173_s11 + $0xb] sm:$0x1] }
 0x6d4   : > { %8347 = vmatprep.subr.mxu1 %v4651_v11  ;;  %8324 = vmatprep.subr.mxu0 %v4613_v15  ;;  %v7822_v11 = vld [vmem:[%s12173_s11 + $0xc] sm:$0x1]  ;;  %v7831_v15 = vld [vmem:[%s12173_s11 + $0xf] sm:$0x1]  ;;  %v6236_v55 = vld [vmem:[%s12174_s12 + $0x178] sm:$0xff] }
 0x6d5   : > { %8348 = vmatpush3.msra.mxu1 %v4635_v2  ;;  %8325 = vmatpush3.msra.mxu0 %v4597_v37  ;;  %v7828_v2 = vld [vmem:[%s12173_s11 + $0xe] sm:$0x1]  ;;  %v6220_v37 = vld [vmem:[%s12174_s12 + $0xf8] sm:$0xff] }
 0x6d6   : > { %8349 = vmatprep.subr.mxu1 %v4650_v13  ;;  %8326 = vmatprep.subr.mxu0 %v4612_v14  ;;  %v6204_v13 = vld [vmem:[%s12174_s12 + $0x78] sm:$0xff]  ;;  %v6219_v14 = vld [vmem:[%s12174_s12 + $0xf0] sm:$0xff] }
 0x6d7   : > { %8350 = vmatpush3.msra.mxu1 %v4634_v22  ;;  %8327 = vmatpush3.msra.mxu0 %v4596_v23  ;;  %v6203_v22 = vld [vmem:[%s12174_s12 + $0x70] sm:$0xff]  ;;  %v6218_v23 = vld [vmem:[%s12174_s12 + $0xe8] sm:$0xff] }
 0x6d8   : > { %8351 = vmatprep.subr.mxu1 %v4649_v25  ;;  %4870 = vmatprep.mubr.f32.mxu0 %v4528_v26  ;;  %v6202_v25 = vld [vmem:[%s12174_s12 + $0x68] sm:$0xff]  ;;  %v6252_v26 = vld [vmem:[%s12174_s12 + $0x1f8] sm:$0xff] }
 0x6d9   : > { %8352 = vmatpush3.msra.mxu1 %v4633_v28  ;;  %8328 = vmatprep.subr.mxu0 %v4611_v31  ;;  %v9150_v32 = vpop.permute.xlu1 %9149  ;;  %v6217_v28 = vld [vmem:[%s12174_s12 + $0xe0] sm:$0xff]  ;;  %v6251_v31 = vld [vmem:[%s12174_s12 + $0x1f0] sm:$0xff] }
 0x6da   : > { %8353 = vmatprep.subr.mxu1 %v4648_v47  ;;  %8329 = vmatpush3.msra.mxu0 %v4595_v10  ;;  %v9151_v21 = vunpack.i.l.bf16 %v9150_v32  ;;  %v9152_v40 = vunpack.i.h.bf16 %v9150_v32  ;;  %v6201_v47 = vld [vmem:[%s12174_s12 + $0x60] sm:$0xff]  ;;  %v6235_v10 = vld [vmem:[%s12174_s12 + $0x170] sm:$0xff]  ;;  %v6234_v32 = vld [vmem:[%s12174_s12 + $0x168] sm:$0xff] }
 0x6db   : > { %8354 = vmatpush3.msra.mxu1 %v4632_v44  ;;  %4871 = vmatmul.mubr.f32.vlgmr.msra.gmra.mxu0 %v4527_v33  ;;  %v6250_v44 = vld [vmem:[%s12174_s12 + $0x1e8] sm:$0xff]  ;;  %v6249_v33 = vld [vmem:[%s12174_s12 + $0x1e0] sm:$0xff] }
 0x6dc   : > { %8355 = vmatprep.subr.mxu1 %v4647_v62  ;;  %v4530_v39 = vsel %vm1433_vm12, %v11095_v19, %v9151_v21  ;;  %8992 = vmatprep.subr.mxu0 %v9192_v58  ;;  %v4644_v19 = vld [vmem:[%s12171_s9 + $0x388] sm:$0xff]  ;;  %v4529_v41 = vsel %vm1433_vm12, %v11093_v16, %v9152_v40  ;;  %v6216_v62 = vld [vmem:[%s12174_s12 + $0xd8] sm:$0xff]  ;;  %v6215_v21 = vld [vmem:[%s12174_s12 + $0xd0] sm:$0xff] }
 0x6dd   : > { %8356 = vmatpush3.msra.mxu1 %v4631_v50  ;;  %4940 = vmatprep.mubr.f32.mxu1 %v4530_v39  ;;  %v6200_v50 = vld [vmem:[%s12174_s12 + $0x58] sm:$0xff]  ;;  %v6213_v40 = vld [vmem:[%s12174_s12 + $0xc0] sm:$0xff] }
 0x6de   : > { %8357 = vmatprep.subr.mxu1 %v4646_v43  ;;  %8994 = vmatprep.mubr.msk.f32.mxu0 %vm9193_vm13, %v9192_v58  ;;  %v6233_v43 = vld [vmem:[%s12174_s12 + $0x160] sm:$0xff]  ;;  %v6248_v39 = vld [vmem:[%s12174_s12 + $0x1d8] sm:$0xff] }
 0x6df   : > { %8358 = vmatpush3.msra.mxu1 %v4630_v17  ;;  %v6199_v17 = vld [vmem:[%s12174_s12 + $0x50] sm:$0xff] }
 0x6e0   : > { %8359 = vmatprep.subr.mxu1 %v4645_v48  ;;  %v6214_v48 = vld [vmem:[%s12174_s12 + $0xc8] sm:$0xff] }
 0x6e1   : > { %8360 = vmatpush3.msra.mxu1 %v4629_v63  ;;  %v6232_v63 = vld [vmem:[%s12174_s12 + $0x158] sm:$0xff] }
 0x6e2   : > { %8361 = vmatprep.subr.mxu1 %v4644_v19  ;;  %v6198_v19 = vld [vmem:[%s12174_s12 + $0x48] sm:$0xff] }
 0x6e3   : > { %8362 = vmatpush3.msra.mxu1 %v4628_v3  ;;  %v6247_v3 = vld [vmem:[%s12174_s12 + $0x1d0] sm:$0xff] }
 0x6e4   : > { %8363 = vmatprep.subr.mxu1 %v4643_v29  ;;  %v6231_v29 = vld [vmem:[%s12174_s12 + $0x150] sm:$0xff] }
 0x6e5   : > { %8364 = vmatpush3.msra.mxu1 %v4627_v45  ;;  %v6197_v45 = vld [vmem:[%s12174_s12 + $0x40] sm:$0xff] }
 0x6e6   : > { %4941 = vmatmul.mubr.f32.vlgmr.msra.gmra.mxu1 %v4529_v41  ;;  %8997 = vmatprep.subr.mxu1 %v9192_v58  ;;  %v6246_v41 = vld [vmem:[%s12174_s12 + $0x1c8] sm:$0xff] }
 0x6e7   : > { %8999 = vmatprep.mubr.msk.f32.mxu1 %vm9193_vm13, %v9192_v58 }
 0x77a   : > { %v8260_v57 = vpop.f32.mrf.mxu0 }
 0x77c   : > { %v8261_v35 = vpop.f32.mrf.mxu0 }
 0x77d   : > { %v8262_v51 = vadd.f32 %v8261_v35, %v8260_v57  ;;  %v6212_v57 = vld [vmem:[%s12174_s12 + $0xb8] sm:$0xff]  ;;  %v6230_v35 = vld [vmem:[%s12174_s12 + $0x148] sm:$0xff] }
 0x77f   : > { %v4733_v54 = vadd.f32 %v8262_v51, %v7786_v36  ;;  %v6229_v51 = vld [vmem:[%s12174_s12 + $0x140] sm:$0xff]  ;;  %v6195_v36 = vld [vmem:[%s12174_s12 + $0x30] sm:$0xff] }
 0x786   : > { %v8295_v46 = vpop.f32.mrf.mxu1 }
 0x788   : > { %v8296_v49 = vpop.f32.mrf.mxu1 }
 0x789   : > { %v8297_v6 = vadd.f32 %v8296_v49, %v8295_v46  ;;  %v6196_v46 = vld [vmem:[%s12174_s12 + $0x38] sm:$0xff]  ;;  %v6211_v49 = vld [vmem:[%s12174_s12 + $0xb0] sm:$0xff] }
 0x78b   : > { %v4803_v53 = vadd.f32 %v8297_v6, %v4733_v54  ;;  %v6210_v6 = vld [vmem:[%s12174_s12 + $0xa8] sm:$0xff]  ;;  %v6228_v54 = vld [vmem:[%s12174_s12 + $0x138] sm:$0xff] }
 0x79b   : > { %v8330_v5 = vpop.f32.mrf.mxu0 }
 0x79d   : > { %v8331_v42 = vpop.f32.mrf.mxu0 }
 0x79e   : > { %v8332_v16 = vadd.f32 %v8331_v42, %v8330_v5  ;;  %v6245_v5 = vld [vmem:[%s12174_s12 + $0x1c0] sm:$0xff]  ;;  %v6244_v42 = vld [vmem:[%s12174_s12 + $0x1b8] sm:$0xff] }
 0x7a0   : > { %v4873_v18 = vadd.f32 %v8332_v16, %v4803_v53  ;;  %v6194_v16 = vld [vmem:[%s12174_s12 + $0x28] sm:$0xff]  ;;  %v6209_v53 = vld [vmem:[%s12174_s12 + $0xa0] sm:$0xff] }
 0x7a6   : > { %v8365_v20 = vpop.f32.mrf.mxu1 }
 0x7a8   : > { %v8366_v56 = vpop.f32.mrf.mxu1 }
 0x7a9   : > { %v8367_v24 = vadd.f32 %v8366_v56, %v8365_v20  ;;  %v6243_v20 = vld [vmem:[%s12174_s12 + $0x1b0] sm:$0xff] }
 0x7aa   : > { %v6227_v56 = vld [vmem:[%s12174_s12 + $0x130] sm:$0xff] }
 0x7ab   : > { %v4943_v52 = vadd.f32 %v8367_v24, %v4873_v18  ;;  %v6193_v18 = vld [vmem:[%s12174_s12 + $0x20] sm:$0xff]  ;;  %v6242_v24 = vld [vmem:[%s12174_s12 + $0x1a8] sm:$0xff] }
 0x7ad   : > { %v11306_v59 = vmax.f32 %v4943_v52, 0.0  ;;  %v6208_v52 = vld [vmem:[%s12174_s12 + $0x98] sm:$0xff] }
 0x7af   : > { %8993 = vmatpush3.msk.msra.mxu0 %vm1314_vm4, %v11306_v59  ;;  %8998 = vmatpush3.msk.msra.mxu1 %vm1314_vm4, %v11306_v59 }
 0x7b0   : > { %8995 = vmatmul.mubr.msk.f32.vlgmr.msra.gmra.mxu0 %vm659_vm1, %v4947_v60  ;;  %9000 = vmatmul.mubr.msk.f32.vlgmr.msra.gmra.mxu1 %vm659_vm1, %v7789_v0  ;;  %v6207_v60 = vld [vmem:[%s12174_s12 + $0x90] sm:$0xff] }
 0x7b1   : > { %9002 = vmatprep.subr.mxu0 %v9192_v58  ;;  %9007 = vmatprep.subr.mxu1 %v9192_v58  ;;  %v6191_v0 = vld [vmem:[%s12174_s12 + $0x10] sm:$0xff] }
 0x7b2   : > { %9003 = vmatpush3.msk.msra.mxu0 %vm1314_vm4, %v11306_v59  ;;  %9008 = vmatpush3.msk.msra.mxu1 %vm1314_vm4, %v11306_v59 }
 0x7b3   : > { %9004 = vmatprep.mubr.msk.f32.mxu0 %vm9193_vm13, %v9192_v58  ;;  %9009 = vmatprep.mubr.msk.f32.mxu1 %vm9193_vm13, %v9192_v58 }
 0x7b4   : > { %9012 = vmatprep.subr.mxu0 %v9192_v58  ;;  %9017 = vmatprep.subr.mxu1 %v9192_v58 }
 0x7b5   : > { %9005 = vmatmul.mubr.msk.f32.vlgmr.msra.gmra.mxu0 %vm659_vm1, %v7792_v34  ;;  %9010 = vmatmul.mubr.msk.f32.vlgmr.msra.gmra.mxu1 %vm659_vm1, %v7795_v30  ;;  %v6206_v34 = vld [vmem:[%s12174_s12 + $0x88] sm:$0xff] }
 0x7b6   : > { %9013 = vmatpush3.msk.msra.mxu0 %vm1314_vm4, %v11306_v59  ;;  %9018 = vmatpush3.msk.msra.mxu1 %vm1314_vm4, %v11306_v59  ;;  %v6190_v30 = vld [vmem:[%s12174_s12 + $0x8] sm:$0xff] }
 0x7b7   : > { %9014 = vmatprep.mubr.msk.f32.mxu0 %vm9193_vm13, %v9192_v58  ;;  %9019 = vmatprep.mubr.msk.f32.mxu1 %vm9193_vm13, %v9192_v58 }
 0x7b8   : > { %9022 = vmatprep.subr.mxu0 %v9192_v58  ;;  %9027 = vmatprep.subr.mxu1 %v9192_v58 }
 0x7b9   : > { %9015 = vmatmul.mubr.msk.f32.vlgmr.msra.gmra.mxu0 %vm659_vm1, %v7798_v4  ;;  %9020 = vmatmul.mubr.msk.f32.vlgmr.msra.gmra.mxu1 %vm659_vm1, %v7801_v7  ;;  %v6226_v4 = vld [vmem:[%s12174_s12 + $0x128] sm:$0xff]  ;;  %v6205_v7 = vld [vmem:[%s12174_s12 + $0x80] sm:$0xff] }
 0x7ba   : > { %9023 = vmatpush3.msk.msra.mxu0 %vm1314_vm4, %v11306_v59  ;;  %9028 = vmatpush3.msk.msra.mxu1 %vm1314_vm4, %v11306_v59 }
 0x7bb   : > { %9024 = vmatprep.mubr.msk.f32.mxu0 %vm9193_vm13, %v9192_v58  ;;  %9029 = vmatprep.mubr.msk.f32.mxu1 %vm9193_vm13, %v9192_v58 }
 0x7bc   : > { %9032 = vmatprep.subr.mxu0 %v9192_v58  ;;  %9037 = vmatprep.subr.mxu1 %v9192_v58 }
 0x7bd   : > { %9025 = vmatmul.mubr.msk.f32.vlgmr.msra.gmra.mxu0 %vm659_vm1, %v7804_v1  ;;  %9030 = vmatmul.mubr.msk.f32.vlgmr.msra.gmra.mxu1 %vm659_vm1, %v7807_v8  ;;  %v6241_v1 = vld [vmem:[%s12174_s12 + $0x1a0] sm:$0xff] }
 0x7be   : > { %9033 = vmatpush3.msk.msra.mxu0 %vm1314_vm4, %v11306_v59  ;;  %9038 = vmatpush3.msk.msra.mxu1 %vm1314_vm4, %v11306_v59  ;;  %v6189_v8 = vld [vmem:[%s12174_s12] sm:$0xff] }
 0x7bf   : > { %9034 = vmatprep.mubr.msk.f32.mxu0 %vm9193_vm13, %v9192_v58  ;;  %9039 = vmatprep.mubr.msk.f32.mxu1 %vm9193_vm13, %v9192_v58 }
 0x7c0   : > { %9042 = vmatprep.subr.mxu0 %v9192_v58  ;;  %9047 = vmatprep.subr.mxu1 %v9192_v58 }
 0x7c1   : > { %9035 = vmatmul.mubr.msk.f32.vlgmr.msra.gmra.mxu0 %vm659_vm1, %v7810_v38  ;;  %9040 = vmatmul.mubr.msk.f32.vlgmr.msra.gmra.mxu1 %vm659_vm1, %v7813_v9  ;;  %v6225_v38 = vld [vmem:[%s12174_s12 + $0x120] sm:$0xff]  ;;  %v6240_v9 = vld [vmem:[%s12174_s12 + $0x198] sm:$0xff] }
 0x7c2   : > { %9043 = vmatpush3.msk.msra.mxu0 %vm1314_vm4, %v11306_v59  ;;  %9048 = vmatpush3.msk.msra.mxu1 %vm1314_vm4, %v11306_v59 }
 0x7c3   : > { %9044 = vmatprep.mubr.msk.f32.mxu0 %vm9193_vm13, %v9192_v58  ;;  %9049 = vmatprep.mubr.msk.f32.mxu1 %vm9193_vm13, %v9192_v58 }
 0x7c4   : > { %9052 = vmatprep.subr.mxu0 %v9192_v58  ;;  %9057 = vmatprep.subr.mxu1 %v9192_v58 }
 0x7c5   : > { %9045 = vmatmul.mubr.msk.f32.vlgmr.msra.gmra.mxu0 %vm659_vm1, %v7816_v61  ;;  %9050 = vmatmul.mubr.msk.f32.vlgmr.msra.gmra.mxu1 %vm659_vm1, %v7819_v27  ;;  %v6284_v61 = vld [vmem:[%s12174_s12 + $0x2f8] sm:$0xff] }
 0x7c6   : > { %9053 = vmatpush3.msk.msra.mxu0 %vm1314_vm4, %v11306_v59  ;;  %9058 = vmatpush3.msk.msra.mxu1 %vm1314_vm4, %v11306_v59  ;;  %v6224_v27 = vld [vmem:[%s12174_s12 + $0x118] sm:$0xff] }
 0x7c7   : > { %9054 = vmatprep.mubr.msk.f32.mxu0 %vm9193_vm13, %v9192_v58  ;;  %9059 = vmatprep.mubr.msk.f32.mxu1 %vm9193_vm13, %v9192_v58 }
 0x7c8   : > { %9062 = vmatprep.subr.mxu0 %v9192_v58  ;;  %9067 = vmatprep.subr.mxu1 %v9192_v58 }
 0x7c9   : > { %9055 = vmatmul.mubr.msk.f32.vlgmr.msra.gmra.mxu0 %vm659_vm1, %v7822_v11  ;;  %9060 = vmatmul.mubr.msk.f32.vlgmr.msra.gmra.mxu1 %vm659_vm1, %v7825_v12 }
 0x7ca   : > { %9063 = vmatpush3.msk.msra.mxu0 %vm1314_vm4, %v11306_v59  ;;  %9068 = vmatpush3.msk.msra.mxu1 %vm1314_vm4, %v11306_v59  ;;  %v6192_v59 = vld [vmem:[%s12174_s12 + $0x18] sm:$0xff] }
 0x7cb   : > { %9069 = vmatprep.mubr.msk.f32.mxu1 %vm9193_vm13, %v9192_v58  ;;  %9064 = vmatprep.mubr.msk.f32.mxu0 %vm9193_vm13, %v9192_v58 }
 0x7cc   : > { %8400 = vmatprep.subr.mxu0 %v6220_v37  ;;  %8435 = vmatprep.subr.mxu1 %v6252_v26 }
 0x7cd   : > { %9070 = vmatmul.mubr.msk.f32.vlgmr.msra.gmra.mxu1 %vm659_vm1, %v7831_v15  ;;  %9065 = vmatmul.mubr.msk.f32.vlgmr.msra.gmra.mxu0 %vm659_vm1, %v7828_v2  ;;  %v6239_v15 = vld [vmem:[%s12174_s12 + $0x190] sm:$0xff] }
 0x7ce   : > { %8401 = vmatpush3.msra.mxu0 %v6204_v13  ;;  %8436 = vmatpush3.msra.mxu1 %v6236_v55  ;;  %v6223_v2 = vld [vmem:[%s12174_s12 + $0x110] sm:$0xff]  ;;  %v6221_v55 = vld [vmem:[%s12174_s12 + $0x100] sm:$0xff] }
 0x7cf   : > { %8402 = vmatprep.subr.mxu0 %v6219_v14  ;;  %8437 = vmatprep.subr.mxu1 %v6251_v31  ;;  %v6238_v14 = vld [vmem:[%s12174_s12 + $0x188] sm:$0xff] }
 0x7d0   : > { %8403 = vmatpush3.msra.mxu0 %v6203_v22  ;;  %8438 = vmatpush3.msra.mxu1 %v6235_v10  ;;  %v6222_v22 = vld [vmem:[%s12174_s12 + $0x108] sm:$0xff]  ;;  %v6316_v10 = vld [vmem:[%s12174_s12 + $0x3f8] sm:$0xff] }
 0x7d1   : > { %8404 = vmatprep.subr.mxu0 %v6218_v23  ;;  %8439 = vmatprep.subr.mxu1 %v6250_v44  ;;  %v6237_v23 = vld [vmem:[%s12174_s12 + $0x180] sm:$0xff] }
 0x7d2   : > { %8405 = vmatpush3.msra.mxu0 %v6202_v25  ;;  %8440 = vmatpush3.msra.mxu1 %v6234_v32 }
 0x7d3   : > { %8406 = vmatprep.subr.mxu0 %v6217_v28  ;;  %8441 = vmatprep.subr.mxu1 %v6249_v33 }
 0x7d4   : > { %8407 = vmatpush3.msra.mxu0 %v6201_v47  ;;  %8442 = vmatpush3.msra.mxu1 %v6233_v43 }
 0x7d5   : > { %8408 = vmatprep.subr.mxu0 %v6216_v62  ;;  %8443 = vmatprep.subr.mxu1 %v6248_v39 }
 0x7d6   : > { %8409 = vmatpush3.msra.mxu0 %v6200_v50  ;;  %8444 = vmatpush3.msra.mxu1 %v6232_v63 }
 0x7d7   : > { %8410 = vmatprep.subr.mxu0 %v6215_v21  ;;  %8445 = vmatprep.subr.mxu1 %v6247_v3 }
 0x7d8   : > { %8411 = vmatpush3.msra.mxu0 %v6199_v17  ;;  %8446 = vmatpush3.msra.mxu1 %v6231_v29 }
 0x7d9   : > { %8412 = vmatprep.subr.mxu0 %v6214_v48  ;;  %8447 = vmatprep.subr.mxu1 %v6246_v41 }
 0x7da   : > { %8413 = vmatpush3.msra.mxu0 %v6198_v19  ;;  %8448 = vmatpush3.msra.mxu1 %v6230_v35 }
 0x7db   : > { %8414 = vmatprep.subr.mxu0 %v6213_v40  ;;  %8449 = vmatprep.subr.mxu1 %v6245_v5 }
 0x7dc   : > { %8415 = vmatpush3.msra.mxu0 %v6197_v45  ;;  %8450 = vmatpush3.msra.mxu1 %v6229_v51 }
 0x7dd   : > { %8416 = vmatprep.subr.mxu0 %v6212_v57  ;;  %8451 = vmatprep.subr.mxu1 %v6244_v42 }
 0x7de   : > { %8417 = vmatpush3.msra.mxu0 %v6196_v46  ;;  %8452 = vmatpush3.msra.mxu1 %v6228_v54 }
 0x7df   : > { %8418 = vmatprep.subr.mxu0 %v6211_v49  ;;  %8453 = vmatprep.subr.mxu1 %v6243_v20 }
 0x7e0   : > { %8419 = vmatpush3.msra.mxu0 %v6195_v36  ;;  %8454 = vmatpush3.msra.mxu1 %v6227_v56 }
 0x7e1   : > { %8420 = vmatprep.subr.mxu0 %v6210_v6  ;;  %8455 = vmatprep.subr.mxu1 %v6242_v24  ;;  %v6268_v24 = vld [vmem:[%s12174_s12 + $0x278] sm:$0xff] }
 0x7e2   : > { %8421 = vmatpush3.msra.mxu0 %v6194_v16  ;;  %8456 = vmatpush3.msra.mxu1 %v6226_v4 }
 0x7e3   : > { %8422 = vmatprep.subr.mxu0 %v6209_v53  ;;  %8457 = vmatprep.subr.mxu1 %v6241_v1  ;;  %v6265_v1 = vld [vmem:[%s12174_s12 + $0x260] sm:$0xff] }
 0x7e4   : > { %8423 = vmatpush3.msra.mxu0 %v6193_v18  ;;  %8458 = vmatpush3.msra.mxu1 %v6225_v38 }
 0x7e5   : > { %8424 = vmatprep.subr.mxu0 %v6208_v52  ;;  %8459 = vmatprep.subr.mxu1 %v6240_v9  ;;  %v6283_v52 = vld [vmem:[%s12174_s12 + $0x2f0] sm:$0xff] }
 0x7e6   : > { %8425 = vmatpush3.msra.mxu0 %v6192_v59  ;;  %8460 = vmatpush3.msra.mxu1 %v6224_v27  ;;  %v6267_v59 = vld [vmem:[%s12174_s12 + $0x270] sm:$0xff]  ;;  %v6300_v27 = vld [vmem:[%s12174_s12 + $0x378] sm:$0xff] }
 0x7e7   : > { %8426 = vmatprep.subr.mxu0 %v6207_v60  ;;  %8461 = vmatprep.subr.mxu1 %v6239_v15  ;;  %v6282_v60 = vld [vmem:[%s12174_s12 + $0x2e8] sm:$0xff]  ;;  %v6263_v15 = vld [vmem:[%s12174_s12 + $0x250] sm:$0xff] }
 0x7e8   : > { %8427 = vmatpush3.msra.mxu0 %v6191_v0  ;;  %8462 = vmatpush3.msra.mxu1 %v6223_v2  ;;  %v6266_v0 = vld [vmem:[%s12174_s12 + $0x268] sm:$0xff]  ;;  %v6299_v2 = vld [vmem:[%s12174_s12 + $0x370] sm:$0xff] }
 0x7e9   : > { %8428 = vmatprep.subr.mxu0 %v6206_v34  ;;  %8463 = vmatprep.subr.mxu1 %v6238_v14  ;;  %v6262_v14 = vld [vmem:[%s12174_s12 + $0x248] sm:$0xff] }
 0x7ea   : > { %8429 = vmatpush3.msra.mxu0 %v6190_v30  ;;  %8464 = vmatpush3.msra.mxu1 %v6222_v22  ;;  %v6281_v30 = vld [vmem:[%s12174_s12 + $0x2e0] sm:$0xff]  ;;  %v6298_v22 = vld [vmem:[%s12174_s12 + $0x368] sm:$0xff] }
 0x7eb   : > { %8430 = vmatprep.subr.mxu0 %v6205_v7  ;;  %8465 = vmatprep.subr.mxu1 %v6237_v23  ;;  %v6277_v23 = vld [vmem:[%s12174_s12 + $0x2c0] sm:$0xff] }
 0x7ec   : > { %8431 = vmatpush3.msra.mxu0 %v6189_v8  ;;  %8466 = vmatpush3.msra.mxu1 %v6221_v55  ;;  %v6280_v8 = vld [vmem:[%s12174_s12 + $0x2d8] sm:$0xff]  ;;  %v6297_v55 = vld [vmem:[%s12174_s12 + $0x360] sm:$0xff] }
 0x7ed   : > { %8470 = vmatprep.subr.mxu0 %v6284_v61  ;;  %8505 = vmatprep.subr.mxu1 %v6316_v10  ;;  %v6264_v61 = vld [vmem:[%s12174_s12 + $0x258] sm:$0xff] }
 0x7ee   : > { %v6296_v10 = vld [vmem:[%s12174_s12 + $0x358] sm:$0xff] }
 0x870   : > { %v5095_v11 = vpop.f32.mrf.mxu1  ;;  %v5020_v12 = vpop.f32.mrf.mxu0 }
 0x872   : > { %v9001_v37 = vpop.f32.mrf.mxu1  ;;  %v8996_v13 = vpop.f32.mrf.mxu0 }
 0x873   : > { %v6278_v37 = vld [vmem:[%s12174_s12 + $0x2c8] sm:$0xff] }
 0x874   : > { %v6314_v13 = vld [vmem:[%s12174_s12 + $0x3e8] sm:$0xff] }
 0x875   : > { %v5245_v25 = vpop.f32.mrf.mxu1  ;;  %v5170_v26 = vpop.f32.mrf.mxu0 }
 0x876   : > { %v9153_v28 = vpack.i.bf16 %v5095_v11, %v5245_v25  ;;  %v6279_v11 = vld [vmem:[%s12174_s12 + $0x2d0] sm:$0xff]  ;;  %v6313_v25 = vld [vmem:[%s12174_s12 + $0x3e0] sm:$0xff] }
 0x877   : > { %v9011_v31 = vpop.f32.mrf.mxu1  ;;  %v9006_v47 = vpop.f32.mrf.mxu0 }
 0x878   : > { %9154 = vrot.lane.b32.xlu0 %v9153_v28, %s9191_s17  ;;  %v6276_v28 = vld [vmem:[%s12174_s12 + $0x2b8] sm:$0xff] }
 0x879   : > { %v5395_v44 = vpop.f32.mrf.mxu1  ;;  %v5320_v62 = vpop.f32.mrf.mxu0  ;;  %v6312_v31 = vld [vmem:[%s12174_s12 + $0x3d8] sm:$0xff] }
 0x87a   : > { %v6260_v47 = vld [vmem:[%s12174_s12 + $0x238] sm:$0xff] }
 0x87b   : > { %v9021_v32 = vpop.f32.mrf.mxu1  ;;  %v9016_v50 = vpop.f32.mrf.mxu0 }
 0x87c   : > { %v6259_v32 = vld [vmem:[%s12174_s12 + $0x230] sm:$0xff] }
 0x87d   : > { %v5545_v33 = vpop.f32.mrf.mxu1  ;;  %v5470_v21 = vpop.f32.mrf.mxu0  ;;  %v6295_v50 = vld [vmem:[%s12174_s12 + $0x350] sm:$0xff] }
 0x87e   : > { %v9158_v43 = vpack.i.bf16 %v5395_v44, %v5545_v33  ;;  %v6275_v44 = vld [vmem:[%s12174_s12 + $0x2b0] sm:$0xff]  ;;  %v6274_v33 = vld [vmem:[%s12174_s12 + $0x2a8] sm:$0xff] }
 0x87f   : > { %v9031_v17 = vpop.f32.mrf.mxu1  ;;  %v9026_v39 = vpop.f32.mrf.mxu0 }
 0x880   : > { %9159 = vrot.lane.b32.xlu1 %v9158_v43, %s9191_s17  ;;  %v6258_v43 = vld [vmem:[%s12174_s12 + $0x228] sm:$0xff]  ;;  %v6273_v39 = vld [vmem:[%s12174_s12 + $0x2a0] sm:$0xff] }
 0x881   : > { %v5695_v48 = vpop.f32.mrf.mxu1  ;;  %v11646_v29 = vpop.f32.mrf.mxu0  ;;  %v6294_v17 = vld [vmem:[%s12174_s12 + $0x348] sm:$0xff] }
 0x883   : > { %v9041_v63 = vpop.f32.mrf.mxu1  ;;  %v9036_v41 = vpop.f32.mrf.mxu0 }
 0x884   : > { %v6257_v63 = vld [vmem:[%s12174_s12 + $0x220] sm:$0xff]  ;;  %v6256_v41 = vld [vmem:[%s12174_s12 + $0x218] sm:$0xff] }
 0x885   : > { %v5845_v19 = vpop.f32.mrf.mxu1  ;;  %v11649_v35 = vpop.f32.mrf.mxu0 }
 0x886   : > { %v9163_v3 = vpack.i.bf16 %v5695_v48, %v5845_v19  ;;  %v6309_v48 = vld [vmem:[%s12174_s12 + $0x3c0] sm:$0xff] }
 0x887   : > { %v9051_v40 = vpop.f32.mrf.mxu1  ;;  %v9046_v5 = vpop.f32.mrf.mxu0  ;;  %v6293_v19 = vld [vmem:[%s12174_s12 + $0x340] sm:$0xff] }
 0x888   : > { %9164 = vrot.lane.b32.xlu0 %v9163_v3, %s9191_s17  ;;  %v6272_v3 = vld [vmem:[%s12174_s12 + $0x298] sm:$0xff]  ;;  %v6307_v5 = vld [vmem:[%s12174_s12 + $0x3b0] sm:$0xff] }
 0x889   : > { %v5995_v45 = vpop.f32.mrf.mxu1  ;;  %v11652_v36 = vpop.f32.mrf.mxu0  ;;  %v6308_v40 = vld [vmem:[%s12174_s12 + $0x3b8] sm:$0xff] }
 0x88b   : > { %v9061_v57 = vpop.f32.mrf.mxu1  ;;  %v9056_v42 = vpop.f32.mrf.mxu0 }
 0x88c   : > { %v6292_v57 = vld [vmem:[%s12174_s12 + $0x338] sm:$0xff]  ;;  %v6255_v42 = vld [vmem:[%s12174_s12 + $0x210] sm:$0xff] }
 0x88d   : > { %v6145_v46 = vpop.f32.mrf.mxu1  ;;  %v11654_v6 = vpop.f32.mrf.mxu0 }
 0x88e   : > { %v9168_v49 = vpack.i.bf16 %v5995_v45, %v6145_v46  ;;  %v6271_v46 = vld [vmem:[%s12174_s12 + $0x290] sm:$0xff] }
 0x88f   : > { %v9071_v51 = vpop.f32.mrf.mxu1  ;;  %v9066_v54 = vpop.f32.mrf.mxu0 }
 0x890   : > { %9169 = vrot.lane.b32.xlu1 %v9168_v49, %s9191_s17  ;;  %v6291_v54 = vld [vmem:[%s12174_s12 + $0x330] sm:$0xff] }
 0x8ea   : > { %v9155_v16 = vpop.permute.xlu0 %9154 }
 0x8eb   : > { %v9157_v20 = vunpack.i.h.bf16 %v9155_v16  ;;  %v9156_v53 = vunpack.i.l.bf16 %v9155_v16  ;;  %v6270_v16 = vld [vmem:[%s12174_s12 + $0x288] sm:$0xff] }
 0x8ed   : > { %v6182_v56 = vsel %vm1433_vm12, %v5170_v26, %v9156_v53  ;;  %v6181_v18 = vsel %vm1433_vm12, %v5020_v12, %v9157_v20  ;;  %v6315_v12 = vld [vmem:[%s12174_s12 + $0x3f0] sm:$0xff]  ;;  %v6261_v26 = vld [vmem:[%s12174_s12 + $0x240] sm:$0xff]  ;;  %v6306_v20 = vld [vmem:[%s12174_s12 + $0x3a8] sm:$0xff] }
 0x8ee   : > { %6382 = vmatprep.mubr.f32.mxu0 %v6182_v56  ;;  %v6254_v53 = vld [vmem:[%s12174_s12 + $0x208] sm:$0xff] }
 0x8ef   : > { %6383 = vmatmul.mubr.f32.vlgmr.msra.gmra.mxu0 %v6181_v18  ;;  %v6290_v56 = vld [vmem:[%s12174_s12 + $0x328] sm:$0xff] }
 0x8f0   : > { %8471 = vmatpush3.msra.mxu0 %v6268_v24 }
 0x8f1   : > { %8472 = vmatprep.subr.mxu0 %v6283_v52  ;;  %v6269_v52 = vld [vmem:[%s12174_s12 + $0x280] sm:$0xff] }
 0x8f2   : > { %8473 = vmatpush3.msra.mxu0 %v6267_v59  ;;  %v9160_v34 = vpop.permute.xlu1 %9159  ;;  %v6305_v59 = vld [vmem:[%s12174_s12 + $0x3a0] sm:$0xff] }
 0x8f3   : > { %v9162_v4 = vunpack.i.h.bf16 %v9160_v34  ;;  %v9161_v7 = vunpack.i.l.bf16 %v9160_v34  ;;  %8474 = vmatprep.subr.mxu0 %v6282_v60  ;;  %v6253_v60 = vld [vmem:[%s12174_s12 + $0x200] sm:$0xff] }
 0x8f4   : > { %8475 = vmatpush3.msra.mxu0 %v6266_v0  ;;  %v6289_v34 = vld [vmem:[%s12174_s12 + $0x320] sm:$0xff] }
 0x8f5   : > { %8476 = vmatprep.subr.mxu0 %v6281_v30  ;;  %v6184_v38 = vsel %vm1433_vm12, %v5470_v21, %v9161_v7  ;;  %v6183_v9 = vsel %vm1433_vm12, %v5320_v62, %v9162_v4  ;;  %v6311_v62 = vld [vmem:[%s12174_s12 + $0x3d0] sm:$0xff]  ;;  %v6310_v21 = vld [vmem:[%s12174_s12 + $0x3c8] sm:$0xff]  ;;  %v6304_v30 = vld [vmem:[%s12174_s12 + $0x398] sm:$0xff] }
 0x8f6   : > { %8477 = vmatpush3.msra.mxu0 %v6265_v1  ;;  %6452 = vmatprep.mubr.f32.mxu1 %v6184_v38  ;;  %v6288_v7 = vld [vmem:[%s12174_s12 + $0x318] sm:$0xff]  ;;  %v6303_v1 = vld [vmem:[%s12174_s12 + $0x390] sm:$0xff] }
 0x8f7   : > { %8478 = vmatprep.subr.mxu0 %v6280_v8  ;;  %6453 = vmatmul.mubr.f32.vlgmr.msra.gmra.mxu1 %v6183_v9  ;;  %v6286_v8 = vld [vmem:[%s12174_s12 + $0x308] sm:$0xff]  ;;  %v6301_v9 = vld [vmem:[%s12174_s12 + $0x380] sm:$0xff] }
 0x8f8   : > { %8479 = vmatpush3.msra.mxu0 %v6264_v61  ;;  %8506 = vmatpush3.msra.mxu1 %v6300_v27  ;;  %v6285_v61 = vld [vmem:[%s12174_s12 + $0x300] sm:$0xff] }
 0x8f9   : > { %8480 = vmatprep.subr.mxu0 %v6279_v11  ;;  %8507 = vmatprep.subr.mxu1 %v6315_v12  ;;  %v6654_v11 = vld [vmem:[%s12176_s14 + $0x1b8] sm:$0xff]  ;;  %v6656_v12 = vld [vmem:[%s12176_s14 + $0x1c8] sm:$0xff] }
 0x8fa   : > { %8481 = vmatpush3.msra.mxu0 %v6263_v15  ;;  %8508 = vmatpush3.msra.mxu1 %v6299_v2  ;;  %v9165_v45 = vpop.permute.xlu0 %9164  ;;  %v6653_v15 = vld [vmem:[%s12176_s14 + $0x1b0] sm:$0xff]  ;;  %v6636_v2 = vld [vmem:[%s12176_s14 + $0x128] sm:$0xff] }
 0x8fb   : > { %8482 = vmatprep.subr.mxu0 %v6278_v37  ;;  %8509 = vmatprep.subr.mxu1 %v6314_v13  ;;  %v9166_v51 = vunpack.i.l.bf16 %v9165_v45  ;;  %v9167_v24 = vunpack.i.h.bf16 %v9165_v45  ;;  %v6638_v37 = vld [vmem:[%s12176_s14 + $0x138] sm:$0xff]  ;;  %v6635_v13 = vld [vmem:[%s12176_s14 + $0x120] sm:$0xff] }
 0x8fc   : > { %8483 = vmatpush3.msra.mxu0 %v6262_v14  ;;  %8510 = vmatpush3.msra.mxu1 %v6298_v22  ;;  %v6637_v14 = vld [vmem:[%s12176_s14 + $0x130] sm:$0xff]  ;;  %v6618_v22 = vld [vmem:[%s12176_s14 + $0x98] sm:$0xff] }
 0x8fd   : > { %8484 = vmatprep.subr.mxu0 %v6277_v23  ;;  %8511 = vmatprep.subr.mxu1 %v6313_v25  ;;  %v6186_v0 = vsel %vm1433_vm12, %v11649_v35, %v9166_v51  ;;  %v6185_v35 = vsel %vm1433_vm12, %v11646_v29, %v9167_v24  ;;  %v6302_v29 = vld [vmem:[%s12174_s12 + $0x388] sm:$0xff]  ;;  %v6617_v25 = vld [vmem:[%s12176_s14 + $0x90] sm:$0xff]  ;;  %v6659_v51 = vld [vmem:[%s12176_s14 + $0x1e0] sm:$0xff] }
 0x8fe   : > { %8485 = vmatpush3.msra.mxu0 %v6261_v26  ;;  %8512 = vmatpush3.msra.mxu1 %v6297_v55  ;;  %v6620_v23 = vld [vmem:[%s12176_s14 + $0xa8] sm:$0xff]  ;;  %v6619_v26 = vld [vmem:[%s12176_s14 + $0xa0] sm:$0xff] }
 0x8ff   : > { %8486 = vmatprep.subr.mxu0 %v6276_v28  ;;  %8513 = vmatprep.subr.mxu1 %v6312_v31  ;;  %v6600_v55 = vld [vmem:[%s12176_s14 + $0x8] sm:$0xff]  ;;  %v6602_v28 = vld [vmem:[%s12176_s14 + $0x18] sm:$0xff]  ;;  %v6599_v31 = vld [vmem:[%s12176_s14] sm:$0xff] }
 0x900   : > { %8487 = vmatpush3.msra.mxu0 %v6260_v47  ;;  %8514 = vmatpush3.msra.mxu1 %v6296_v10  ;;  %v6601_v47 = vld [vmem:[%s12176_s14 + $0x10] sm:$0xff]  ;;  %v6658_v10 = vld [vmem:[%s12176_s14 + $0x1d8] sm:$0xff]  ;;  %v6623_v24 = vld [vmem:[%s12176_s14 + $0xc0] sm:$0xff] }
 0x901   : > { %8488 = vmatprep.subr.mxu0 %v6275_v44  ;;  %8515 = vmatprep.subr.mxu1 %v6311_v62  ;;  %v6660_v44 = vld [vmem:[%s12176_s14 + $0x1e8] sm:$0xff] }
 0x902   : > { %8489 = vmatpush3.msra.mxu0 %v6259_v32  ;;  %8516 = vmatpush3.msra.mxu1 %v6295_v50  ;;  %v9170_v49 = vpop.permute.xlu1 %9169 }
 0x903   : > { %8490 = vmatprep.subr.mxu0 %v6274_v33  ;;  %8517 = vmatprep.subr.mxu1 %v6310_v21  ;;  %v9171_v18 = vunpack.i.l.bf16 %v9170_v49  ;;  %v9172_v38 = vunpack.i.h.bf16 %v9170_v49  ;;  %v6657_v49 = vld [vmem:[%s12176_s14 + $0x1d0] sm:$0xff] }
 0x904   : > { %8491 = vmatpush3.msra.mxu0 %v6258_v43  ;;  %8518 = vmatpush3.msra.mxu1 %v6294_v17  ;;  %v6317_v17 = vld [vmem:[%s12175_s13] sm:$0x1] }
 0x905   : > { %8492 = vmatprep.subr.mxu0 %v6273_v39  ;;  %8519 = vmatprep.subr.mxu1 %v6309_v48  ;;  %v6188_v4 = vsel %vm1433_vm12, %v11654_v6, %v9171_v18  ;;  %v6287_v6 = vld [vmem:[%s12174_s12 + $0x310] sm:$0xff]  ;;  %v6187_v27 = vsel %vm1433_vm12, %v11652_v36, %v9172_v38  ;;  %v6655_v36 = vld [vmem:[%s12176_s14 + $0x1c0] sm:$0xff]  ;;  %v6628_v38 = vld [vmem:[%s12176_s14 + $0xe8] sm:$0xff] }
 0x906   : > { %8493 = vmatpush3.msra.mxu0 %v6257_v63  ;;  %8520 = vmatpush3.msra.mxu1 %v6293_v19  ;;  %v6621_v18 = vld [vmem:[%s12176_s14 + $0xb0] sm:$0xff] }
 0x907   : > { %8494 = vmatprep.subr.mxu0 %v6272_v3  ;;  %8521 = vmatprep.subr.mxu1 %v6308_v40 }
 0x908   : > { %8495 = vmatpush3.msra.mxu0 %v6256_v41  ;;  %8522 = vmatpush3.msra.mxu1 %v6292_v57 }
 0x909   : > { %8496 = vmatprep.subr.mxu0 %v6271_v46  ;;  %8523 = vmatprep.subr.mxu1 %v6307_v5 }
 0x90a   : > { %8497 = vmatpush3.msra.mxu0 %v6255_v42  ;;  %8524 = vmatpush3.msra.mxu1 %v6291_v54  ;;  %v6640_v42 = vld [vmem:[%s12176_s14 + $0x148] sm:$0xff]  ;;  %v6642_v54 = vld [vmem:[%s12176_s14 + $0x158] sm:$0xff] }
 0x90b   : > { %8498 = vmatprep.subr.mxu0 %v6270_v16  ;;  %8525 = vmatprep.subr.mxu1 %v6306_v20  ;;  %v6639_v16 = vld [vmem:[%s12176_s14 + $0x140] sm:$0xff]  ;;  %v6641_v20 = vld [vmem:[%s12176_s14 + $0x150] sm:$0xff] }
 0x90c   : > { %8499 = vmatpush3.msra.mxu0 %v6254_v53  ;;  %8526 = vmatpush3.msra.mxu1 %v6290_v56  ;;  %v6622_v53 = vld [vmem:[%s12176_s14 + $0xb8] sm:$0xff]  ;;  %v6624_v56 = vld [vmem:[%s12176_s14 + $0xc8] sm:$0xff] }
 0x90d   : > { %8500 = vmatprep.subr.mxu0 %v6269_v52  ;;  %8527 = vmatprep.subr.mxu1 %v6305_v59  ;;  %v6604_v52 = vld [vmem:[%s12176_s14 + $0x28] sm:$0xff]  ;;  %v6606_v59 = vld [vmem:[%s12176_s14 + $0x38] sm:$0xff] }
 0x90e   : > { %8501 = vmatpush3.msra.mxu0 %v6253_v60  ;;  %6522 = vmatprep.mubr.f32.mxu0 %v6186_v0  ;;  %v6603_v60 = vld [vmem:[%s12176_s14 + $0x20] sm:$0xff]  ;;  %v6605_v0 = vld [vmem:[%s12176_s14 + $0x30] sm:$0xff] }
 0x90f   : > { %8528 = vmatpush3.msra.mxu1 %v6289_v34  ;;  %6523 = vmatmul.mubr.f32.vlgmr.msra.gmra.mxu0 %v6185_v35  ;;  %v6662_v34 = vld [vmem:[%s12176_s14 + $0x1f8] sm:$0xff]  ;;  %v6663_v35 = vld [vmem:[%s12176_s14 + $0x200] sm:$0xff] }
 0x910   : > { %8529 = vmatprep.subr.mxu1 %v6304_v30  ;;  %6592 = vmatprep.mubr.f32.mxu1 %v6188_v4  ;;  %v6664_v30 = vld [vmem:[%s12176_s14 + $0x208] sm:$0xff]  ;;  %v6661_v4 = vld [vmem:[%s12176_s14 + $0x1f0] sm:$0xff] }
 0x911   : > { %8530 = vmatpush3.msra.mxu1 %v6288_v7  ;;  %6834 = vmatprep.mubr.f32.mxu0 %v9192_v58  ;;  %v6644_v7 = vld [vmem:[%s12176_s14 + $0x168] sm:$0xff] }
 0x912   : > { %8531 = vmatprep.subr.mxu1 %v6303_v1  ;;  %6794 = vmatprep.subr.mxu0 %v6654_v11  ;;  %v6646_v1 = vld [vmem:[%s12176_s14 + $0x178] sm:$0xff] }
 0x913   : > { %8532 = vmatpush3.msra.mxu1 %v6287_v6  ;;  %6795 = vmatpush1.msra.mxu0 %v6653_v15  ;;  %v6643_v6 = vld [vmem:[%s12176_s14 + $0x160] sm:$0xff]  ;;  %v6610_v11 = vld [vmem:[%s12176_s14 + $0x58] sm:$0xff]  ;;  %v6609_v15 = vld [vmem:[%s12176_s14 + $0x50] sm:$0xff] }
 0x914   : > { %8533 = vmatprep.subr.mxu1 %v6302_v29  ;;  %6796 = vmatprep.subr.mxu0 %v6636_v2  ;;  %v6645_v29 = vld [vmem:[%s12176_s14 + $0x170] sm:$0xff]  ;;  %v6668_v2 = vld [vmem:[%s12176_s14 + $0x228] sm:$0xff] }
 0x915   : > { %8534 = vmatpush3.msra.mxu1 %v6286_v8  ;;  %6797 = vmatpush1.msra.mxu0 %v6635_v13  ;;  %v6626_v8 = vld [vmem:[%s12176_s14 + $0xd8] sm:$0xff]  ;;  %v6667_v13 = vld [vmem:[%s12176_s14 + $0x220] sm:$0xff] }
 0x916   : > { %8535 = vmatprep.subr.mxu1 %v6301_v9  ;;  %6798 = vmatprep.subr.mxu0 %v6618_v22  ;;  %v6625_v9 = vld [vmem:[%s12176_s14 + $0xd0] sm:$0xff]  ;;  %v6650_v22 = vld [vmem:[%s12176_s14 + $0x198] sm:$0xff] }
 0x917   : > { %8536 = vmatpush3.msra.mxu1 %v6285_v61  ;;  %6799 = vmatpush1.msra.mxu0 %v6617_v25  ;;  %v6627_v61 = vld [vmem:[%s12176_s14 + $0xe0] sm:$0xff]  ;;  %v6649_v25 = vld [vmem:[%s12176_s14 + $0x190] sm:$0xff] }
 0x918   : > { %6593 = vmatmul.mubr.f32.vlgmr.msra.gmra.mxu1 %v6187_v27  ;;  %6865 = vmatprep.subr.mxu1 %v6656_v12  ;;  %v6608_v27 = vld [vmem:[%s12176_s14 + $0x48] sm:$0xff]  ;;  %v6607_v12 = vld [vmem:[%s12176_s14 + $0x40] sm:$0xff] }
 0x919   : > { %6905 = vmatprep.mubr.f32.mxu1 %v9192_v58  ;;  %6866 = vmatpush1.msra.mxu1 %v6655_v36  ;;  %v6666_v36 = vld [vmem:[%s12176_s14 + $0x218] sm:$0xff] }
 0x91a   : > { %6867 = vmatprep.subr.mxu1 %v6638_v37  ;;  %6800 = vmatprep.subr.mxu0 %v6600_v55  ;;  %v6665_v37 = vld [vmem:[%s12176_s14 + $0x210] sm:$0xff]  ;;  %v6632_v55 = vld [vmem:[%s12176_s14 + $0x108] sm:$0xff] }
 0x91b   : > { %6868 = vmatpush1.msra.mxu1 %v6637_v14  ;;  %6801 = vmatpush1.msra.mxu0 %v6599_v31  ;;  %v6648_v14 = vld [vmem:[%s12176_s14 + $0x188] sm:$0xff]  ;;  %v6631_v31 = vld [vmem:[%s12176_s14 + $0x100] sm:$0xff] }
 0x91c   : > { %6869 = vmatprep.subr.mxu1 %v6620_v23  ;;  %6936 = vmatprep.subr.mxu0 %v6658_v10  ;;  %v6647_v23 = vld [vmem:[%s12176_s14 + $0x180] sm:$0xff]  ;;  %v6614_v10 = vld [vmem:[%s12176_s14 + $0x78] sm:$0xff] }
 0x91d   : > { %6870 = vmatpush1.msra.mxu1 %v6619_v26  ;;  %v6630_v26 = vld [vmem:[%s12176_s14 + $0xf8] sm:$0xff] }
 0x91e   : > { %6871 = vmatprep.subr.mxu1 %v6602_v28  ;;  %v6629_v28 = vld [vmem:[%s12176_s14 + $0xf0] sm:$0xff] }
 0x91f   : > { %6872 = vmatpush1.msra.mxu1 %v6601_v47  ;;  %v6612_v47 = vld [vmem:[%s12176_s14 + $0x68] sm:$0xff] }
 0x920   : > { %7007 = vmatprep.subr.mxu1 %v6660_v44  ;;  %v6611_v44 = vld [vmem:[%s12176_s14 + $0x60] sm:$0xff] }
 0x9af   : > { %v8432_v62 = vpop.f32.mrf.mxu0 }
 0x9b1   : > { %v8433_v32 = vpop.f32.mrf.mxu0 }
 0x9b2   : > { %v8434_v43 = vadd.f32 %v8433_v32, %v8432_v62  ;;  %v6613_v62 = vld [vmem:[%s12176_s14 + $0x70] sm:$0xff]  ;;  %v6670_v32 = vld [vmem:[%s12176_s14 + $0x238] sm:$0xff] }
 0x9b4   : > { %v6385_v63 = vadd.f32 %v8434_v43, %v6317_v17  ;;  %v6634_v43 = vld [vmem:[%s12176_s14 + $0x118] sm:$0xff]  ;;  %v6633_v17 = vld [vmem:[%s12176_s14 + $0x110] sm:$0xff] }
 0x9b7   : > { %v8467_v50 = vpop.f32.mrf.mxu1 }
 0x9b9   : > { %v8468_v21 = vpop.f32.mrf.mxu1 }
 0x9ba   : > { %v8469_v48 = vadd.f32 %v8468_v21, %v8467_v50  ;;  %v6669_v50 = vld [vmem:[%s12176_s14 + $0x230] sm:$0xff]  ;;  %v6651_v21 = vld [vmem:[%s12176_s14 + $0x1a0] sm:$0xff] }
 0x9bc   : > { %v6455_v40 = vadd.f32 %v8469_v48, %v6385_v63  ;;  %v6677_v48 = vlaneseq }
 0x9be   : > { %v12103_v63 = vshrl.u32 %v6677_v48, 7  ;;  %vm7547_vm14 = vcmp.lt.s32.totalorder %v6677_v48, 256 }
 0x9cf   : > { %v8502_v33 = vpop.f32.mrf.mxu0 }
 0x9d1   : > { %v8503_v39 = vpop.f32.mrf.mxu0 }
 0x9d2   : > { %v8504_v19 = vadd.f32 %v8503_v39, %v8502_v33  ;;  %v6652_v33 = vld [vmem:[%s12176_s14 + $0x1a8] sm:$0xff] }
 0x9d3   : > { %v6616_v39 = vld [vmem:[%s12176_s14 + $0x88] sm:$0xff] }
 0x9d4   : > { %v6525_v41 = vadd.f32 %v8504_v19, %v6455_v40  ;;  %v12106_v19 = vsub.s32 1, %v12103_v63  ;;  %v12110_v40 = vsub.s32 0, %v12103_v63 }
 0x9d8   : > { %v8537_v3 = vpop.f32.mrf.mxu1 }
 0x9da   : > { %v8538_v45 = vpop.f32.mrf.mxu1 }
 0x9db   : > { %v8539_v57 = vadd.f32 %v8538_v45, %v8537_v3  ;;  %v6691_v3 = vsub.s32 3, %v12103_v63  ;;  %v6687_v45 = vsub.s32 2, %v12103_v63 }
 0x9dd   : > { %v6595_v46 = vadd.f32 %v8539_v57, %v6525_v41  ;;  %v6671_v41 = vld [vmem:[%s12177_s15] sm:$0xff]  ;;  %v9194_v57 = vmov 1966171168  }
 0x9df   : > { %v11913_v5 = vmax.f32 %v6595_v46, 0.0  ;;  %v7432_v46 = vunpack.c.l.s4 %v9194_v57 }
 0x9e1   : > { %7834 = vmatmul.mubr.msk.f32.vlgmr.msra.gmra.mxu0 %vm1268_vm10, %v11913_v5  ;;  %7835 = vmatmul.mubr.msk.f32.vlgmr.msra.gmra.mxu1 %vm1268_vm10, %v11913_v5 }
 0x9e2   : > { %6937 = vmatpush1.msra.mxu0 %v6657_v49  ;;  %7008 = vmatpush1.msra.mxu1 %v6659_v51  ;;  %v6692_v49 = vrot.slane %v6671_v41, %v6691_v3 }
 0x9e3   : > { %6938 = vmatprep.subr.mxu0 %v6640_v42  ;;  %7009 = vmatprep.subr.mxu1 %v6642_v54  ;;  %v6680_v54 = vrot.slane %v6671_v41, %v12110_v40 }
 0x9e4   : > { %6939 = vmatpush1.msra.mxu0 %v6639_v16  ;;  %7010 = vmatpush1.msra.mxu1 %v6641_v20  ;;  %v6688_v16 = vrot.slane %v6671_v41, %v6687_v45 }
 0x9e5   : > { %6940 = vmatprep.subr.mxu0 %v6622_v53  ;;  %7011 = vmatprep.subr.mxu1 %v6624_v56  ;;  %v7433_v56 = vunpack.c.0.s8 %v7432_v46 }
 0x9e6   : > { %6941 = vmatpush1.msra.mxu0 %v6621_v18  ;;  %7012 = vmatpush1.msra.mxu1 %v6623_v24 }
 0x9e7   : > { %6942 = vmatprep.subr.mxu0 %v6604_v52  ;;  %7013 = vmatprep.subr.mxu1 %v6606_v59  ;;  %v6695_v52 = vsub.s32 4, %v12103_v63  ;;  %v6703_v59 = vsub.s32 6, %v12103_v63 }
 0x9e8   : > { %6943 = vmatpush1.msra.mxu0 %v6603_v60  ;;  %6976 = vmatprep.mubr.f32.mxu0 %v9192_v58  ;;  %v6699_v60 = vsub.s32 5, %v12103_v63 }
 0x9e9   : > { %7014 = vmatpush1.msra.mxu1 %v6605_v0  ;;  %7047 = vmatprep.mubr.f32.mxu1 %v9192_v58  ;;  %v6707_v0 = vsub.s32 7, %v12103_v63 }
 0x9ea   : > { %7836 = vmatmul.mubr.msk.f32.vlgmr.msra.gmra.mxu0 %vm1268_vm10, %v11913_v5  ;;  %7837 = vmatmul.mubr.msk.f32.vlgmr.msra.gmra.mxu1 %vm1268_vm10, %v11913_v5 }
 0x9eb   : > { %7078 = vmatprep.subr.mxu0 %v6662_v34  ;;  %7149 = vmatprep.subr.mxu1 %v6664_v30 }
 0x9ec   : > { %7079 = vmatpush1.msra.mxu0 %v6661_v4  ;;  %7150 = vmatpush1.msra.mxu1 %v6663_v35  ;;  %v12123_v4 = vsub.s32 %v7433_v56, %v12103_v63 }
 0x9ed   : > { %7080 = vmatprep.subr.mxu0 %v6644_v7  ;;  %7151 = vmatprep.subr.mxu1 %v6646_v1  ;;  %v6696_v1 = vrot.slane %v6671_v41, %v6695_v52 }
 0x9ee   : > { %7081 = vmatpush1.msra.mxu0 %v6643_v6  ;;  %7152 = vmatpush1.msra.mxu1 %v6645_v29  ;;  %v6704_v6 = vrot.slane %v6671_v41, %v6703_v59  ;;  %v6700_v29 = vrot.slane %v6671_v41, %v6699_v60 }
 0x9ef   : > { %7082 = vmatprep.subr.mxu0 %v6626_v8  ;;  %7153 = vmatprep.subr.mxu1 %v6628_v38  ;;  %v6708_v8 = vrot.slane %v6671_v41, %v6707_v0 }
 0x9f0   : > { %7083 = vmatpush1.msra.mxu0 %v6625_v9  ;;  %7154 = vmatpush1.msra.mxu1 %v6627_v61 }
 0x9f1   : > { %7084 = vmatprep.subr.mxu0 %v6608_v27  ;;  %7155 = vmatprep.subr.mxu1 %v6610_v11 }
 0x9f2   : > { %7085 = vmatpush1.msra.mxu0 %v6607_v12  ;;  %7118 = vmatprep.mubr.f32.mxu0 %v9192_v58 }
 0x9f3   : > { %7156 = vmatpush1.msra.mxu1 %v6609_v15  ;;  %7189 = vmatprep.mubr.f32.mxu1 %v9192_v58 }
 0x9f4   : > { %7838 = vmatmul.mubr.msk.f32.vlgmr.msra.gmra.mxu0 %vm1268_vm10, %v11913_v5  ;;  %7839 = vmatmul.mubr.msk.f32.vlgmr.msra.gmra.mxu1 %vm1268_vm10, %v11913_v5 }
 0x9f5   : > { %7220 = vmatprep.subr.mxu0 %v6666_v36  ;;  %7291 = vmatprep.subr.mxu1 %v6668_v2 }
 0x9f6   : > { %7221 = vmatpush1.msra.mxu0 %v6665_v37  ;;  %7292 = vmatpush1.msra.mxu1 %v6667_v13 }
 0x9f7   : > { %7222 = vmatprep.subr.mxu0 %v6648_v14  ;;  %7293 = vmatprep.subr.mxu1 %v6650_v22 }
 0x9f8   : > { %7223 = vmatpush1.msra.mxu0 %v6647_v23  ;;  %7294 = vmatpush1.msra.mxu1 %v6649_v25 }
 0x9f9   : > { %7224 = vmatprep.subr.mxu0 %v6630_v26  ;;  %7295 = vmatprep.subr.mxu1 %v6632_v55  ;;  %v6672_v55 = vld [vmem:[%s12177_s15 + $0x8] sm:$0xff] }
 0x9fa   : > { %7225 = vmatpush1.msra.mxu0 %v6629_v28  ;;  %7296 = vmatpush1.msra.mxu1 %v6631_v31  ;;  %v6728_v57 = vrot.slane %v6672_v55, %v6695_v52  ;;  %v6736_v46 = vrot.slane %v6672_v55, %v6703_v59  ;;  %v6673_v52 = vld [vmem:[%s12177_s15 + $0x10] sm:$0x3] }
 0x9fb   : > { %7226 = vmatprep.subr.mxu0 %v6612_v47  ;;  %7297 = vmatprep.subr.mxu1 %v6614_v10  ;;  %v6716_v47 = vrot.slane %v6672_v55, %v12106_v19  ;;  %v6724_v10 = vrot.slane %v6672_v55, %v6691_v3 }
 0x9fc   : > { %7227 = vmatpush1.msra.mxu0 %v6611_v44  ;;  %7260 = vmatprep.mubr.f32.mxu0 %v9192_v58 }
 0x9fd   : > { %7298 = vmatpush1.msra.mxu1 %v6613_v62  ;;  %7331 = vmatprep.mubr.f32.mxu1 %v9192_v58 }
 0x9fe   : > { %7840 = vmatmul.mubr.msk.f32.vlgmr.msra.gmra.mxu0 %vm1268_vm10, %v11913_v5  ;;  %7841 = vmatmul.mubr.msk.f32.vlgmr.msra.gmra.mxu1 %vm1268_vm10, %v11913_v5 }
 0x9ff   : > { %7362 = vmatprep.subr.mxu0 %v6670_v32  ;;  %7402 = vmatprep.mubr.f32.mxu0 %v9192_v58  ;;  %v6615_v58 = vld [vmem:[%s12176_s14 + $0x80] sm:$0xff]  ;;  %v6712_v32 = vrot.slane %v6672_v55, %v12110_v40 }
 0xa00   : > { %7363 = vmatpush1.msra.mxu0 %v6669_v50  ;;  %v6720_v50 = vrot.slane %v6672_v55, %v6687_v45 }
 0xa01   : > { %7364 = vmatprep.subr.mxu0 %v6652_v33 }
 0xa02   : > { %7365 = vmatpush1.msra.mxu0 %v6651_v21 }
 0xa03   : > { %7366 = vmatprep.subr.mxu0 %v6634_v43 }
 0xa04   : > { %7367 = vmatpush1.msra.mxu0 %v6633_v17 }
 0xa05   : > { %7368 = vmatprep.subr.mxu0 %v6616_v39 }
 0xa06   : > { %7369 = vmatpush1.msra.mxu0 %v6615_v58 }
 0xa07   : > { %7842 = vmatmul.mubr.msk.f32.vlgmr.msra.gmra.mxu0 %vm1268_vm10, %v11913_v5  ;;  %v6684_v5 = vrot.slane %v6671_v41, %v12106_v19 }
 0xaa1   : > { %v6836_v51 = vpop.f32.mrf.mxu0  ;;  %v6907_v42 = vpop.f32.mrf.mxu1 }
 0xaa2   : > { %v6837_v34 = vadd.f32 %v6836_v51, %v6680_v54  ;;  %v6908_v30 = vadd.f32 %v6907_v42, %v6688_v16 }
 0xaa3   : > { %v6838_v20 = vpop.f32.mrf.mxu0  ;;  %v6909_v53 = vpop.f32.mrf.mxu1 }
 0xaa4   : > { %v6839_v18 = vadd.f32 %v6838_v20, %v6684_v5  ;;  %v6910_v24 = vadd.f32 %v6909_v53, %v6692_v49  ;;  %v6732_v5 = vrot.slane %v6672_v55, %v6699_v60  ;;  %v6740_v49 = vrot.slane %v6672_v55, %v6707_v0 }
 0xaa6   : > { %v7427_v35 = vcombine.low %v6837_v34, %v6839_v18  ;;  %v7428_v7 = vcombine.low %v6908_v30, %v6910_v24 }
 0xaa8   : > { %v7437_v61 = vrot.slane %v7427_v35, %v12123_v4  ;;  %v7444_v27 = vrot.slane %v7428_v7, %v12123_v4  ;;  %v6744_v35 = vrot.slane %v6673_v52, %v12110_v40  ;;  %v6748_v7 = vrot.slane %v6673_v52, %v12106_v19 }
 0xaaa   : > { %v6978_v38 = vpop.f32.mrf.mxu0  ;;  %v7049_v9 = vpop.f32.mrf.mxu1  ;;  %v7459_v22 = vcombine.low %v7437_v61, %v7444_v27 }
 0xaab   : > { %v6979_v15 = vadd.f32 %v6978_v38, %v6696_v1  ;;  %v7050_v36 = vadd.f32 %v7049_v9, %v6704_v6 }
 0xaac   : > { %v6980_v11 = vpop.f32.mrf.mxu0  ;;  %v7051_v12 = vpop.f32.mrf.mxu1  ;;  %v7467_v44 = vrot.slane %v7459_v22, %v12123_v4 }
 0xaad   : > { %v6981_v2 = vadd.f32 %v6980_v11, %v6700_v29  ;;  %v7052_v37 = vadd.f32 %v7051_v12, %v6708_v8 }
 0xaaf   : > { %v7429_v13 = vcombine.low %v6979_v15, %v6981_v2  ;;  %v7430_v14 = vcombine.low %v7050_v36, %v7052_v37 }
 0xab1   : > { %v7451_v23 = vrot.slane %v7429_v13, %v12123_v4  ;;  %v7458_v25 = vrot.slane %v7430_v14, %v12123_v4 }
 0xab3   : > { %v7460_v26 = vcombine.low %v7451_v23, %v7458_v25 }
 0xab4   : > { %v7120_v28 = vpop.f32.mrf.mxu0  ;;  %v7191_v31 = vpop.f32.mrf.mxu1 }
 0xab5   : > { %v7474_v62 = vrot.slane %v7460_v26, %v12123_v4  ;;  %v7121_v58 = vadd.f32 %v7120_v28, %v6712_v32  ;;  %v7192_v63 = vadd.f32 %v7191_v31, %v6720_v50 }
 0xab6   : > { %v7122_v33 = vpop.f32.mrf.mxu0  ;;  %v7193_v21 = vpop.f32.mrf.mxu1 }
 0xab7   : > { %v7475_v43 = vcombine.low %v7467_v44, %v7474_v62  ;;  %v7123_v17 = vadd.f32 %v7122_v33, %v6716_v47  ;;  %v7194_v39 = vadd.f32 %v7193_v21, %v6724_v10 }
 0xab9   : > { %7543 = vst [vmem:[%s12139_s28] sm:$0xff] %v7475_v43  ;;  %v7476_v3 = vcombine.low %v7121_v58, %v7123_v17  ;;  %v7477_v41 = vcombine.low %v7192_v63, %v7194_v39 }
 0xabb   : > { %v7486_v54 = vrot.slane %v7476_v3, %v12123_v4  ;;  %v7493_v45 = vrot.slane %v7477_v41, %v12123_v4 }
 0xabd   : > { %v7508_v59 = vcombine.low %v7486_v54, %v7493_v45 }
 0xabe   : > { %v7262_v51 = vpop.f32.mrf.mxu0  ;;  %v7333_v42 = vpop.f32.mrf.mxu1 }
 0xabf   : > { %v7263_v53 = vadd.f32 %v7262_v51, %v6728_v57  ;;  %v7334_v56 = vadd.f32 %v7333_v42, %v6736_v46  ;;  %v7516_v29 = vrot.slane %v7508_v59, %v12123_v4 }
 0xac0   : > { %v7264_v16 = vpop.f32.mrf.mxu0  ;;  %v7335_v20 = vpop.f32.mrf.mxu1 }
 0xac1   : > { %v7265_v18 = vadd.f32 %v7264_v16, %v6732_v5  ;;  %v7336_v24 = vadd.f32 %v7335_v20, %v6740_v49 }
 0xac3   : > { %v7478_v34 = vcombine.low %v7263_v53, %v7265_v18  ;;  %v7479_v30 = vcombine.low %v7334_v56, %v7336_v24 }
 0xac5   : > { %v7500_v60 = vrot.slane %v7478_v34, %v12123_v4  ;;  %v7507_v0 = vrot.slane %v7479_v30, %v12123_v4 }
 0xac7   : > { %v7509_v1 = vcombine.low %v7500_v60, %v7507_v0  ;;  %v7404_v6 = vpop.f32.mrf.mxu0 }
 0xac8   : > { %v7405_v9 = vadd.f32 %v7404_v6, %v6744_v35 }
 0xac9   : > { %v7523_v8 = vrot.slane %v7509_v1, %v12123_v4  ;;  %v7406_v38 = vpop.f32.mrf.mxu0 }
 0xaca   : > { %v7407_v61 = vadd.f32 %v7406_v38, %v6748_v7 }
 0xacb   : > { %v7524_v27 = vcombine.low %v7516_v29, %v7523_v8 }
 0xacc   : > { %v7525_v11 = vcombine.low %v7405_v9, %v7407_v61 }
 0xacd   : > { %7544 = vst [vmem:[%s12139_s28 + $0x8] sm:$0xff] %v7524_v27 }
 0xace   : > { %v7532_v12 = vrot.slane %v7525_v11, %v12123_v4 }
 0xad0   : > { %v7539_v40 = vrot.slane %v7532_v12, %v12123_v4 }
 0xad2   : > { %7549 = vst.msk [vmem:[%s12139_s28 + $0x10] sm:$0x3] %vm7547_vm14, %v7539_v40 }
 0xad3 PF: > { %s26_s21 = sadd.s32 1, %s9181_s21  }
 0xad4   : > { %p23_p4 = scmp.ge.s32.totalorder %s26_s21, 4  }
 0xad6   :  { %25 = sbr.rel (!%p23_p4) target bundleno = 2 (0x2), region = 167 }

</bundles_post_ra>
